<compile_context>
chip_gen: v5e
topology: v5e:2x2
jax: 0.10.0
libtpu: 0.0.40
codegen_flags: <defaults>
</compile_context>

<pallas_src>
import functools
import math

import jax
import jax.numpy as jnp
from jax import lax
from jax.experimental import pallas as pl
from jax.experimental.pallas import tpu as pltpu


# ---------------------------------------------------------------------------
# VMEM budgeting helpers (generation aware).
# ---------------------------------------------------------------------------
def _padded_block_bytes(shape, itemsize=4):
    """VMEM footprint of one f32 block, accounting for (8, 128) tile padding."""
    shape = tuple(int(d) for d in shape)
    if len(shape) == 1:
        shape = (1,) + shape
    lead = 1
    for d in shape[:-2]:
        lead *= d
    sub = -(-shape[-2] // 8) * 8
    lane = -(-shape[-1] // 128) * 128
    return lead * sub * lane * itemsize


def _vmem_limit(bytes_needed):
    """What the kernel actually needs (+headroom), capped at 3/4 of VMEM capacity."""
    try:
        cap = int(pltpu.get_tpu_info().vmem_capacity_bytes)
    except Exception:
        cap = 64 * 1024 * 1024      # conservative fallback = v7x per-core capacity
    want = int(bytes_needed * 1.25) + (4 << 20)
    return int(max(16 << 20, min(want, (cap * 3) // 4)))


# ---------------------------------------------------------------------------
# Conv 3x3 (valid, stride 1) + bias + ReLU, fused in one kernel per image.
# ---------------------------------------------------------------------------
def _conv3x3_relu_kernel(x_ref, w_ref, b_ref, o_ref, *, img_w, out_len):
    # x_ref: (1, Cin, Lin)   flattened-spatial input, channels on sublanes
    # w_ref: (9, Cout, Cin)  one (Cout, Cin) matrix per filter tap
    # b_ref: (Cout, 1)
    # o_ref: (1, Cout, out_len)   lane p = h*img_w + w
    for t in range(9):
        i, j = divmod(t, 3)
        xs = x_ref[0, :, pl.ds(i * img_w + j, out_len)]          # (Cin, out_len)
        contrib = jnp.dot(w_ref[t], xs, preferred_element_type=jnp.float32)
        if t == 0:
            o_ref[0] = contrib
        else:
            o_ref[0] += contrib
    o_ref[0] = jnp.maximum(o_ref[0] + b_ref[...], 0.0)


def conv3x3_relu_pallas(x, w_taps, b, *, img_w, in_h, in_w):
    """x: (B, Cin, Lin) flattened NCHW; returns (B, Cout, out_len) with
    out_len = (in_h - 3) * img_w + (in_w - 2); lane p = h*img_w + w is valid for
    w < in_w - 2 (remaining lanes are ignored wrap-around values)."""
    B, Cin, Lin = x.shape
    _, Cout, _ = w_taps.shape
    Ho, Wo = in_h - 2, in_w - 2
    out_len = (Ho - 1) * img_w + Wo
    assert 2 * img_w + 2 + out_len <= Lin

    need = (2 * _padded_block_bytes((Cin, Lin))
            + 2 * _padded_block_bytes((Cout, out_len))
            + _padded_block_bytes((9, Cout, Cin))
            + _padded_block_bytes((Cout, 1)))

    return pl.pallas_call(
        functools.partial(_conv3x3_relu_kernel, img_w=img_w, out_len=out_len),
        out_shape=jax.ShapeDtypeStruct((B, Cout, out_len), jnp.float32),
        grid=(B,),
        in_specs=[
            pl.BlockSpec((1, Cin, Lin), lambda n: (n, 0, 0)),   # one image, resident
            pl.BlockSpec((9, Cout, Cin), lambda n: (0, 0, 0)),  # taps, fetched once
            pl.BlockSpec((Cout, 1), lambda n: (0, 0)),
        ],
        out_specs=pl.BlockSpec((1, Cout, out_len), lambda n: (n, 0, 0)),
        compiler_params=pltpu.CompilerParams(
            dimension_semantics=("parallel",),      # images across TensorCores (v7x)
            vmem_limit_bytes=_vmem_limit(need),
        ),
    )(x, w_taps, b)


# ---------------------------------------------------------------------------
# Fused fc1(+ReLU)+fc2, K-tiled with a resident f32 accumulator (P3 pattern).
# ---------------------------------------------------------------------------
def _fc_fused_kernel(x_ref, w1_ref, b1_ref, w2_ref, b2_ref, o_ref, acc_ref):
    k = pl.program_id(0)

    @pl.when(k == 0)
    def _():
        acc_ref[...] = jnp.zeros_like(acc_ref)

    acc_ref[...] += jnp.dot(x_ref[...], w1_ref[...],
                            preferred_element_type=jnp.float32)

    @pl.when(k == pl.num_programs(0) - 1)
    def _():
        h = jnp.maximum(acc_ref[...] + b1_ref[...], 0.0)                 # fc1 + ReLU
        o_ref[...] = (jnp.dot(h, w2_ref[...], preferred_element_type=jnp.float32)
                      + b2_ref[...]).astype(o_ref.dtype)                 # fc2


def fc_fused_pallas(x, w1, b1, w2, b2, *, tk):
    B, K = x.shape
    Kp, H1 = w1.shape
    N2 = w2.shape[1]
    if K != Kp:                       # zero-pad K of the (tiny, B-row) activations
        x = jnp.pad(x, ((0, 0), (0, Kp - K)))
    assert Kp % tk == 0
    n_k = Kp // tk

    need = (2 * _padded_block_bytes((B, tk))
            + 2 * _padded_block_bytes((tk, H1))
            + _padded_block_bytes((H1, N2))
            + _padded_block_bytes((1, H1))
            + _padded_block_bytes((1, N2))
            + _padded_block_bytes((B, N2))
            + _padded_block_bytes((B, H1)))

    # Note: fc1 is HBM-bound on weight streaming, so a single-core K loop is fine.
    return pl.pallas_call(
        _fc_fused_kernel,
        out_shape=jax.ShapeDtypeStruct((B, N2), jnp.float32),
        grid=(n_k,),
        in_specs=[
            pl.BlockSpec((B, tk), lambda k: (0, k)),
            pl.BlockSpec((tk, H1), lambda k: (k, 0)),
            pl.BlockSpec((1, H1), lambda k: (0, 0)),
            pl.BlockSpec((H1, N2), lambda k: (0, 0)),
            pl.BlockSpec((1, N2), lambda k: (0, 0)),
        ],
        out_specs=pl.BlockSpec((B, N2), lambda k: (0, 0)),
        scratch_shapes=[pltpu.VMEM((B, H1), jnp.float32)],
        compiler_params=pltpu.CompilerParams(
            dimension_semantics=("arbitrary",),     # K is a reduction axis
            vmem_limit_bytes=_vmem_limit(need),
        ),
    )(x, w1, b1, w2, b2)


# ---------------------------------------------------------------------------
# One-time parameter preparation (PyTorch layout -> matmul-ready layout).
# ---------------------------------------------------------------------------
_TK_FC = 2048   # fc K tile (multiple of 128); weight is zero-padded so TK divides K.


def prepare_params(params, H, W):
    Ho2, Wo2 = H - 4, W - 4                    # conv2 valid output grid
    P2 = (Ho2 - 1) * W + Wo2                   # stored lane-length of conv2 output

    def conv_taps(w_oihw):                     # (Cout, Cin, 3, 3) -> (9, Cout, Cin)
        Cout, Cin, kh, kw = w_oihw.shape
        taps = jnp.transpose(w_oihw, (2, 3, 0, 1)).reshape(kh * kw, Cout, Cin)
        pad = (-Cin) % 8                       # sublane-align the contraction dim
        if pad:
            taps = jnp.pad(taps, ((0, 0), (0, 0), (0, pad)))
        return taps

    # fc1: PyTorch flattens conv2's output in (c, h, w) order with width Wo2.  Our
    # activations are stored as (c, h*W + w) with garbage columns w in [Wo2, W);
    # permute + zero-expand the weight rows once so no runtime transpose is needed.
    fc1_w = params["fc1_w"]                               # (128, 64*Ho2*Wo2)
    n_hidden = fc1_w.shape[0]
    wm = fc1_w.reshape(n_hidden, 64, Ho2, Wo2)
    wm = jnp.pad(wm, ((0, 0), (0, 0), (0, 0), (0, W - Wo2)))     # zero garbage cols
    wm = wm.reshape(n_hidden, 64, Ho2 * W)[:, :, :P2]
    wm = wm.reshape(n_hidden, 64 * P2).T                          # (K, 128)

    K = 64 * P2
    tk = K if K <= _TK_FC else _TK_FC
    Kp = -(-K // tk) * tk
    if Kp != K:
        wm = jnp.pad(wm, ((0, Kp - K), (0, 0)))                   # zero K padding

    return {
        "conv1_w": conv_taps(params["conv1_w"]),
        "conv1_b": params["conv1_b"].reshape(-1, 1),
        "conv2_w": conv_taps(params["conv2_w"]),
        "conv2_b": params["conv2_b"].reshape(-1, 1),
        "fc1_w": wm,                                              # (Kp, 128)
        "fc1_b": params["fc1_b"].reshape(1, -1),
        "fc2_w": params["fc2_w"].T,                               # (128, 2)
        "fc2_b": params["fc2_b"].reshape(1, -1),
        "fc_tk": tk,
    }


# ---------------------------------------------------------------------------
# Forward pass (PyTorch semantics) and pure-JAX reference.
# ---------------------------------------------------------------------------
def cnn_forward(x_nchw, prepared):
    B, C, H, W = x_nchw.shape
    x = x_nchw.reshape(B, C, H * W)            # free reshape; stays in NCHW order
    cin1 = prepared["conv1_w"].shape[2]
    if C < cin1:                               # sublane-pad conv1's tiny K (3 -> 8)
        x = jnp.pad(x, ((0, 0), (0, cin1 - C), (0, 0)))

    y1 = conv3x3_relu_pallas(x, prepared["conv1_w"], prepared["conv1_b"],
                             img_w=W, in_h=H, in_w=W)              # (B, 32, P1)
    y2 = conv3x3_relu_pallas(y1, prepared["conv2_w"], prepared["conv2_b"],
                             img_w=W, in_h=H - 2, in_w=W - 2)      # (B, 64, P2)

    flat = y2.reshape(B, -1)                   # free reshape; matches fc1_w row order
    return fc_fused_pallas(flat, prepared["fc1_w"], prepared["fc1_b"],
                           prepared["fc2_w"], prepared["fc2_b"],
                           tk=prepared["fc_tk"])


def cnn_reference(x_nchw, params):
    dn = ("NCHW", "OIHW", "NCHW")
    y = lax.conv_general_dilated(x_nchw, params["conv1_w"], (1, 1), "VALID",
                                 dimension_numbers=dn)
    y = jnp.maximum(y + params["conv1_b"][None, :, None, None], 0.0)
    y = lax.conv_general_dilated(y, params["conv2_w"], (1, 1), "VALID",
                                 dimension_numbers=dn)
    y = jnp.maximum(y + params["conv2_b"][None, :, None, None], 0.0)
    flat = y.reshape(y.shape[0], -1)
    h = jnp.maximum(flat @ params["fc1_w"].T + params["fc1_b"], 0.0)
    return h @ params["fc2_w"].T + params["fc2_b"]


# ---------------------------------------------------------------------------
# Deterministic parameters (shapes from CNN.__init__, fc1 sized for this spatial).
# ---------------------------------------------------------------------------
def init_params(key, H, W):
    conv_out_size = 64 * (H - 4) * (W - 4)
    ks = jax.random.split(key, 8)

    def u(k, shape, fan_in):
        bound = 1.0 / math.sqrt(fan_in)
        return jax.random.uniform(k, shape, jnp.float32, -bound, bound)

    return {
        "conv1_w": u(ks[0], (32, 3, 3, 3), 3 * 9),
        "conv1_b": u(ks[1], (32,), 3 * 9),
        "conv2_w": u(ks[2], (64, 32, 3, 3), 32 * 9),
        "conv2_b": u(ks[3], (64,), 32 * 9),
        "fc1_w": u(ks[4], (128, conv_out_size), conv_out_size),
        "fc1_b": u(ks[5], (128,), conv_out_size),
        "fc2_w": u(ks[6], (2, 128), 128),
        "fc2_b": u(ks[7], (2,), 128),
    }


if __name__ == "__main__":
    # Small shapes consistent with the module: batch=2, 3 input channels, 16x16
    # spatial (fc1 sized with the same formula the module uses, for this extent).
    B, C, H, W = 2, 3, 16, 16
    kx, kp = jax.random.split(jax.random.PRNGKey(0))
    x = jax.random.normal(kx, (B, C, H, W), jnp.float32)
    params = init_params(kp, H, W)

    prepared = prepare_params(params, H, W)        # one-time weight re-layout
    fwd = jax.jit(lambda inp: cnn_forward(inp, prepared))

    out = jax.block_until_ready(fwd(x))
    assert out.shape == (B, 2)

    ref = jax.block_until_ready(cnn_reference(x, params))
    assert bool(jnp.all(jnp.isfinite(out)))
    err = float(jnp.max(jnp.abs(out - ref)))
    tol = 2e-3 * (1.0 + float(jnp.max(jnp.abs(ref))))
    assert err < tol, (err, tol)

    print("KERNEL_OK")
</pallas_src>

<mosaic_0001>
module attributes {stable_mosaic.version = 11 : i64} {
  func.func @_conv3x3_relu_kernel(%arg0: i32, %arg1: memref<1x8x256xf32, #tpu.memory_space<vmem>>, %arg2: memref<9x32x8xf32, #tpu.memory_space<vmem>>, %arg3: memref<32x1xf32, #tpu.memory_space<vmem>>, %arg4: memref<1x32x222xf32, #tpu.memory_space<vmem>>) attributes {dimension_semantics = [#tpu.dimension_semantics<parallel>], iteration_bounds = array<i64: 2>, scalar_prefetch = 0 : i64, scratch_operands = 0 : i64, tpu.core_type = #tpu.core_type<tc>, window_params = [{transform_indices = @transform_0, window_bounds = array<i64: 1, 8, 256>}, {pipeline_mode = #tpu.pipeline_mode<synchronous>, transform_indices = @transform_1, window_bounds = array<i64: 9, 32, 8>}, {pipeline_mode = #tpu.pipeline_mode<synchronous>, transform_indices = @transform_2, window_bounds = array<i64: 32, 1>}, {transform_indices = @transform_3, window_bounds = array<i64: 1, 32, 222>}]} {
    %c0 = arith.constant 0 : index
    %c0_0 = arith.constant 0 : index
    %c0_1 = arith.constant 0 : index
    %0 = vector.load %arg1[%c0, %c0_0, %c0_1] : memref<1x8x256xf32, #tpu.memory_space<vmem>>, vector<1x8x222xf32>
    %1 = vector.shape_cast %0 : vector<1x8x222xf32> to vector<8x222xf32>
    %c0_2 = arith.constant 0 : index
    %c0_3 = arith.constant 0 : index
    %c0_4 = arith.constant 0 : index
    %2 = vector.load %arg2[%c0_2, %c0_3, %c0_4] : memref<9x32x8xf32, #tpu.memory_space<vmem>>, vector<1x32x8xf32>
    %3 = vector.shape_cast %2 : vector<1x32x8xf32> to vector<32x8xf32>
    %cst = arith.constant dense<0.000000e+00> : vector<32x222xf32>
    %4 = tpu.matmul %3, %1, %cst {dimension_numbers = #tpu.dot_dimension_numbers<[1], [0], [0], [1], [0, 0, 1, 1], [], []>} : vector<32x8xf32>, vector<8x222xf32>, vector<32x222xf32> -> vector<32x222xf32>
    %c0_5 = arith.constant 0 : index
    %c0_6 = arith.constant 0 : index
    %c0_7 = arith.constant 0 : index
    %5 = vector.load %arg4[%c0_5, %c0_6, %c0_7] : memref<1x32x222xf32, #tpu.memory_space<vmem>>, vector<1x32x222xf32>
    %6 = vector.shape_cast %5 : vector<1x32x222xf32> to vector<32x222xf32>
    %7 = vector.shape_cast %4 : vector<32x222xf32> to vector<1x32x222xf32>
    tpu.vector_store %arg4[%c0_5, %c0_6, %c0_7], %7 {strides = array<i32>} : memref<1x32x222xf32, #tpu.memory_space<vmem>>, vector<1x32x222xf32>,
    %c0_8 = arith.constant 0 : index
    %c0_9 = arith.constant 0 : index
    %c1 = arith.constant 1 : index
    %8 = vector.load %arg1[%c0_8, %c0_9, %c1] : memref<1x8x256xf32, #tpu.memory_space<vmem>>, vector<1x8x222xf32>
    %9 = vector.shape_cast %8 : vector<1x8x222xf32> to vector<8x222xf32>
    %c1_10 = arith.constant 1 : index
    %c0_11 = arith.constant 0 : index
    %c0_12 = arith.constant 0 : index
    %10 = vector.load %arg2[%c1_10, %c0_11, %c0_12] : memref<9x32x8xf32, #tpu.memory_space<vmem>>, vector<1x32x8xf32>
    %11 = vector.shape_cast %10 : vector<1x32x8xf32> to vector<32x8xf32>
    %cst_13 = arith.constant dense<0.000000e+00> : vector<32x222xf32>
    %12 = tpu.matmul %11, %9, %cst_13 {dimension_numbers = #tpu.dot_dimension_numbers<[1], [0], [0], [1], [0, 0, 1, 1], [], []>} : vector<32x8xf32>, vector<8x222xf32>, vector<32x222xf32> -> vector<32x222xf32>
    %c0_14 = arith.constant 0 : index
    %c0_15 = arith.constant 0 : index
    %c0_16 = arith.constant 0 : index
    %13 = vector.load %arg4[%c0_14, %c0_15, %c0_16] : memref<1x32x222xf32, #tpu.memory_space<vmem>>, vector<1x32x222xf32>
    %14 = vector.shape_cast %13 : vector<1x32x222xf32> to vector<32x222xf32>
    %15 = arith.addf %14, %12 : vector<32x222xf32>
    %c0_17 = arith.constant 0 : index
    %c0_18 = arith.constant 0 : index
    %c0_19 = arith.constant 0 : index
    %16 = vector.load %arg4[%c0_17, %c0_18, %c0_19] : memref<1x32x222xf32, #tpu.memory_space<vmem>>, vector<1x32x222xf32>
    %17 = vector.shape_cast %16 : vector<1x32x222xf32> to vector<32x222xf32>
    %18 = vector.shape_cast %15 : vector<32x222xf32> to vector<1x32x222xf32>
    tpu.vector_store %arg4[%c0_17, %c0_18, %c0_19], %18 {strides = array<i32>} : memref<1x32x222xf32, #tpu.memory_space<vmem>>, vector<1x32x222xf32>,
    %c0_20 = arith.constant 0 : index
    %c0_21 = arith.constant 0 : index
    %c2 = arith.constant 2 : index
    %19 = vector.load %arg1[%c0_20, %c0_21, %c2] : memref<1x8x256xf32, #tpu.memory_space<vmem>>, vector<1x8x222xf32>
    %20 = vector.shape_cast %19 : vector<1x8x222xf32> to vector<8x222xf32>
    %c2_22 = arith.constant 2 : index
    %c0_23 = arith.constant 0 : index
    %c0_24 = arith.constant 0 : index
    %21 = vector.load %arg2[%c2_22, %c0_23, %c0_24] : memref<9x32x8xf32, #tpu.memory_space<vmem>>, vector<1x32x8xf32>
    %22 = vector.shape_cast %21 : vector<1x32x8xf32> to vector<32x8xf32>
    %cst_25 = arith.constant dense<0.000000e+00> : vector<32x222xf32>
    %23 = tpu.matmul %22, %20, %cst_25 {dimension_numbers = #tpu.dot_dimension_numbers<[1], [0], [0], [1], [0, 0, 1, 1], [], []>} : vector<32x8xf32>, vector<8x222xf32>, vector<32x222xf32> -> vector<32x222xf32>
    %c0_26 = arith.constant 0 : index
    %c0_27 = arith.constant 0 : index
    %c0_28 = arith.constant 0 : index
    %24 = vector.load %arg4[%c0_26, %c0_27, %c0_28] : memref<1x32x222xf32, #tpu.memory_space<vmem>>, vector<1x32x222xf32>
    %25 = vector.shape_cast %24 : vector<1x32x222xf32> to vector<32x222xf32>
    %26 = arith.addf %25, %23 : vector<32x222xf32>
    %c0_29 = arith.constant 0 : index
    %c0_30 = arith.constant 0 : index
    %c0_31 = arith.constant 0 : index
    %27 = vector.load %arg4[%c0_29, %c0_30, %c0_31] : memref<1x32x222xf32, #tpu.memory_space<vmem>>, vector<1x32x222xf32>
    %28 = vector.shape_cast %27 : vector<1x32x222xf32> to vector<32x222xf32>
    %29 = vector.shape_cast %26 : vector<32x222xf32> to vector<1x32x222xf32>
    tpu.vector_store %arg4[%c0_29, %c0_30, %c0_31], %29 {strides = array<i32>} : memref<1x32x222xf32, #tpu.memory_space<vmem>>, vector<1x32x222xf32>,
    %c0_32 = arith.constant 0 : index
    %c0_33 = arith.constant 0 : index
    %c16 = arith.constant 16 : index
    %30 = vector.load %arg1[%c0_32, %c0_33, %c16] : memref<1x8x256xf32, #tpu.memory_space<vmem>>, vector<1x8x222xf32>
    %31 = vector.shape_cast %30 : vector<1x8x222xf32> to vector<8x222xf32>
    %c3 = arith.constant 3 : index
    %c0_34 = arith.constant 0 : index
    %c0_35 = arith.constant 0 : index
    %32 = vector.load %arg2[%c3, %c0_34, %c0_35] : memref<9x32x8xf32, #tpu.memory_space<vmem>>, vector<1x32x8xf32>
    %33 = vector.shape_cast %32 : vector<1x32x8xf32> to vector<32x8xf32>
    %cst_36 = arith.constant dense<0.000000e+00> : vector<32x222xf32>
    %34 = tpu.matmul %33, %31, %cst_36 {dimension_numbers = #tpu.dot_dimension_numbers<[1], [0], [0], [1], [0, 0, 1, 1], [], []>} : vector<32x8xf32>, vector<8x222xf32>, vector<32x222xf32> -> vector<32x222xf32>
    %c0_37 = arith.constant 0 : index
    %c0_38 = arith.constant 0 : index
    %c0_39 = arith.constant 0 : index
    %35 = vector.load %arg4[%c0_37, %c0_38, %c0_39] : memref<1x32x222xf32, #tpu.memory_space<vmem>>, vector<1x32x222xf32>
    %36 = vector.shape_cast %35 : vector<1x32x222xf32> to vector<32x222xf32>
    %37 = arith.addf %36, %34 : vector<32x222xf32>
    %c0_40 = arith.constant 0 : index
    %c0_41 = arith.constant 0 : index
    %c0_42 = arith.constant 0 : index
    %38 = vector.load %arg4[%c0_40, %c0_41, %c0_42] : memref<1x32x222xf32, #tpu.memory_space<vmem>>, vector<1x32x222xf32>
    %39 = vector.shape_cast %38 : vector<1x32x222xf32> to vector<32x222xf32>
    %40 = vector.shape_cast %37 : vector<32x222xf32> to vector<1x32x222xf32>
    tpu.vector_store %arg4[%c0_40, %c0_41, %c0_42], %40 {strides = array<i32>} : memref<1x32x222xf32, #tpu.memory_space<vmem>>, vector<1x32x222xf32>,
    %c0_43 = arith.constant 0 : index
    %c0_44 = arith.constant 0 : index
    %c17 = arith.constant 17 : index
    %41 = vector.load %arg1[%c0_43, %c0_44, %c17] : memref<1x8x256xf32, #tpu.memory_space<vmem>>, vector<1x8x222xf32>
    %42 = vector.shape_cast %41 : vector<1x8x222xf32> to vector<8x222xf32>
    %c4 = arith.constant 4 : index
    %c0_45 = arith.constant 0 : index
    %c0_46 = arith.constant 0 : index
    %43 = vector.load %arg2[%c4, %c0_45, %c0_46] : memref<9x32x8xf32, #tpu.memory_space<vmem>>, vector<1x32x8xf32>
    %44 = vector.shape_cast %43 : vector<1x32x8xf32> to vector<32x8xf32>
    %cst_47 = arith.constant dense<0.000000e+00> : vector<32x222xf32>
    %45 = tpu.matmul %44, %42, %cst_47 {dimension_numbers = #tpu.dot_dimension_numbers<[1], [0], [0], [1], [0, 0, 1, 1], [], []>} : vector<32x8xf32>, vector<8x222xf32>, vector<32x222xf32> -> vector<32x222xf32>
    %c0_48 = arith.constant 0 : index
    %c0_49 = arith.constant 0 : index
    %c0_50 = arith.constant 0 : index
    %46 = vector.load %arg4[%c0_48, %c0_49, %c0_50] : memref<1x32x222xf32, #tpu.memory_space<vmem>>, vector<1x32x222xf32>
    %47 = vector.shape_cast %46 : vector<1x32x222xf32> to vector<32x222xf32>
    %48 = arith.addf %47, %45 : vector<32x222xf32>
    %c0_51 = arith.constant 0 : index
    %c0_52 = arith.constant 0 : index
    %c0_53 = arith.constant 0 : index
    %49 = vector.load %arg4[%c0_51, %c0_52, %c0_53] : memref<1x32x222xf32, #tpu.memory_space<vmem>>, vector<1x32x222xf32>
    %50 = vector.shape_cast %49 : vector<1x32x222xf32> to vector<32x222xf32>
    %51 = vector.shape_cast %48 : vector<32x222xf32> to vector<1x32x222xf32>
    tpu.vector_store %arg4[%c0_51, %c0_52, %c0_53], %51 {strides = array<i32>} : memref<1x32x222xf32, #tpu.memory_space<vmem>>, vector<1x32x222xf32>,
    %c0_54 = arith.constant 0 : index
    %c0_55 = arith.constant 0 : index
    %c18 = arith.constant 18 : index
    %52 = vector.load %arg1[%c0_54, %c0_55, %c18] : memref<1x8x256xf32, #tpu.memory_space<vmem>>, vector<1x8x222xf32>
    %53 = vector.shape_cast %52 : vector<1x8x222xf32> to vector<8x222xf32>
    %c5 = arith.constant 5 : index
    %c0_56 = arith.constant 0 : index
    %c0_57 = arith.constant 0 : index
    %54 = vector.load %arg2[%c5, %c0_56, %c0_57] : memref<9x32x8xf32, #tpu.memory_space<vmem>>, vector<1x32x8xf32>
    %55 = vector.shape_cast %54 : vector<1x32x8xf32> to vector<32x8xf32>
    %cst_58 = arith.constant dense<0.000000e+00> : vector<32x222xf32>
    %56 = tpu.matmul %55, %53, %cst_58 {dimension_numbers = #tpu.dot_dimension_numbers<[1], [0], [0], [1], [0, 0, 1, 1], [], []>} : vector<32x8xf32>, vector<8x222xf32>, vector<32x222xf32> -> vector<32x222xf32>
    %c0_59 = arith.constant 0 : index
    %c0_60 = arith.constant 0 : index
    %c0_61 = arith.constant 0 : index
    %57 = vector.load %arg4[%c0_59, %c0_60, %c0_61] : memref<1x32x222xf32, #tpu.memory_space<vmem>>, vector<1x32x222xf32>
    %58 = vector.shape_cast %57 : vector<1x32x222xf32> to vector<32x222xf32>
    %59 = arith.addf %58, %56 : vector<32x222xf32>
    %c0_62 = arith.constant 0 : index
    %c0_63 = arith.constant 0 : index
    %c0_64 = arith.constant 0 : index
    %60 = vector.load %arg4[%c0_62, %c0_63, %c0_64] : memref<1x32x222xf32, #tpu.memory_space<vmem>>, vector<1x32x222xf32>
    %61 = vector.shape_cast %60 : vector<1x32x222xf32> to vector<32x222xf32>
    %62 = vector.shape_cast %59 : vector<32x222xf32> to vector<1x32x222xf32>
    tpu.vector_store %arg4[%c0_62, %c0_63, %c0_64], %62 {strides = array<i32>} : memref<1x32x222xf32, #tpu.memory_space<vmem>>, vector<1x32x222xf32>,
    %c0_65 = arith.constant 0 : index
    %c0_66 = arith.constant 0 : index
    %c32 = arith.constant 32 : index
    %63 = vector.load %arg1[%c0_65, %c0_66, %c32] : memref<1x8x256xf32, #tpu.memory_space<vmem>>, vector<1x8x222xf32>
    %64 = vector.shape_cast %63 : vector<1x8x222xf32> to vector<8x222xf32>
    %c6 = arith.constant 6 : index
    %c0_67 = arith.constant 0 : index
    %c0_68 = arith.constant 0 : index
    %65 = vector.load %arg2[%c6, %c0_67, %c0_68] : memref<9x32x8xf32, #tpu.memory_space<vmem>>, vector<1x32x8xf32>
    %66 = vector.shape_cast %65 : vector<1x32x8xf32> to vector<32x8xf32>
    %cst_69 = arith.constant dense<0.000000e+00> : vector<32x222xf32>
    %67 = tpu.matmul %66, %64, %cst_69 {dimension_numbers = #tpu.dot_dimension_numbers<[1], [0], [0], [1], [0, 0, 1, 1], [], []>} : vector<32x8xf32>, vector<8x222xf32>, vector<32x222xf32> -> vector<32x222xf32>
    %c0_70 = arith.constant 0 : index
    %c0_71 = arith.constant 0 : index
    %c0_72 = arith.constant 0 : index
    %68 = vector.load %arg4[%c0_70, %c0_71, %c0_72] : memref<1x32x222xf32, #tpu.memory_space<vmem>>, vector<1x32x222xf32>
    %69 = vector.shape_cast %68 : vector<1x32x222xf32> to vector<32x222xf32>
    %70 = arith.addf %69, %67 : vector<32x222xf32>
    %c0_73 = arith.constant 0 : index
    %c0_74 = arith.constant 0 : index
    %c0_75 = arith.constant 0 : index
    %71 = vector.load %arg4[%c0_73, %c0_74, %c0_75] : memref<1x32x222xf32, #tpu.memory_space<vmem>>, vector<1x32x222xf32>
    %72 = vector.shape_cast %71 : vector<1x32x222xf32> to vector<32x222xf32>
    %73 = vector.shape_cast %70 : vector<32x222xf32> to vector<1x32x222xf32>
    tpu.vector_store %arg4[%c0_73, %c0_74, %c0_75], %73 {strides = array<i32>} : memref<1x32x222xf32, #tpu.memory_space<vmem>>, vector<1x32x222xf32>,
    %c0_76 = arith.constant 0 : index
    %c0_77 = arith.constant 0 : index
    %c33 = arith.constant 33 : index
    %74 = vector.load %arg1[%c0_76, %c0_77, %c33] : memref<1x8x256xf32, #tpu.memory_space<vmem>>, vector<1x8x222xf32>
    %75 = vector.shape_cast %74 : vector<1x8x222xf32> to vector<8x222xf32>
    %c7 = arith.constant 7 : index
    %c0_78 = arith.constant 0 : index
    %c0_79 = arith.constant 0 : index
    %76 = vector.load %arg2[%c7, %c0_78, %c0_79] : memref<9x32x8xf32, #tpu.memory_space<vmem>>, vector<1x32x8xf32>
    %77 = vector.shape_cast %76 : vector<1x32x8xf32> to vector<32x8xf32>
    %cst_80 = arith.constant dense<0.000000e+00> : vector<32x222xf32>
    %78 = tpu.matmul %77, %75, %cst_80 {dimension_numbers = #tpu.dot_dimension_numbers<[1], [0], [0], [1], [0, 0, 1, 1], [], []>} : vector<32x8xf32>, vector<8x222xf32>, vector<32x222xf32> -> vector<32x222xf32>
    %c0_81 = arith.constant 0 : index
    %c0_82 = arith.constant 0 : index
    %c0_83 = arith.constant 0 : index
    %79 = vector.load %arg4[%c0_81, %c0_82, %c0_83] : memref<1x32x222xf32, #tpu.memory_space<vmem>>, vector<1x32x222xf32>
    %80 = vector.shape_cast %79 : vector<1x32x222xf32> to vector<32x222xf32>
    %81 = arith.addf %80, %78 : vector<32x222xf32>
    %c0_84 = arith.constant 0 : index
    %c0_85 = arith.constant 0 : index
    %c0_86 = arith.constant 0 : index
    %82 = vector.load %arg4[%c0_84, %c0_85, %c0_86] : memref<1x32x222xf32, #tpu.memory_space<vmem>>, vector<1x32x222xf32>
    %83 = vector.shape_cast %82 : vector<1x32x222xf32> to vector<32x222xf32>
    %84 = vector.shape_cast %81 : vector<32x222xf32> to vector<1x32x222xf32>
    tpu.vector_store %arg4[%c0_84, %c0_85, %c0_86], %84 {strides = array<i32>} : memref<1x32x222xf32, #tpu.memory_space<vmem>>, vector<1x32x222xf32>,
    %c0_87 = arith.constant 0 : index
    %c0_88 = arith.constant 0 : index
    %c34 = arith.constant 34 : index
    %85 = vector.load %arg1[%c0_87, %c0_88, %c34] : memref<1x8x256xf32, #tpu.memory_space<vmem>>, vector<1x8x222xf32>
    %86 = vector.shape_cast %85 : vector<1x8x222xf32> to vector<8x222xf32>
    %c8 = arith.constant 8 : index
    %c0_89 = arith.constant 0 : index
    %c0_90 = arith.constant 0 : index
    %87 = vector.load %arg2[%c8, %c0_89, %c0_90] : memref<9x32x8xf32, #tpu.memory_space<vmem>>, vector<1x32x8xf32>
    %88 = vector.shape_cast %87 : vector<1x32x8xf32> to vector<32x8xf32>
    %cst_91 = arith.constant dense<0.000000e+00> : vector<32x222xf32>
    %89 = tpu.matmul %88, %86, %cst_91 {dimension_numbers = #tpu.dot_dimension_numbers<[1], [0], [0], [1], [0, 0, 1, 1], [], []>} : vector<32x8xf32>, vector<8x222xf32>, vector<32x222xf32> -> vector<32x222xf32>
    %c0_92 = arith.constant 0 : index
    %c0_93 = arith.constant 0 : index
    %c0_94 = arith.constant 0 : index
    %90 = vector.load %arg4[%c0_92, %c0_93, %c0_94] : memref<1x32x222xf32, #tpu.memory_space<vmem>>, vector<1x32x222xf32>
    %91 = vector.shape_cast %90 : vector<1x32x222xf32> to vector<32x222xf32>
    %92 = arith.addf %91, %89 : vector<32x222xf32>
    %c0_95 = arith.constant 0 : index
    %c0_96 = arith.constant 0 : index
    %c0_97 = arith.constant 0 : index
    %93 = vector.load %arg4[%c0_95, %c0_96, %c0_97] : memref<1x32x222xf32, #tpu.memory_space<vmem>>, vector<1x32x222xf32>
    %94 = vector.shape_cast %93 : vector<1x32x222xf32> to vector<32x222xf32>
    %95 = vector.shape_cast %92 : vector<32x222xf32> to vector<1x32x222xf32>
    tpu.vector_store %arg4[%c0_95, %c0_96, %c0_97], %95 {strides = array<i32>} : memref<1x32x222xf32, #tpu.memory_space<vmem>>, vector<1x32x222xf32>,
    %c0_98 = arith.constant 0 : index
    %c0_99 = arith.constant 0 : index
    %c0_100 = arith.constant 0 : index
    %96 = vector.load %arg4[%c0_98, %c0_99, %c0_100] : memref<1x32x222xf32, #tpu.memory_space<vmem>>, vector<1x32x222xf32>
    %97 = vector.shape_cast %96 : vector<1x32x222xf32> to vector<32x222xf32>
    %c0_101 = arith.constant 0 : index
    %c0_102 = arith.constant 0 : index
    %98 = vector.load %arg3[%c0_101, %c0_102] : memref<32x1xf32, #tpu.memory_space<vmem>>, vector<32x1xf32>
    %99 = vector.broadcast %98 : vector<32x1xf32> to vector<32x222xf32>
    %100 = arith.addf %97, %99 : vector<32x222xf32>
    %cst_103 = arith.constant 0.000000e+00 : f32
    %101 = vector.broadcast %cst_103 : f32 to vector<32x222xf32>
    %102 = arith.maximumf %100, %101 : vector<32x222xf32>
    %c0_104 = arith.constant 0 : index
    %c0_105 = arith.constant 0 : index
    %c0_106 = arith.constant 0 : index
    %103 = vector.load %arg4[%c0_104, %c0_105, %c0_106] : memref<1x32x222xf32, #tpu.memory_space<vmem>>, vector<1x32x222xf32>
    %104 = vector.shape_cast %103 : vector<1x32x222xf32> to vector<32x222xf32>
    %105 = vector.shape_cast %102 : vector<32x222xf32> to vector<1x32x222xf32>
    tpu.vector_store %arg4[%c0_104, %c0_105, %c0_106], %105 {strides = array<i32>} : memref<1x32x222xf32, #tpu.memory_space<vmem>>, vector<1x32x222xf32>,
    return
  }
  func.func @transform_0(%arg0: i32) -> (i32, i32, i32) {
    %c0_i32 = arith.constant 0 : i32
    %c0_i32_0 = arith.constant 0 : i32
    %c0_i32_1 = arith.constant 0 : i32
    return %arg0, %c0_i32, %c0_i32_0 : i32, i32, i32
  }
  func.func @transform_1(%arg0: i32) -> (i32, i32, i32) {
    %c0_i32 = arith.constant 0 : i32
    %c0_i32_0 = arith.constant 0 : i32
    %c0_i32_1 = arith.constant 0 : i32
    %c0_i32_2 = arith.constant 0 : i32
    return %c0_i32, %c0_i32_0, %c0_i32_1 : i32, i32, i32
  }
  func.func @transform_2(%arg0: i32) -> (i32, i32) {
    %c0_i32 = arith.constant 0 : i32
    %c0_i32_0 = arith.constant 0 : i32
    %c0_i32_1 = arith.constant 0 : i32
    return %c0_i32, %c0_i32_0 : i32, i32
  }
  func.func @transform_3(%arg0: i32) -> (i32, i32, i32) {
    %c0_i32 = arith.constant 0 : i32
    %c0_i32_0 = arith.constant 0 : i32
    %c0_i32_1 = arith.constant 0 : i32
    return %arg0, %c0_i32, %c0_i32_0 : i32, i32, i32
  }
}

module attributes {stable_mosaic.version = 11 : i64} {
  func.func @_conv3x3_relu_kernel(%arg0: i32, %arg1: memref<1x32x222xf32, #tpu.memory_space<vmem>>, %arg2: memref<9x64x32xf32, #tpu.memory_space<vmem>>, %arg3: memref<64x1xf32, #tpu.memory_space<vmem>>, %arg4: memref<1x64x188xf32, #tpu.memory_space<vmem>>) attributes {dimension_semantics = [#tpu.dimension_semantics<parallel>], iteration_bounds = array<i64: 2>, scalar_prefetch = 0 : i64, scratch_operands = 0 : i64, tpu.core_type = #tpu.core_type<tc>, window_params = [{transform_indices = @transform_0, window_bounds = array<i64: 1, 32, 222>}, {pipeline_mode = #tpu.pipeline_mode<synchronous>, transform_indices = @transform_1, window_bounds = array<i64: 9, 64, 32>}, {pipeline_mode = #tpu.pipeline_mode<synchronous>, transform_indices = @transform_2, window_bounds = array<i64: 64, 1>}, {transform_indices = @transform_3, window_bounds = array<i64: 1, 64, 188>}]} {
    %c0 = arith.constant 0 : index
    %c0_0 = arith.constant 0 : index
    %c0_1 = arith.constant 0 : index
    %0 = vector.load %arg1[%c0, %c0_0, %c0_1] : memref<1x32x222xf32, #tpu.memory_space<vmem>>, vector<1x32x188xf32>
    %1 = vector.shape_cast %0 : vector<1x32x188xf32> to vector<32x188xf32>
    %c0_2 = arith.constant 0 : index
    %c0_3 = arith.constant 0 : index
    %c0_4 = arith.constant 0 : index
    %2 = vector.load %arg2[%c0_2, %c0_3, %c0_4] : memref<9x64x32xf32, #tpu.memory_space<vmem>>, vector<1x64x32xf32>
    %3 = vector.shape_cast %2 : vector<1x64x32xf32> to vector<64x32xf32>
    %cst = arith.constant dense<0.000000e+00> : vector<64x188xf32>
    %4 = tpu.matmul %3, %1, %cst {dimension_numbers = #tpu.dot_dimension_numbers<[1], [0], [0], [1], [0, 0, 1, 1], [], []>} : vector<64x32xf32>, vector<32x188xf32>, vector<64x188xf32> -> vector<64x188xf32>
    %c0_5 = arith.constant 0 : index
    %c0_6 = arith.constant 0 : index
    %c0_7 = arith.constant 0 : index
    %5 = vector.load %arg4[%c0_5, %c0_6, %c0_7] : memref<1x64x188xf32, #tpu.memory_space<vmem>>, vector<1x64x188xf32>
    %6 = vector.shape_cast %5 : vector<1x64x188xf32> to vector<64x188xf32>
    %7 = vector.shape_cast %4 : vector<64x188xf32> to vector<1x64x188xf32>
    tpu.vector_store %arg4[%c0_5, %c0_6, %c0_7], %7 {strides = array<i32>} : memref<1x64x188xf32, #tpu.memory_space<vmem>>, vector<1x64x188xf32>,
    %c0_8 = arith.constant 0 : index
    %c0_9 = arith.constant 0 : index
    %c1 = arith.constant 1 : index
    %8 = vector.load %arg1[%c0_8, %c0_9, %c1] : memref<1x32x222xf32, #tpu.memory_space<vmem>>, vector<1x32x188xf32>
    %9 = vector.shape_cast %8 : vector<1x32x188xf32> to vector<32x188xf32>
    %c1_10 = arith.constant 1 : index
    %c0_11 = arith.constant 0 : index
    %c0_12 = arith.constant 0 : index
    %10 = vector.load %arg2[%c1_10, %c0_11, %c0_12] : memref<9x64x32xf32, #tpu.memory_space<vmem>>, vector<1x64x32xf32>
    %11 = vector.shape_cast %10 : vector<1x64x32xf32> to vector<64x32xf32>
    %cst_13 = arith.constant dense<0.000000e+00> : vector<64x188xf32>
    %12 = tpu.matmul %11, %9, %cst_13 {dimension_numbers = #tpu.dot_dimension_numbers<[1], [0], [0], [1], [0, 0, 1, 1], [], []>} : vector<64x32xf32>, vector<32x188xf32>, vector<64x188xf32> -> vector<64x188xf32>
    %c0_14 = arith.constant 0 : index
    %c0_15 = arith.constant 0 : index
    %c0_16 = arith.constant 0 : index
    %13 = vector.load %arg4[%c0_14, %c0_15, %c0_16] : memref<1x64x188xf32, #tpu.memory_space<vmem>>, vector<1x64x188xf32>
    %14 = vector.shape_cast %13 : vector<1x64x188xf32> to vector<64x188xf32>
    %15 = arith.addf %14, %12 : vector<64x188xf32>
    %c0_17 = arith.constant 0 : index
    %c0_18 = arith.constant 0 : index
    %c0_19 = arith.constant 0 : index
    %16 = vector.load %arg4[%c0_17, %c0_18, %c0_19] : memref<1x64x188xf32, #tpu.memory_space<vmem>>, vector<1x64x188xf32>
    %17 = vector.shape_cast %16 : vector<1x64x188xf32> to vector<64x188xf32>
    %18 = vector.shape_cast %15 : vector<64x188xf32> to vector<1x64x188xf32>
    tpu.vector_store %arg4[%c0_17, %c0_18, %c0_19], %18 {strides = array<i32>} : memref<1x64x188xf32, #tpu.memory_space<vmem>>, vector<1x64x188xf32>,
    %c0_20 = arith.constant 0 : index
    %c0_21 = arith.constant 0 : index
    %c2 = arith.constant 2 : index
    %19 = vector.load %arg1[%c0_20, %c0_21, %c2] : memref<1x32x222xf32, #tpu.memory_space<vmem>>, vector<1x32x188xf32>
    %20 = vector.shape_cast %19 : vector<1x32x188xf32> to vector<32x188xf32>
    %c2_22 = arith.constant 2 : index
    %c0_23 = arith.constant 0 : index
    %c0_24 = arith.constant 0 : index
    %21 = vector.load %arg2[%c2_22, %c0_23, %c0_24] : memref<9x64x32xf32, #tpu.memory_space<vmem>>, vector<1x64x32xf32>
    %22 = vector.shape_cast %21 : vector<1x64x32xf32> to vector<64x32xf32>
    %cst_25 = arith.constant dense<0.000000e+00> : vector<64x188xf32>
    %23 = tpu.matmul %22, %20, %cst_25 {dimension_numbers = #tpu.dot_dimension_numbers<[1], [0], [0], [1], [0, 0, 1, 1], [], []>} : vector<64x32xf32>, vector<32x188xf32>, vector<64x188xf32> -> vector<64x188xf32>
    %c0_26 = arith.constant 0 : index
    %c0_27 = arith.constant 0 : index
    %c0_28 = arith.constant 0 : index
    %24 = vector.load %arg4[%c0_26, %c0_27, %c0_28] : memref<1x64x188xf32, #tpu.memory_space<vmem>>, vector<1x64x188xf32>
    %25 = vector.shape_cast %24 : vector<1x64x188xf32> to vector<64x188xf32>
    %26 = arith.addf %25, %23 : vector<64x188xf32>
    %c0_29 = arith.constant 0 : index
    %c0_30 = arith.constant 0 : index
    %c0_31 = arith.constant 0 : index
    %27 = vector.load %arg4[%c0_29, %c0_30, %c0_31] : memref<1x64x188xf32, #tpu.memory_space<vmem>>, vector<1x64x188xf32>
    %28 = vector.shape_cast %27 : vector<1x64x188xf32> to vector<64x188xf32>
    %29 = vector.shape_cast %26 : vector<64x188xf32> to vector<1x64x188xf32>
    tpu.vector_store %arg4[%c0_29, %c0_30, %c0_31], %29 {strides = array<i32>} : memref<1x64x188xf32, #tpu.memory_space<vmem>>, vector<1x64x188xf32>,
    %c0_32 = arith.constant 0 : index
    %c0_33 = arith.constant 0 : index
    %c16 = arith.constant 16 : index
    %30 = vector.load %arg1[%c0_32, %c0_33, %c16] : memref<1x32x222xf32, #tpu.memory_space<vmem>>, vector<1x32x188xf32>
    %31 = vector.shape_cast %30 : vector<1x32x188xf32> to vector<32x188xf32>
    %c3 = arith.constant 3 : index
    %c0_34 = arith.constant 0 : index
    %c0_35 = arith.constant 0 : index
    %32 = vector.load %arg2[%c3, %c0_34, %c0_35] : memref<9x64x32xf32, #tpu.memory_space<vmem>>, vector<1x64x32xf32>
    %33 = vector.shape_cast %32 : vector<1x64x32xf32> to vector<64x32xf32>
    %cst_36 = arith.constant dense<0.000000e+00> : vector<64x188xf32>
    %34 = tpu.matmul %33, %31, %cst_36 {dimension_numbers = #tpu.dot_dimension_numbers<[1], [0], [0], [1], [0, 0, 1, 1], [], []>} : vector<64x32xf32>, vector<32x188xf32>, vector<64x188xf32> -> vector<64x188xf32>
    %c0_37 = arith.constant 0 : index
    %c0_38 = arith.constant 0 : index
    %c0_39 = arith.constant 0 : index
    %35 = vector.load %arg4[%c0_37, %c0_38, %c0_39] : memref<1x64x188xf32, #tpu.memory_space<vmem>>, vector<1x64x188xf32>
    %36 = vector.shape_cast %35 : vector<1x64x188xf32> to vector<64x188xf32>
    %37 = arith.addf %36, %34 : vector<64x188xf32>
    %c0_40 = arith.constant 0 : index
    %c0_41 = arith.constant 0 : index
    %c0_42 = arith.constant 0 : index
    %38 = vector.load %arg4[%c0_40, %c0_41, %c0_42] : memref<1x64x188xf32, #tpu.memory_space<vmem>>, vector<1x64x188xf32>
    %39 = vector.shape_cast %38 : vector<1x64x188xf32> to vector<64x188xf32>
    %40 = vector.shape_cast %37 : vector<64x188xf32> to vector<1x64x188xf32>
    tpu.vector_store %arg4[%c0_40, %c0_41, %c0_42], %40 {strides = array<i32>} : memref<1x64x188xf32, #tpu.memory_space<vmem>>, vector<1x64x188xf32>,
    %c0_43 = arith.constant 0 : index
    %c0_44 = arith.constant 0 : index
    %c17 = arith.constant 17 : index
    %41 = vector.load %arg1[%c0_43, %c0_44, %c17] : memref<1x32x222xf32, #tpu.memory_space<vmem>>, vector<1x32x188xf32>
    %42 = vector.shape_cast %41 : vector<1x32x188xf32> to vector<32x188xf32>
    %c4 = arith.constant 4 : index
    %c0_45 = arith.constant 0 : index
    %c0_46 = arith.constant 0 : index
    %43 = vector.load %arg2[%c4, %c0_45, %c0_46] : memref<9x64x32xf32, #tpu.memory_space<vmem>>, vector<1x64x32xf32>
    %44 = vector.shape_cast %43 : vector<1x64x32xf32> to vector<64x32xf32>
    %cst_47 = arith.constant dense<0.000000e+00> : vector<64x188xf32>
    %45 = tpu.matmul %44, %42, %cst_47 {dimension_numbers = #tpu.dot_dimension_numbers<[1], [0], [0], [1], [0, 0, 1, 1], [], []>} : vector<64x32xf32>, vector<32x188xf32>, vector<64x188xf32> -> vector<64x188xf32>
    %c0_48 = arith.constant 0 : index
    %c0_49 = arith.constant 0 : index
    %c0_50 = arith.constant 0 : index
    %46 = vector.load %arg4[%c0_48, %c0_49, %c0_50] : memref<1x64x188xf32, #tpu.memory_space<vmem>>, vector<1x64x188xf32>
    %47 = vector.shape_cast %46 : vector<1x64x188xf32> to vector<64x188xf32>
    %48 = arith.addf %47, %45 : vector<64x188xf32>
    %c0_51 = arith.constant 0 : index
    %c0_52 = arith.constant 0 : index
    %c0_53 = arith.constant 0 : index
    %49 = vector.load %arg4[%c0_51, %c0_52, %c0_53] : memref<1x64x188xf32, #tpu.memory_space<vmem>>, vector<1x64x188xf32>
    %50 = vector.shape_cast %49 : vector<1x64x188xf32> to vector<64x188xf32>
    %51 = vector.shape_cast %48 : vector<64x188xf32> to vector<1x64x188xf32>
    tpu.vector_store %arg4[%c0_51, %c0_52, %c0_53], %51 {strides = array<i32>} : memref<1x64x188xf32, #tpu.memory_space<vmem>>, vector<1x64x188xf32>,
    %c0_54 = arith.constant 0 : index
    %c0_55 = arith.constant 0 : index
    %c18 = arith.constant 18 : index
    %52 = vector.load %arg1[%c0_54, %c0_55, %c18] : memref<1x32x222xf32, #tpu.memory_space<vmem>>, vector<1x32x188xf32>
    %53 = vector.shape_cast %52 : vector<1x32x188xf32> to vector<32x188xf32>
    %c5 = arith.constant 5 : index
    %c0_56 = arith.constant 0 : index
    %c0_57 = arith.constant 0 : index
    %54 = vector.load %arg2[%c5, %c0_56, %c0_57] : memref<9x64x32xf32, #tpu.memory_space<vmem>>, vector<1x64x32xf32>
    %55 = vector.shape_cast %54 : vector<1x64x32xf32> to vector<64x32xf32>
    %cst_58 = arith.constant dense<0.000000e+00> : vector<64x188xf32>
    %56 = tpu.matmul %55, %53, %cst_58 {dimension_numbers = #tpu.dot_dimension_numbers<[1], [0], [0], [1], [0, 0, 1, 1], [], []>} : vector<64x32xf32>, vector<32x188xf32>, vector<64x188xf32> -> vector<64x188xf32>
    %c0_59 = arith.constant 0 : index
    %c0_60 = arith.constant 0 : index
    %c0_61 = arith.constant 0 : index
    %57 = vector.load %arg4[%c0_59, %c0_60, %c0_61] : memref<1x64x188xf32, #tpu.memory_space<vmem>>, vector<1x64x188xf32>
    %58 = vector.shape_cast %57 : vector<1x64x188xf32> to vector<64x188xf32>
    %59 = arith.addf %58, %56 : vector<64x188xf32>
    %c0_62 = arith.constant 0 : index
    %c0_63 = arith.constant 0 : index
    %c0_64 = arith.constant 0 : index
    %60 = vector.load %arg4[%c0_62, %c0_63, %c0_64] : memref<1x64x188xf32, #tpu.memory_space<vmem>>, vector<1x64x188xf32>
    %61 = vector.shape_cast %60 : vector<1x64x188xf32> to vector<64x188xf32>
    %62 = vector.shape_cast %59 : vector<64x188xf32> to vector<1x64x188xf32>
    tpu.vector_store %arg4[%c0_62, %c0_63, %c0_64], %62 {strides = array<i32>} : memref<1x64x188xf32, #tpu.memory_space<vmem>>, vector<1x64x188xf32>,
    %c0_65 = arith.constant 0 : index
    %c0_66 = arith.constant 0 : index
    %c32 = arith.constant 32 : index
    %63 = vector.load %arg1[%c0_65, %c0_66, %c32] : memref<1x32x222xf32, #tpu.memory_space<vmem>>, vector<1x32x188xf32>
    %64 = vector.shape_cast %63 : vector<1x32x188xf32> to vector<32x188xf32>
    %c6 = arith.constant 6 : index
    %c0_67 = arith.constant 0 : index
    %c0_68 = arith.constant 0 : index
    %65 = vector.load %arg2[%c6, %c0_67, %c0_68] : memref<9x64x32xf32, #tpu.memory_space<vmem>>, vector<1x64x32xf32>
    %66 = vector.shape_cast %65 : vector<1x64x32xf32> to vector<64x32xf32>
    %cst_69 = arith.constant dense<0.000000e+00> : vector<64x188xf32>
    %67 = tpu.matmul %66, %64, %cst_69 {dimension_numbers = #tpu.dot_dimension_numbers<[1], [0], [0], [1], [0, 0, 1, 1], [], []>} : vector<64x32xf32>, vector<32x188xf32>, vector<64x188xf32> -> vector<64x188xf32>
    %c0_70 = arith.constant 0 : index
    %c0_71 = arith.constant 0 : index
    %c0_72 = arith.constant 0 : index
    %68 = vector.load %arg4[%c0_70, %c0_71, %c0_72] : memref<1x64x188xf32, #tpu.memory_space<vmem>>, vector<1x64x188xf32>
    %69 = vector.shape_cast %68 : vector<1x64x188xf32> to vector<64x188xf32>
    %70 = arith.addf %69, %67 : vector<64x188xf32>
    %c0_73 = arith.constant 0 : index
    %c0_74 = arith.constant 0 : index
    %c0_75 = arith.constant 0 : index
    %71 = vector.load %arg4[%c0_73, %c0_74, %c0_75] : memref<1x64x188xf32, #tpu.memory_space<vmem>>, vector<1x64x188xf32>
    %72 = vector.shape_cast %71 : vector<1x64x188xf32> to vector<64x188xf32>
    %73 = vector.shape_cast %70 : vector<64x188xf32> to vector<1x64x188xf32>
    tpu.vector_store %arg4[%c0_73, %c0_74, %c0_75], %73 {strides = array<i32>} : memref<1x64x188xf32, #tpu.memory_space<vmem>>, vector<1x64x188xf32>,
    %c0_76 = arith.constant 0 : index
    %c0_77 = arith.constant 0 : index
    %c33 = arith.constant 33 : index
    %74 = vector.load %arg1[%c0_76, %c0_77, %c33] : memref<1x32x222xf32, #tpu.memory_space<vmem>>, vector<1x32x188xf32>
    %75 = vector.shape_cast %74 : vector<1x32x188xf32> to vector<32x188xf32>
    %c7 = arith.constant 7 : index
    %c0_78 = arith.constant 0 : index
    %c0_79 = arith.constant 0 : index
    %76 = vector.load %arg2[%c7, %c0_78, %c0_79] : memref<9x64x32xf32, #tpu.memory_space<vmem>>, vector<1x64x32xf32>
    %77 = vector.shape_cast %76 : vector<1x64x32xf32> to vector<64x32xf32>
    %cst_80 = arith.constant dense<0.000000e+00> : vector<64x188xf32>
    %78 = tpu.matmul %77, %75, %cst_80 {dimension_numbers = #tpu.dot_dimension_numbers<[1], [0], [0], [1], [0, 0, 1, 1], [], []>} : vector<64x32xf32>, vector<32x188xf32>, vector<64x188xf32> -> vector<64x188xf32>
    %c0_81 = arith.constant 0 : index
    %c0_82 = arith.constant 0 : index
    %c0_83 = arith.constant 0 : index
    %79 = vector.load %arg4[%c0_81, %c0_82, %c0_83] : memref<1x64x188xf32, #tpu.memory_space<vmem>>, vector<1x64x188xf32>
    %80 = vector.shape_cast %79 : vector<1x64x188xf32> to vector<64x188xf32>
    %81 = arith.addf %80, %78 : vector<64x188xf32>
    %c0_84 = arith.constant 0 : index
    %c0_85 = arith.constant 0 : index
    %c0_86 = arith.constant 0 : index
    %82 = vector.load %arg4[%c0_84, %c0_85, %c0_86] : memref<1x64x188xf32, #tpu.memory_space<vmem>>, vector<1x64x188xf32>
    %83 = vector.shape_cast %82 : vector<1x64x188xf32> to vector<64x188xf32>
    %84 = vector.shape_cast %81 : vector<64x188xf32> to vector<1x64x188xf32>
    tpu.vector_store %arg4[%c0_84, %c0_85, %c0_86], %84 {strides = array<i32>} : memref<1x64x188xf32, #tpu.memory_space<vmem>>, vector<1x64x188xf32>,
    %c0_87 = arith.constant 0 : index
    %c0_88 = arith.constant 0 : index
    %c34 = arith.constant 34 : index
    %85 = vector.load %arg1[%c0_87, %c0_88, %c34] : memref<1x32x222xf32, #tpu.memory_space<vmem>>, vector<1x32x188xf32>
    %86 = vector.shape_cast %85 : vector<1x32x188xf32> to vector<32x188xf32>
    %c8 = arith.constant 8 : index
    %c0_89 = arith.constant 0 : index
    %c0_90 = arith.constant 0 : index
    %87 = vector.load %arg2[%c8, %c0_89, %c0_90] : memref<9x64x32xf32, #tpu.memory_space<vmem>>, vector<1x64x32xf32>
    %88 = vector.shape_cast %87 : vector<1x64x32xf32> to vector<64x32xf32>
    %cst_91 = arith.constant dense<0.000000e+00> : vector<64x188xf32>
    %89 = tpu.matmul %88, %86, %cst_91 {dimension_numbers = #tpu.dot_dimension_numbers<[1], [0], [0], [1], [0, 0, 1, 1], [], []>} : vector<64x32xf32>, vector<32x188xf32>, vector<64x188xf32> -> vector<64x188xf32>
    %c0_92 = arith.constant 0 : index
    %c0_93 = arith.constant 0 : index
    %c0_94 = arith.constant 0 : index
    %90 = vector.load %arg4[%c0_92, %c0_93, %c0_94] : memref<1x64x188xf32, #tpu.memory_space<vmem>>, vector<1x64x188xf32>
    %91 = vector.shape_cast %90 : vector<1x64x188xf32> to vector<64x188xf32>
    %92 = arith.addf %91, %89 : vector<64x188xf32>
    %c0_95 = arith.constant 0 : index
    %c0_96 = arith.constant 0 : index
    %c0_97 = arith.constant 0 : index
    %93 = vector.load %arg4[%c0_95, %c0_96, %c0_97] : memref<1x64x188xf32, #tpu.memory_space<vmem>>, vector<1x64x188xf32>
    %94 = vector.shape_cast %93 : vector<1x64x188xf32> to vector<64x188xf32>
    %95 = vector.shape_cast %92 : vector<64x188xf32> to vector<1x64x188xf32>
    tpu.vector_store %arg4[%c0_95, %c0_96, %c0_97], %95 {strides = array<i32>} : memref<1x64x188xf32, #tpu.memory_space<vmem>>, vector<1x64x188xf32>,
    %c0_98 = arith.constant 0 : index
    %c0_99 = arith.constant 0 : index
    %c0_100 = arith.constant 0 : index
    %96 = vector.load %arg4[%c0_98, %c0_99, %c0_100] : memref<1x64x188xf32, #tpu.memory_space<vmem>>, vector<1x64x188xf32>
    %97 = vector.shape_cast %96 : vector<1x64x188xf32> to vector<64x188xf32>
    %c0_101 = arith.constant 0 : index
    %c0_102 = arith.constant 0 : index
    %98 = vector.load %arg3[%c0_101, %c0_102] : memref<64x1xf32, #tpu.memory_space<vmem>>, vector<64x1xf32>
    %99 = vector.broadcast %98 : vector<64x1xf32> to vector<64x188xf32>
    %100 = arith.addf %97, %99 : vector<64x188xf32>
    %cst_103 = arith.constant 0.000000e+00 : f32
    %101 = vector.broadcast %cst_103 : f32 to vector<64x188xf32>
    %102 = arith.maximumf %100, %101 : vector<64x188xf32>
    %c0_104 = arith.constant 0 : index
    %c0_105 = arith.constant 0 : index
    %c0_106 = arith.constant 0 : index
    %103 = vector.load %arg4[%c0_104, %c0_105, %c0_106] : memref<1x64x188xf32, #tpu.memory_space<vmem>>, vector<1x64x188xf32>
    %104 = vector.shape_cast %103 : vector<1x64x188xf32> to vector<64x188xf32>
    %105 = vector.shape_cast %102 : vector<64x188xf32> to vector<1x64x188xf32>
    tpu.vector_store %arg4[%c0_104, %c0_105, %c0_106], %105 {strides = array<i32>} : memref<1x64x188xf32, #tpu.memory_space<vmem>>, vector<1x64x188xf32>,
    return
  }
  func.func @transform_0(%arg0: i32) -> (i32, i32, i32) {
    %c0_i32 = arith.constant 0 : i32
    %c0_i32_0 = arith.constant 0 : i32
    %c0_i32_1 = arith.constant 0 : i32
    return %arg0, %c0_i32, %c0_i32_0 : i32, i32, i32
  }
  func.func @transform_1(%arg0: i32) -> (i32, i32, i32) {
    %c0_i32 = arith.constant 0 : i32
    %c0_i32_0 = arith.constant 0 : i32
    %c0_i32_1 = arith.constant 0 : i32
    %c0_i32_2 = arith.constant 0 : i32
    return %c0_i32, %c0_i32_0, %c0_i32_1 : i32, i32, i32
  }
  func.func @transform_2(%arg0: i32) -> (i32, i32) {
    %c0_i32 = arith.constant 0 : i32
    %c0_i32_0 = arith.constant 0 : i32
    %c0_i32_1 = arith.constant 0 : i32
    return %c0_i32, %c0_i32_0 : i32, i32
  }
  func.func @transform_3(%arg0: i32) -> (i32, i32, i32) {
    %c0_i32 = arith.constant 0 : i32
    %c0_i32_0 = arith.constant 0 : i32
    %c0_i32_1 = arith.constant 0 : i32
    return %arg0, %c0_i32, %c0_i32_0 : i32, i32, i32
  }
}

module attributes {stable_mosaic.version = 11 : i64} {
  func.func @_fc_fused_kernel(%arg0: i32, %arg1: memref<2x2048xf32, #tpu.memory_space<vmem>>, %arg2: memref<2048x128xf32, #tpu.memory_space<vmem>>, %arg3: memref<1x128xf32, #tpu.memory_space<vmem>>, %arg4: memref<128x2xf32, #tpu.memory_space<vmem>>, %arg5: memref<1x2xf32, #tpu.memory_space<vmem>>, %arg6: memref<2x2xf32, #tpu.memory_space<vmem>>, %arg7: memref<2x128xf32, #tpu.memory_space<vmem>>) attributes {dimension_semantics = [#tpu.dimension_semantics<arbitrary>], iteration_bounds = array<i64: 6>, scalar_prefetch = 0 : i64, scratch_operands = 1 : i64, tpu.core_type = #tpu.core_type<tc>, window_params = [{transform_indices = @transform_0, window_bounds = array<i64: 2, 2048>}, {transform_indices = @transform_1, window_bounds = array<i64: 2048, 128>}, {pipeline_mode = #tpu.pipeline_mode<synchronous>, transform_indices = @transform_2, window_bounds = array<i64: 1, 128>}, {pipeline_mode = #tpu.pipeline_mode<synchronous>, transform_indices = @transform_3, window_bounds = array<i64: 128, 2>}, {pipeline_mode = #tpu.pipeline_mode<synchronous>, transform_indices = @transform_4, window_bounds = array<i64: 1, 2>}, {pipeline_mode = #tpu.pipeline_mode<synchronous>, transform_indices = @transform_5, window_bounds = array<i64: 2, 2>}]} {
    %c0_i32 = arith.constant 0 : i32
    %0 = arith.cmpi eq, %arg0, %c0_i32 : i32
    %1 = arith.extui %0 : i1 to i32
    %c0_i32_0 = arith.constant 0 : i32
    %2 = arith.cmpi ne, %1, %c0_i32_0 : i32
    scf.if %2 {
      %cst_9 = arith.constant 0.000000e+00 : f32
      %12 = vector.broadcast %cst_9 : f32 to vector<2x128xf32>
      %c0_10 = arith.constant 0 : index
      %c0_11 = arith.constant 0 : index
      %13 = vector.load %arg7[%c0_10, %c0_11] : memref<2x128xf32, #tpu.memory_space<vmem>>, vector<2x128xf32>
      tpu.vector_store %arg7[%c0_10, %c0_11], %12 {strides = array<i32>} : memref<2x128xf32, #tpu.memory_space<vmem>>, vector<2x128xf32>,
    } else {
    }
    %c0 = arith.constant 0 : index
    %c0_1 = arith.constant 0 : index
    %3 = vector.load %arg7[%c0, %c0_1] : memref<2x128xf32, #tpu.memory_space<vmem>>, vector<2x128xf32>
    %c0_2 = arith.constant 0 : index
    %c0_3 = arith.constant 0 : index
    %4 = vector.load %arg1[%c0_2, %c0_3] : memref<2x2048xf32, #tpu.memory_space<vmem>>, vector<2x2048xf32>
    %c0_4 = arith.constant 0 : index
    %c0_5 = arith.constant 0 : index
    %5 = vector.load %arg2[%c0_4, %c0_5] : memref<2048x128xf32, #tpu.memory_space<vmem>>, vector<2048x128xf32>
    %cst = arith.constant dense<0.000000e+00> : vector<2x128xf32>
    %6 = tpu.matmul %4, %5, %cst {dimension_numbers = #tpu.dot_dimension_numbers<[1], [0], [0], [1], [0, 0, 1, 1], [], []>} : vector<2x2048xf32>, vector<2048x128xf32>, vector<2x128xf32> -> vector<2x128xf32>
    %7 = arith.addf %3, %6 : vector<2x128xf32>
    %c0_6 = arith.constant 0 : index
    %c0_7 = arith.constant 0 : index
    %8 = vector.load %arg7[%c0_6, %c0_7] : memref<2x128xf32, #tpu.memory_space<vmem>>, vector<2x128xf32>
    tpu.vector_store %arg7[%c0_6, %c0_7], %7 {strides = array<i32>} : memref<2x128xf32, #tpu.memory_space<vmem>>, vector<2x128xf32>,
    %c5_i32 = arith.constant 5 : i32
    %9 = arith.cmpi eq, %arg0, %c5_i32 : i32
    %10 = arith.extui %9 : i1 to i32
    %c0_i32_8 = arith.constant 0 : i32
    %11 = arith.cmpi ne, %10, %c0_i32_8 : i32
    scf.if %11 {
      %c0_9 = arith.constant 0 : index
      %c0_10 = arith.constant 0 : index
      %12 = vector.load %arg7[%c0_9, %c0_10] : memref<2x128xf32, #tpu.memory_space<vmem>>, vector<2x128xf32>
      %c0_11 = arith.constant 0 : index
      %c0_12 = arith.constant 0 : index
      %13 = vector.load %arg3[%c0_11, %c0_12] : memref<1x128xf32, #tpu.memory_space<vmem>>, vector<1x128xf32>
      %14 = vector.broadcast %13 : vector<1x128xf32> to vector<2x128xf32>
      %15 = arith.addf %12, %14 : vector<2x128xf32>
      %cst_13 = arith.constant 0.000000e+00 : f32
      %16 = vector.broadcast %cst_13 : f32 to vector<2x128xf32>
      %17 = arith.maximumf %15, %16 : vector<2x128xf32>
      %c0_14 = arith.constant 0 : index
      %c0_15 = arith.constant 0 : index
      %18 = vector.load %arg4[%c0_14, %c0_15] : memref<128x2xf32, #tpu.memory_space<vmem>>, vector<128x2xf32>
      %cst_16 = arith.constant dense<0.000000e+00> : vector<2x2xf32>
      %19 = tpu.matmul %17, %18, %cst_16 {dimension_numbers = #tpu.dot_dimension_numbers<[1], [0], [0], [1], [0, 0, 1, 1], [], []>} : vector<2x128xf32>, vector<128x2xf32>, vector<2x2xf32> -> vector<2x2xf32>
      %c0_17 = arith.constant 0 : index
      %c0_18 = arith.constant 0 : index
      %20 = vector.load %arg5[%c0_17, %c0_18] : memref<1x2xf32, #tpu.memory_space<vmem>>, vector<1x2xf32>
      %21 = vector.broadcast %20 : vector<1x2xf32> to vector<2x2xf32>
      %22 = arith.addf %19, %21 : vector<2x2xf32>
      %c0_19 = arith.constant 0 : index
      %c0_20 = arith.constant 0 : index
      %23 = vector.load %arg6[%c0_19, %c0_20] : memref<2x2xf32, #tpu.memory_space<vmem>>, vector<2x2xf32>
      tpu.vector_store %arg6[%c0_19, %c0_20], %22 {strides = array<i32>} : memref<2x2xf32, #tpu.memory_space<vmem>>, vector<2x2xf32>,
    } else {
    }
    return
  }
  func.func @transform_0(%arg0: i32) -> (i32, i32) {
    %c0_i32 = arith.constant 0 : i32
    %c0_i32_0 = arith.constant 0 : i32
    return %c0_i32, %arg0 : i32, i32
  }
  func.func @transform_1(%arg0: i32) -> (i32, i32) {
    %c0_i32 = arith.constant 0 : i32
    %c0_i32_0 = arith.constant 0 : i32
    return %arg0, %c0_i32 : i32, i32
  }
  func.func @transform_2(%arg0: i32) -> (i32, i32) {
    %c0_i32 = arith.constant 0 : i32
    %c0_i32_0 = arith.constant 0 : i32
    %c0_i32_1 = arith.constant 0 : i32
    return %c0_i32, %c0_i32_0 : i32, i32
  }
  func.func @transform_3(%arg0: i32) -> (i32, i32) {
    %c0_i32 = arith.constant 0 : i32
    %c0_i32_0 = arith.constant 0 : i32
    %c0_i32_1 = arith.constant 0 : i32
    return %c0_i32, %c0_i32_0 : i32, i32
  }
  func.func @transform_4(%arg0: i32) -> (i32, i32) {
    %c0_i32 = arith.constant 0 : i32
    %c0_i32_0 = arith.constant 0 : i32
    %c0_i32_1 = arith.constant 0 : i32
    return %c0_i32, %c0_i32_0 : i32, i32
  }
  func.func @transform_5(%arg0: i32) -> (i32, i32) {
    %c0_i32 = arith.constant 0 : i32
    %c0_i32_0 = arith.constant 0 : i32
    %c0_i32_1 = arith.constant 0 : i32
    return %c0_i32, %c0_i32_0 : i32, i32
  }
}

</mosaic_0001>

<bundles_post_ra>
// kernel: _lambda_.3
= control target key start
LH: loop header
LB: loop body
LE: loop exit
PB: predicated region body
PF: predicated region fallthrough
CT: control target
= control target key end

     0   :  { %8 = vsyncpa [#allocation3], 0  ;;  %s1868_s0 = inlined_call_operand.vmem [shape: f32[2,8,256], index: 0, kind: input, shape index: {}]   ;;  %s1869_s1 = inlined_call_operand.hbm [shape: f32[9,32,8], index: 1, kind: input, shape index: {}]   ;;  %s1870_s2 = inlined_call_operand.hbm [shape: f32[32,1], index: 2, kind: input, shape index: {}]   ;;  %s1871_s3 = inlined_call_operand.vmem [shape: f32[2,32,222], index: 3, kind: output, shape index: {}]  }
   0x1   :  { %9 = vsyncpa [#allocation5], 0  ;;  %s1594_s12 = smov 0  }
   0x2 LB: > { %s125_s15 = sshll.u32 %s1869_s1, 4  ;;  %s1311_s16 = sadd.s32 4294967295, %s1559_s12   ;;  %s1559_s12 = sphi %s1594_s12, %s15_s12   ;;  %s126_s15 = int_to_ptr.hbm [resolvable:$true] %s125_s15 }
   0x3   : > { %p1313_p0 = scmp.ge.s32.totalorder %s1559_s12, 1  ;;  %p114_p1 = scmp.lt.s32.totalorder %s1559_s12, 3 }
   0x4   : > { %p1417_p2 = scmp.eq.s32.totalorder %s1311_s16, 0  ;;  %s1561_s18 = smov [#allocation2]  }
   0x5   : > { %p1605_p3 = pnand %p1313_p0, %p114_p1  ;;  %s127_s19 = sshll.u32 %s1561_s18, 4  ;;  %s128_s19 = int_to_ptr.vmem [resolvable:$true] %s127_s19 }
   0x6   : > { %s139_s22 = sshll.u32 %s1870_s2, 4  ;;  %s1562_s23 = smov [#allocation4]   ;;  %s140_s22 = int_to_ptr.hbm [resolvable:$true] %s139_s22 }
   0x7   : > { %p1410_p4 = pneg %p1605_p3  ;;  %s141_s24 = sshll.u32 %s1562_s23, 4  ;;  %s142_s24 = int_to_ptr.vmem [resolvable:$true] %s141_s24 }
   0x8   : > { %s1563_s25 = smov 128   ;;  %s1564_s26 = smov 8  }
   0x9   : > { %p1411_p5 = pnand %p1417_p2, %p1410_p4  ;;  %165 = sbr.rel (%p1605_p3) target bundleno = 420 (0x1a4), region = 32 }
   0xb   : > { %1413 = dma.hbm_to_vmem [thread:$0]  (!%p1411_p5), %s126_s15, 4608, %s128_s19, [#allocation3], %s1563_s25, %s1563_s25, %s1564_s26  }
   0xc   : > { %1416 = dma.hbm_to_vmem [thread:$0]  (!%p1411_p5), %s140_s22, 512, %s142_s24, [#allocation5], %s1563_s25, %s1563_s25, %s1564_s26  }
   0xe   : > { %1550 = dma.done.wait (%p1417_p2), [#allocation3], 4608  }
   0xf   : > { %1552 = vsyncadd (%p1417_p2), [#allocation3], 4294962688 }
  0x10   : > { %1554 = dma.done.wait (%p1417_p2), [#allocation5], 512  }
  0x11   : > { %1556 = vsyncadd (%p1417_p2), [#allocation5], 4294966784  ;;  %p195_p6 = scmp.lt.s32.totalorder %s1311_s16, 1  ;;  %vm211_vm0 = vcmask 64512   ;;  %v209_v2 = vld [vmem:[#allocation2 + $0x10] sm:$0xff]  ;;  %s1565_s4 = smov 127  }
  0x12   : > { %s1566_s5 = smov 112   ;;  %s1567_s6 = smov 110   ;;  %v210_v4 = vld [vmem:[#allocation2 + $0x18] sm:$0xff]  ;;  %v207_v5 = vld [vmem:[#allocation2] sm:$0xff]  ;;  %v208_v6 = vld [vmem:[#allocation2 + $0x8] sm:$0xff]  ;;  %vm304_vm1 = vcmask 1039360  }
  0x13   : > { %s1874_s16 = smov (!%p195_p6, %s1311_s16), 1  ;;  %s1568_s7 = smov 126   ;;  %vm526_vm2 = vcmask 916480   ;;  %v294_v11 = vld [vmem:[#allocation2 + $0x20] sm:$0xff]  ;;  %vm415_vm3 = vcmask 1031168   ;;  %vm637_vm4 = vcmask 908288  }
  0x14   : > { %s1398_s27 = sshll.u32 %s1874_s16, 4  ;;  %s1569_s8 = smov 111   ;;  %v295_v18 = vld [vmem:[#allocation2 + $0x28] sm:$0xff]  ;;  %v405_v24 = vld [vmem:[#allocation2 + $0x40] sm:$0xff]  ;;  %v296_v28 = vld [vmem:[#allocation2 + $0x30] sm:$0xff]  ;;  %vm748_vm5 = vcmask 900096  }
  0x15   : > { %s199_s30 = scalar_lea.vmem %s1868_s0, %s1398_s27  ;;  %s1570_s9 = smov 96   ;;  %v406_v30 = vld [vmem:[#allocation2 + $0x48] sm:$0xff]  ;;  %v297_v32 = vld [vmem:[#allocation2 + $0x38] sm:$0xff]  ;;  %v407_v33 = vld [vmem:[#allocation2 + $0x50] sm:$0xff]  ;;  %vm859_vm6 = vcmask 785408   ;;  %vm970_vm7 = vcmask 777216  }
  0x16   : > { %v291_v0 = vld [vmem:[%s199_s30] sm:$0xff]  ;;  %v292_v1 = vld [vmem:[%s199_s30 + $0x8] sm:$0xff]  ;;  %s1571_s10 = smov 95   ;;  %s1572_s11 = smov 94   ;;  %v408_v38 = vld [vmem:[#allocation2 + $0x58] sm:$0xff]  ;;  %vm283_vm8 = vcmask 769024  }
  0x17   : > { %v1442_v3 = vpack.i.bf16 %v292_v1, %v291_v0  ;;  %1401 = vmatpush.msra.mxu3 %v292_v1  ;;  %1400 = vmatpush.msra.mxu2 %v291_v0  ;;  %v516_v36 = vld [vmem:[#allocation2 + $0x60] sm:$0xff]  ;;  %v517_v40 = vld [vmem:[#allocation2 + $0x68] sm:$0xff]  ;;  %v518_v44 = vld [vmem:[#allocation2 + $0x70] sm:$0xff]  ;;  %s1399_s13 = sshll.u32 %s1874_s16, 6 }
  0x18   : > { %1330 = vmatmul.msk.f32.vlgmr.msra.gmra.mxu3 %vm211_vm0, %v209_v2  ;;  %1326 = vmatmul.msk.f32.vlgmr.msra.gmra.mxu2 %vm211_vm0, %v209_v2  ;;  %v627_v41 = vld [vmem:[#allocation2 + $0x80] sm:$0xff]  ;;  %v628_v46 = vld [vmem:[#allocation2 + $0x88] sm:$0xff]  ;;  %v519_v48 = vld [vmem:[#allocation2 + $0x78] sm:$0xff]  ;;  %s1678_s17 = scalar_lea.vmem %s1871_s3, %s1399_s13  ;;  %v1573_v2 = vmov 0  }
  0x19   : > { %1443 = vrot.lane.b32.xlu0 %v1442_v3, %s1565_s4  ;;  %1453 = vrot.lane.b32.xlu1 %v1442_v3, %s1566_s5  ;;  %v629_v49 = vld [vmem:[#allocation2 + $0x90] sm:$0xff]  ;;  %v738_v52 = vld [vmem:[#allocation2 + $0xa0] sm:$0xff]  ;;  %v630_v54 = vld [vmem:[#allocation2 + $0x98] sm:$0xff] }
  0x1a   : > { %1463 = vrot.lane.b32.xlu2 %v1442_v3, %s1567_s6  ;;  %268 = vmatpush.msra.mxu1 %v292_v1  ;;  %v739_v56 = vld [vmem:[#allocation2 + $0xa8] sm:$0xff]  ;;  %v849_v57 = vld [vmem:[#allocation2 + $0xc0] sm:$0xff]  ;;  %v740_v58 = vld [vmem:[#allocation2 + $0xb0] sm:$0xff] }
  0x1b   : > { %239 = vmatpush.msra.mxu0 %v291_v0  ;;  %1328 = vmatmul.msk.f32.vlgmr.msra.gmra.mxu1 %vm211_vm0, %v207_v5  ;;  %v850_v59 = vld [vmem:[#allocation2 + $0xc8] sm:$0xff]  ;;  %v741_v61 = vld [vmem:[#allocation2 + $0xb8] sm:$0xff]  ;;  %v851_v62 = vld [vmem:[#allocation2 + $0xd0] sm:$0xff] }
  0x1c   : > { %1324 = vmatmul.msk.f32.vlgmr.msra.gmra.mxu0 %vm211_vm0, %v207_v5  ;;  %v960_v1 = vld [vmem:[#allocation2 + $0xe0] sm:$0xff]  ;;  %1483 = vset.pattern.permute.xlu0 %v1573_v2 }
  0x1d   : > { %1484 = vset.pattern.permute.xlu1 %v1573_v2  ;;  %1482 = vset.pattern.permute.xlu2 %v1573_v2 }
  0x20   : > { %1331 = vmatmul.msk.f32.gmra.mxu3 %vm211_vm0, %v210_v4  ;;  %1327 = vmatmul.msk.f32.gmra.mxu2 %vm211_vm0, %v210_v4  ;;  %v852_v4 = vld [vmem:[#allocation2 + $0xd8] sm:$0xff] }
  0x21   : > { %1448 = vrot.lane.b32.xlu0 %v1442_v3, %s1568_s7  ;;  %1458 = vrot.lane.b32.xlu1 %v1442_v3, %s1569_s8 }
  0x22   : > { %1468 = vrot.lane.b32.xlu2 %v1442_v3, %s1570_s9 }
  0x23   : > { %1329 = vmatmul.msk.f32.gmra.mxu1 %vm211_vm0, %v208_v6 }
  0x24   : > { %1325 = vmatmul.msk.f32.gmra.mxu0 %vm211_vm0, %v208_v6  ;;  %v961_v6 = vld [vmem:[#allocation2 + $0xe8] sm:$0xff] }
  0x29   : > { %1473 = vrot.lane.b32.xlu0 %v1442_v3, %s1571_s10  ;;  %1478 = vrot.lane.b32.xlu1 %v1442_v3, %s1572_s11  ;;  %v1187_v3 = vld [vmem:[#allocation4 + $0x8] sm:$0xff] }
  0x31   : > { %1197 = vperm.xlu0 %1483, %v1187_v3  }
  0x74   : > { %v1464_v26 = vpop.permute.xlu2 %1463 }
  0x75   : > { %v1466_v27 = vunpack.i.h.bf16 %v1464_v26  ;;  %v1465_v29 = vunpack.i.l.bf16 %v1464_v26 }
  0x77   : > { %v749_v31 = vsel %vm748_vm5, %v1465_v29, %v1466_v27 }
  0x7c   : > { %v1469_v34 = vpop.permute.xlu2 %1468 }
  0x7d   : > { %v1471_v35 = vunpack.i.h.bf16 %v1469_v34  ;;  %v1470_v37 = vunpack.i.l.bf16 %v1469_v34 }
  0x7f   : > { %v860_v39 = vsel %vm859_vm6, %v1470_v37, %v1471_v35 }
  0x8b   : > { %v1444_v7 = vpop.permute.xlu0 %1443  ;;  %v1454_v8 = vpop.permute.xlu1 %1453 }
  0x8c   : > { %v1445_v9 = vunpack.i.l.bf16 %v1444_v7  ;;  %v1446_v10 = vunpack.i.h.bf16 %v1444_v7  ;;  %v1456_v12 = vunpack.i.h.bf16 %v1454_v8  ;;  %v1455_v13 = vunpack.i.l.bf16 %v1454_v8  ;;  %v1188_v7 = vld [vmem:[#allocation4 + $0x10] sm:$0xff]  ;;  %v1071_v8 = vld [vmem:[#allocation2 + $0x100] sm:$0xff] }
  0x8d   : > { %1202 = vperm.xlu1 %1484, %v1188_v7  }
  0x8e   : > { %364 = vmatpush.msrb.mxu3 %v1446_v10  ;;  %v305_v14 = vsel %vm304_vm1, %v1445_v9, %v1446_v10  ;;  %v527_v15 = vsel %vm526_vm2, %v1455_v13, %v1456_v12  ;;  %v962_v9 = vld [vmem:[#allocation2 + $0xf0] sm:$0xff]  ;;  %v1186_v10 = vld [vmem:[#allocation4] sm:$0xff] }
  0x8f   : > { %335 = vmatpush.msrb.mxu2 %v305_v14  ;;  %1336 = vmatmul.msk.f32.vlgmr.msrb.gmra.mxu3 %vm211_vm0, %v294_v11  ;;  %v963_v14 = vld [vmem:[#allocation2 + $0xf8] sm:$0xff] }
  0x90   : > { %1332 = vmatmul.msk.f32.vlgmr.msrb.gmra.mxu2 %vm211_vm0, %v294_v11  ;;  %586 = vmatpush.msra.mxu3 %v1456_v12  ;;  %v1072_v11 = vld [vmem:[#allocation2 + $0x108] sm:$0xff] }
  0x91   : > { %557 = vmatpush.msra.mxu2 %v527_v15  ;;  %1192 = vperm.xlu2 %1482, %v1186_v10   ;;  %v1073_v15 = vld [vmem:[#allocation2 + $0x110] sm:$0xff] }
  0x92   : > { %808 = vmatpush.msrb.mxu3 %v1466_v27 }
  0x93   : > { %v1449_v16 = vpop.permute.xlu0 %1448  ;;  %v1459_v17 = vpop.permute.xlu1 %1458  ;;  %779 = vmatpush.msrb.mxu2 %v749_v31 }
  0x94   : > { %v1450_v19 = vunpack.i.l.bf16 %v1449_v16  ;;  %v1451_v20 = vunpack.i.h.bf16 %v1449_v16  ;;  %v1461_v21 = vunpack.i.h.bf16 %v1459_v17  ;;  %v1460_v22 = vunpack.i.l.bf16 %v1459_v17 }
  0x96   : > { %475 = vmatpush.msrb.mxu1 %v1451_v20  ;;  %v416_v23 = vsel %vm415_vm3, %v1450_v19, %v1451_v20  ;;  %v638_v25 = vsel %vm637_vm4, %v1460_v22, %v1461_v21 }
  0x97   : > { %1337 = vmatmul.msk.f32.gmra.mxu3 %vm211_vm0, %v295_v18  ;;  %446 = vmatpush.msrb.mxu0 %v416_v23 }
  0x98   : > { %1333 = vmatmul.msk.f32.gmra.mxu2 %vm211_vm0, %v295_v18  ;;  %1344 = vmatmul.msk.f32.vlgmr.msrb.gmra.mxu1 %vm211_vm0, %v405_v24  ;;  %v270_v0 = vpop.f32.mrf.mxu1  ;;  %v1074_v18 = vld [vmem:[#allocation2 + $0x118] sm:$0xff] }
  0x99   : > { %1340 = vmatmul.msk.f32.vlgmr.msrb.gmra.mxu0 %vm211_vm0, %v405_v24  ;;  %697 = vmatpush.msra.mxu1 %v1461_v21  ;;  %284 = vst.msk [vmem:[%s1678_s17 + $0x8] sm:$0xff] %vm283_vm8, %v270_v0  ;;  %v241_v13 = vpop.f32.mrf.mxu0 }
  0x9a   : > { %668 = vmatpush.msra.mxu0 %v638_v25  ;;  %v1189_v25 = vld [vmem:[#allocation4 + $0x18] sm:$0xff] }
  0x9b   : > { %919 = vmatpush.msrb.mxu1 %v1471_v35  ;;  %v1474_v42 = vpop.permute.xlu0 %1473  ;;  %v1479_v50 = vpop.permute.xlu1 %1478  ;;  %1207 = vperm.xlu2 %1482, %v1189_v25  }
  0x9c   : > { %890 = vmatpush.msrb.mxu0 %v860_v39  ;;  %v1476_v43 = vunpack.i.h.bf16 %v1474_v42  ;;  %v1475_v45 = vunpack.i.l.bf16 %v1474_v42  ;;  %v1481_v51 = vunpack.i.h.bf16 %v1479_v50  ;;  %v1480_v53 = vunpack.i.l.bf16 %v1479_v50  ;;  %v276_v60 = vpop.f32.mrf.mxu3  ;;  %v247_v12 = vpop.f32.mrf.mxu2 }
  0x9d   : > { %288 = vst.msk [vmem:[%s1678_s17 + $0x28] sm:$0xff] %vm283_vm8, %v276_v60 }
  0x9e   : > { %v971_v47 = vsel %vm970_vm7, %v1475_v45, %v1476_v43  ;;  %v1081_v55 = vsel %vm283_vm8, %v1480_v53, %v1481_v51 }
  0x9f   : > { %1338 = vmatmul.msk.f32.gmra.mxu3 %vm211_vm0, %v296_v28 }
  0xa0   : > { %1334 = vmatmul.msk.f32.gmra.mxu2 %vm211_vm0, %v296_v28  ;;  %1345 = vmatmul.msk.f32.gmra.mxu1 %vm211_vm0, %v406_v30  ;;  %v273_v5 = vpop.f32.mrf.mxu1  ;;  %v379_v19 = vld [vmem:[%s1678_s17 + $0x8] sm:$0xff] }
  0xa1   : > { %1341 = vmatmul.msk.f32.gmra.mxu0 %vm211_vm0, %v406_v30  ;;  %286 = vst.msk [vmem:[%s1678_s17 + $0x18] sm:$0xff] %vm283_vm8, %v273_v5  ;;  %v244_v17 = vpop.f32.mrf.mxu0 }
  0xa4   : > { %v279_v63 = vpop.f32.mrf.mxu3  ;;  %v250_v16 = vpop.f32.mrf.mxu2  ;;  %v383_v39 = vld [vmem:[%s1678_s17 + $0x28] sm:$0xff] }
  0xa5   : > { %290 = vst.msk [vmem:[%s1678_s17 + $0x38] sm:$0xff] %vm283_vm8, %v279_v63 }
  0xa7   : > { %1339 = vmatmul.msk.f32.gmra.mxu3 %vm211_vm0, %v297_v32 }
  0xa8   : > { %1335 = vmatmul.msk.f32.gmra.mxu2 %vm211_vm0, %v297_v32  ;;  %1346 = vmatmul.msk.f32.gmra.mxu1 %vm211_vm0, %v407_v33  ;;  %v381_v28 = vld [vmem:[%s1678_s17 + $0x18] sm:$0xff] }
  0xa9   : > { %1342 = vmatmul.msk.f32.gmra.mxu0 %vm211_vm0, %v407_v33 }
  0xaf   : > { %1352 = vmatmul.msk.f32.vlgmr.msra.gmra.mxu3 %vm211_vm0, %v516_v36 }
  0xb0   : > { %1348 = vmatmul.msk.f32.vlgmr.msra.gmra.mxu2 %vm211_vm0, %v516_v36  ;;  %1347 = vmatmul.msk.f32.gmra.mxu1 %vm211_vm0, %v408_v38 }
  0xb1   : > { %1343 = vmatmul.msk.f32.gmra.mxu0 %vm211_vm0, %v408_v38  ;;  %1030 = vmatpush.msra.mxu3 %v1476_v43 }
  0xb2   : > { %1001 = vmatpush.msra.mxu2 %v971_v47 }
  0xb7   : > { %1353 = vmatmul.msk.f32.gmra.mxu3 %vm211_vm0, %v517_v40 }
  0xb8   : > { %1349 = vmatmul.msk.f32.gmra.mxu2 %vm211_vm0, %v517_v40  ;;  %1360 = vmatmul.msk.f32.vlgmr.msra.gmra.mxu1 %vm211_vm0, %v627_v41 }
  0xb9   : > { %1356 = vmatmul.msk.f32.vlgmr.msra.gmra.mxu0 %vm211_vm0, %v627_v41  ;;  %1140 = vmatpush.msra.mxu1 %v1481_v51 }
  0xba   : > { %1111 = vmatpush.msra.mxu0 %v1081_v55 }
  0xbf   : > { %1354 = vmatmul.msk.f32.gmra.mxu3 %vm211_vm0, %v518_v44 }
  0xc0   : > { %1350 = vmatmul.msk.f32.gmra.mxu2 %vm211_vm0, %v518_v44  ;;  %1361 = vmatmul.msk.f32.gmra.mxu1 %vm211_vm0, %v628_v46 }
  0xc1   : > { %1357 = vmatmul.msk.f32.gmra.mxu0 %vm211_vm0, %v628_v46 }
  0xc7   : > { %1355 = vmatmul.msk.f32.gmra.mxu3 %vm211_vm0, %v519_v48 }
  0xc8   : > { %1351 = vmatmul.msk.f32.gmra.mxu2 %vm211_vm0, %v519_v48  ;;  %1362 = vmatmul.msk.f32.gmra.mxu1 %vm211_vm0, %v629_v49 }
  0xc9   : > { %1358 = vmatmul.msk.f32.gmra.mxu0 %vm211_vm0, %v629_v49  ;;  %v385_v49 = vld [vmem:[%s1678_s17 + $0x38] sm:$0xff] }
  0xcf   : > { %1368 = vmatmul.msk.f32.vlgmr.msrb.gmra.mxu3 %vm211_vm0, %v738_v52 }
  0xd0   : > { %1364 = vmatmul.msk.f32.vlgmr.msrb.gmra.mxu2 %vm211_vm0, %v738_v52  ;;  %1363 = vmatmul.msk.f32.gmra.mxu1 %vm211_vm0, %v630_v54 }
  0xd1   : > { %1359 = vmatmul.msk.f32.gmra.mxu0 %vm211_vm0, %v630_v54 }
  0xd7   : > { %1369 = vmatmul.msk.f32.gmra.mxu3 %vm211_vm0, %v739_v56 }
  0xd8   : > { %1365 = vmatmul.msk.f32.gmra.mxu2 %vm211_vm0, %v739_v56  ;;  %1376 = vmatmul.msk.f32.vlgmr.msrb.gmra.mxu1 %vm211_vm0, %v849_v57 }
  0xd9   : > { %1372 = vmatmul.msk.f32.vlgmr.msrb.gmra.mxu0 %vm211_vm0, %v849_v57 }
  0xdf   : > { %1370 = vmatmul.msk.f32.gmra.mxu3 %vm211_vm0, %v740_v58 }
  0xe0   : > { %1366 = vmatmul.msk.f32.gmra.mxu2 %vm211_vm0, %v740_v58  ;;  %1377 = vmatmul.msk.f32.gmra.mxu1 %vm211_vm0, %v850_v59 }
  0xe1   : > { %1373 = vmatmul.msk.f32.gmra.mxu0 %vm211_vm0, %v850_v59 }
  0xe7   : > { %1371 = vmatmul.msk.f32.gmra.mxu3 %vm211_vm0, %v741_v61 }
  0xe8   : > { %1367 = vmatmul.msk.f32.gmra.mxu2 %vm211_vm0, %v741_v61  ;;  %1378 = vmatmul.msk.f32.gmra.mxu1 %vm211_vm0, %v851_v62 }
  0xe9   : > { %1374 = vmatmul.msk.f32.gmra.mxu0 %vm211_vm0, %v851_v62 }
  0xef   : > { %1384 = vmatmul.msk.f32.vlgmr.msra.gmra.mxu3 %vm211_vm0, %v960_v1 }
  0xf0   : > { %1380 = vmatmul.msk.f32.vlgmr.msra.gmra.mxu2 %vm211_vm0, %v960_v1  ;;  %1379 = vmatmul.msk.f32.gmra.mxu1 %vm211_vm0, %v852_v4 }
  0xf1   : > { %1375 = vmatmul.msk.f32.gmra.mxu0 %vm211_vm0, %v852_v4 }
  0xf7   : > { %1385 = vmatmul.msk.f32.gmra.mxu3 %vm211_vm0, %v961_v6 }
  0xf8   : > { %1381 = vmatmul.msk.f32.gmra.mxu2 %vm211_vm0, %v961_v6  ;;  %1392 = vmatmul.msk.f32.vlgmr.msra.gmra.mxu1 %vm211_vm0, %v1071_v8 }
  0xf9   : > { %1388 = vmatmul.msk.f32.vlgmr.msra.gmra.mxu0 %vm211_vm0, %v1071_v8 }
  0xff   : > { %1386 = vmatmul.msk.f32.gmra.mxu3 %vm211_vm0, %v962_v9 }
 0x100   : > { %1382 = vmatmul.msk.f32.gmra.mxu2 %vm211_vm0, %v962_v9  ;;  %1393 = vmatmul.msk.f32.gmra.mxu1 %vm211_vm0, %v1072_v11 }
 0x101   : > { %1389 = vmatmul.msk.f32.gmra.mxu0 %vm211_vm0, %v1072_v11 }
 0x107   : > { %1387 = vmatmul.msk.f32.gmra.mxu3 %vm211_vm0, %v963_v14 }
 0x108   : > { %1383 = vmatmul.msk.f32.gmra.mxu2 %vm211_vm0, %v963_v14  ;;  %1394 = vmatmul.msk.f32.gmra.mxu1 %vm211_vm0, %v1073_v15 }
 0x109   : > { %1390 = vmatmul.msk.f32.gmra.mxu0 %vm211_vm0, %v1073_v15 }
 0x110   : > { %1395 = vmatmul.msk.f32.gmra.mxu1 %vm211_vm0, %v1074_v18 }
 0x111   : > { %1391 = vmatmul.msk.f32.gmra.mxu0 %vm211_vm0, %v1074_v18 }
 0x112   : > { %v366_v20 = vpop.f32.mrf.mxu3 }
 0x113   : > { %v387_v21 = vadd.f32 %v379_v19, %v366_v20  ;;  %v337_v22 = vpop.f32.mrf.mxu2 }
 0x114   : > { %v386_v23 = vadd.f32 %v337_v22, %v241_v13 }
 0x115   : > { %395 = vst.msk [vmem:[%s1678_s17 + $0x8] sm:$0xff] %vm283_vm8, %v387_v21  ;;  %v477_v24 = vpop.f32.mrf.mxu1 }
 0x116   : > { %v448_v26 = vpop.f32.mrf.mxu0 }
 0x117   : > { %v1717_v27 = vadd.f32 %v448_v26, %v386_v23 }
 0x11a   : > { %v369_v29 = vpop.f32.mrf.mxu3 }
 0x11b   : > { %v389_v30 = vadd.f32 %v381_v28, %v369_v29  ;;  %v340_v31 = vpop.f32.mrf.mxu2 }
 0x11c   : > { %v388_v32 = vadd.f32 %v340_v31, %v244_v17  ;;  %v490_v33 = vld [vmem:[%s1678_s17 + $0x8] sm:$0xff] }
 0x11d   : > { %397 = vst.msk [vmem:[%s1678_s17 + $0x18] sm:$0xff] %vm283_vm8, %v389_v30  ;;  %v498_v34 = vadd.f32 %v490_v33, %v477_v24  ;;  %v480_v35 = vpop.f32.mrf.mxu1 }
 0x11e   : > { %v451_v36 = vpop.f32.mrf.mxu0 }
 0x11f   : > { %506 = vst.msk [vmem:[%s1678_s17 + $0x8] sm:$0xff] %vm283_vm8, %v498_v34  ;;  %v1725_v37 = vadd.f32 %v451_v36, %v388_v32 }
 0x122   : > { %v372_v38 = vpop.f32.mrf.mxu3 }
 0x123   : > { %v391_v40 = vadd.f32 %v383_v39, %v372_v38  ;;  %v343_v41 = vpop.f32.mrf.mxu2 }
 0x124   : > { %v390_v42 = vadd.f32 %v343_v41, %v247_v12  ;;  %v492_v43 = vld [vmem:[%s1678_s17 + $0x18] sm:$0xff] }
 0x125   : > { %399 = vst.msk [vmem:[%s1678_s17 + $0x28] sm:$0xff] %vm283_vm8, %v391_v40  ;;  %v500_v44 = vadd.f32 %v492_v43, %v480_v35  ;;  %v483_v45 = vpop.f32.mrf.mxu1 }
 0x126   : > { %v454_v46 = vpop.f32.mrf.mxu0  ;;  %v601_v59 = vld [vmem:[%s1678_s17 + $0x8] sm:$0xff] }
 0x127   : > { %508 = vst.msk [vmem:[%s1678_s17 + $0x18] sm:$0xff] %vm283_vm8, %v500_v44  ;;  %v1733_v47 = vadd.f32 %v454_v46, %v390_v42 }
 0x12a   : > { %v375_v48 = vpop.f32.mrf.mxu3 }
 0x12b   : > { %v393_v50 = vadd.f32 %v385_v49, %v375_v48  ;;  %v346_v51 = vpop.f32.mrf.mxu2 }
 0x12c   : > { %v392_v52 = vadd.f32 %v346_v51, %v250_v16  ;;  %v494_v53 = vld [vmem:[%s1678_s17 + $0x28] sm:$0xff] }
 0x12d   : > { %401 = vst.msk [vmem:[%s1678_s17 + $0x38] sm:$0xff] %vm283_vm8, %v393_v50  ;;  %v502_v54 = vadd.f32 %v494_v53, %v483_v45  ;;  %v486_v55 = vpop.f32.mrf.mxu1 }
 0x12e   : > { %v457_v56 = vpop.f32.mrf.mxu0  ;;  %v603_v3 = vld [vmem:[%s1678_s17 + $0x18] sm:$0xff] }
 0x12f   : > { %510 = vst.msk [vmem:[%s1678_s17 + $0x28] sm:$0xff] %vm283_vm8, %v502_v54  ;;  %v1741_v57 = vadd.f32 %v457_v56, %v392_v52 }
 0x132   : > { %v588_v58 = vpop.f32.mrf.mxu3 }
 0x133   : > { %v609_v60 = vadd.f32 %v601_v59, %v588_v58  ;;  %v1744_v61 = vpop.f32.mrf.mxu2 }
 0x134   : > { %v496_v62 = vld [vmem:[%s1678_s17 + $0x38] sm:$0xff]  ;;  %v608_v53 = vadd.f32 %v1744_v61, %v1717_v27 }
 0x135   : > { %617 = vst.msk [vmem:[%s1678_s17 + $0x8] sm:$0xff] %vm283_vm8, %v609_v60  ;;  %v504_v63 = vadd.f32 %v496_v62, %v486_v55  ;;  %v699_v0 = vpop.f32.mrf.mxu1 }
 0x136   : > { %v1749_v1 = vpop.f32.mrf.mxu0  ;;  %v605_v11 = vld [vmem:[%s1678_s17 + $0x28] sm:$0xff] }
 0x137   : > { %512 = vst.msk [vmem:[%s1678_s17 + $0x38] sm:$0xff] %vm283_vm8, %v504_v63  ;;  %v719_v59 = vadd.f32 %v1749_v1, %v608_v53 }
 0x13a   : > { %v591_v2 = vpop.f32.mrf.mxu3 }
 0x13b   : > { %v611_v4 = vadd.f32 %v603_v3, %v591_v2  ;;  %v1754_v5 = vpop.f32.mrf.mxu2 }
 0x13c   : > { %v712_v6 = vld [vmem:[%s1678_s17 + $0x8] sm:$0xff]  ;;  %v610_v27 = vadd.f32 %v1754_v5, %v1725_v37 }
 0x13d   : > { %619 = vst.msk [vmem:[%s1678_s17 + $0x18] sm:$0xff] %vm283_vm8, %v611_v4  ;;  %v720_v7 = vadd.f32 %v712_v6, %v699_v0  ;;  %v702_v8 = vpop.f32.mrf.mxu1 }
 0x13e   : > { %v1759_v9 = vpop.f32.mrf.mxu0  ;;  %v607_v19 = vld [vmem:[%s1678_s17 + $0x38] sm:$0xff] }
 0x13f   : > { %728 = vst.msk [vmem:[%s1678_s17 + $0x8] sm:$0xff] %vm283_vm8, %v720_v7  ;;  %v721_v7 = vadd.f32 %v1759_v9, %v610_v27 }
 0x142   : > { %v594_v10 = vpop.f32.mrf.mxu3 }
 0x143   : > { %v613_v12 = vadd.f32 %v605_v11, %v594_v10  ;;  %v1764_v13 = vpop.f32.mrf.mxu2 }
 0x144   : > { %v714_v14 = vld [vmem:[%s1678_s17 + $0x18] sm:$0xff]  ;;  %v612_v5 = vadd.f32 %v1764_v13, %v1733_v47 }
 0x145   : > { %621 = vst.msk [vmem:[%s1678_s17 + $0x28] sm:$0xff] %vm283_vm8, %v613_v12  ;;  %v722_v15 = vadd.f32 %v714_v14, %v702_v8  ;;  %v705_v16 = vpop.f32.mrf.mxu1 }
 0x146   : > { %v1769_v17 = vpop.f32.mrf.mxu0  ;;  %v823_v28 = vld [vmem:[%s1678_s17 + $0x8] sm:$0xff] }
 0x147   : > { %730 = vst.msk [vmem:[%s1678_s17 + $0x18] sm:$0xff] %vm283_vm8, %v722_v15 }
 0x14a   : > { %v597_v18 = vpop.f32.mrf.mxu3 }
 0x14b   : > { %v615_v20 = vadd.f32 %v607_v19, %v597_v18  ;;  %v1774_v21 = vpop.f32.mrf.mxu2 }
 0x14c   : > { %v716_v22 = vld [vmem:[%s1678_s17 + $0x28] sm:$0xff] }
 0x14d   : > { %623 = vst.msk [vmem:[%s1678_s17 + $0x38] sm:$0xff] %vm283_vm8, %v615_v20  ;;  %v724_v23 = vadd.f32 %v716_v22, %v705_v16  ;;  %v708_v24 = vpop.f32.mrf.mxu1  ;;  %v1193_v16 = vpop.permute.xlu2 %1192 }
 0x14e   : > { %v1779_v25 = vpop.f32.mrf.mxu0  ;;  %v825_v36 = vld [vmem:[%s1678_s17 + $0x18] sm:$0xff] }
 0x14f   : > { %732 = vst.msk [vmem:[%s1678_s17 + $0x28] sm:$0xff] %vm283_vm8, %v724_v23 }
 0x152   : > { %v810_v26 = vpop.f32.mrf.mxu3 }
 0x153   : > { %v831_v29 = vadd.f32 %v823_v28, %v810_v26  ;;  %v781_v30 = vpop.f32.mrf.mxu2  ;;  %v723_v26 = vadd.f32 %v1769_v17, %v612_v5  ;;  %v614_v17 = vadd.f32 %v1774_v21, %v1741_v57 }
 0x154   : > { %v718_v31 = vld [vmem:[%s1678_s17 + $0x38] sm:$0xff]  ;;  %v830_v0 = vadd.f32 %v781_v30, %v719_v59 }
 0x155   : > { %839 = vst.msk [vmem:[%s1678_s17 + $0x8] sm:$0xff] %vm283_vm8, %v831_v29  ;;  %v726_v32 = vadd.f32 %v718_v31, %v708_v24  ;;  %v921_v33 = vpop.f32.mrf.mxu1  ;;  %v1198_v31 = vpop.permute.xlu0 %1197 }
 0x156   : > { %v892_v34 = vpop.f32.mrf.mxu0  ;;  %v827_v45 = vld [vmem:[%s1678_s17 + $0x28] sm:$0xff] }
 0x157   : > { %734 = vst.msk [vmem:[%s1678_s17 + $0x38] sm:$0xff] %vm283_vm8, %v726_v32  ;;  %v941_v61 = vadd.f32 %v892_v34, %v830_v0 }
 0x15a   : > { %v813_v35 = vpop.f32.mrf.mxu3 }
 0x15b   : > { %v833_v38 = vadd.f32 %v825_v36, %v813_v35  ;;  %v784_v39 = vpop.f32.mrf.mxu2 }
 0x15c   : > { %v934_v40 = vld [vmem:[%s1678_s17 + $0x8] sm:$0xff]  ;;  %v832_v14 = vadd.f32 %v784_v39, %v721_v7 }
 0x15d   : > { %841 = vst.msk [vmem:[%s1678_s17 + $0x18] sm:$0xff] %vm283_vm8, %v833_v38  ;;  %v942_v41 = vadd.f32 %v934_v40, %v921_v33  ;;  %v924_v42 = vpop.f32.mrf.mxu1 }
 0x15e   : > { %v895_v43 = vpop.f32.mrf.mxu0  ;;  %v829_v55 = vld [vmem:[%s1678_s17 + $0x38] sm:$0xff] }
 0x15f   : > { %950 = vst.msk [vmem:[%s1678_s17 + $0x8] sm:$0xff] %vm283_vm8, %v942_v41  ;;  %v943_v9 = vadd.f32 %v895_v43, %v832_v14 }
 0x162   : > { %v816_v44 = vpop.f32.mrf.mxu3 }
 0x163   : > { %v835_v46 = vadd.f32 %v827_v45, %v816_v44  ;;  %v787_v48 = vpop.f32.mrf.mxu2 }
 0x164   : > { %v936_v49 = vld [vmem:[%s1678_s17 + $0x18] sm:$0xff]  ;;  %v834_v32 = vadd.f32 %v787_v48, %v723_v26  ;;  %v1203_v48 = vpop.permute.xlu1 %1202 }
 0x165   : > { %843 = vst.msk [vmem:[%s1678_s17 + $0x28] sm:$0xff] %vm283_vm8, %v835_v46  ;;  %v944_v50 = vadd.f32 %v936_v49, %v924_v42  ;;  %v927_v51 = vpop.f32.mrf.mxu1  ;;  %v725_v42 = vadd.f32 %v1779_v25, %v614_v17 }
 0x166   : > { %v898_v52 = vpop.f32.mrf.mxu0  ;;  %v1045_v4 = vld [vmem:[%s1678_s17 + $0x8] sm:$0xff] }
 0x167   : > { %952 = vst.msk [vmem:[%s1678_s17 + $0x18] sm:$0xff] %vm283_vm8, %v944_v50  ;;  %v945_v35 = vadd.f32 %v898_v52, %v834_v32 }
 0x16a   : > { %v819_v54 = vpop.f32.mrf.mxu3 }
 0x16b   : > { %v837_v56 = vadd.f32 %v829_v55, %v819_v54  ;;  %v790_v58 = vpop.f32.mrf.mxu2 }
 0x16c   : > { %v938_v60 = vld [vmem:[%s1678_s17 + $0x28] sm:$0xff]  ;;  %v836_v46 = vadd.f32 %v790_v58, %v725_v42 }
 0x16d   : > { %845 = vst.msk [vmem:[%s1678_s17 + $0x38] sm:$0xff] %vm283_vm8, %v837_v56  ;;  %v946_v62 = vadd.f32 %v938_v60, %v927_v51  ;;  %v930_v63 = vpop.f32.mrf.mxu1 }
 0x16e   : > { %v1808_v2 = vpop.f32.mrf.mxu0  ;;  %v1047_v20 = vld [vmem:[%s1678_s17 + $0x18] sm:$0xff] }
 0x16f   : > { %954 = vst.msk [vmem:[%s1678_s17 + $0x28] sm:$0xff] %vm283_vm8, %v946_v62  ;;  %v947_v53 = vadd.f32 %v1808_v2, %v836_v46  ;;  %v1208_v2 = vpop.permute.xlu2 %1207 }
 0x172   : > { %v1032_v3 = vpop.f32.mrf.mxu3 }
 0x173   : > { %v1053_v1 = vadd.f32 %v1045_v4, %v1032_v3  ;;  %v1003_v6 = vpop.f32.mrf.mxu2 }
 0x174   : > { %v1052_v8 = vadd.f32 %v1003_v6, %v941_v61  ;;  %v940_v10 = vld [vmem:[%s1678_s17 + $0x38] sm:$0xff] }
 0x175   : > { %1061 = vst.msk [vmem:[%s1678_s17 + $0x8] sm:$0xff] %vm283_vm8, %v1053_v1  ;;  %v948_v11 = vadd.f32 %v940_v10, %v930_v63  ;;  %v1142_v12 = vpop.f32.mrf.mxu1 }
 0x176   : > { %v1113_v15 = vpop.f32.mrf.mxu0  ;;  %v1049_v38 = vld [vmem:[%s1678_s17 + $0x28] sm:$0xff] }
 0x177   : > { %956 = vst.msk [vmem:[%s1678_s17 + $0x38] sm:$0xff] %vm283_vm8, %v948_v11  ;;  %v1162_v37 = vadd.f32 %v1113_v15, %v1052_v8 }
 0x179   : > { %v1210_v18 = vadd.f32 %v1193_v16, %v1162_v37 }
 0x17a   : > { %v1035_v19 = vpop.f32.mrf.mxu3 }
 0x17b   : > { %v1055_v22 = vadd.f32 %v1047_v20, %v1035_v19  ;;  %v1006_v23 = vpop.f32.mrf.mxu2  ;;  %v1218_v24 = vmax.f32 %v1210_v18, 0.0 }
 0x17c   : > { %v1054_v28 = vadd.f32 %v1006_v23, %v943_v9  ;;  %v1155_v29 = vld [vmem:[%s1678_s17 + $0x8] sm:$0xff] }
 0x17d   : > { %1063 = vst.msk [vmem:[%s1678_s17 + $0x18] sm:$0xff] %vm283_vm8, %v1055_v22  ;;  %v1163_v30 = vadd.f32 %v1155_v29, %v1142_v12  ;;  %v1145_v47 = vpop.f32.mrf.mxu1 }
 0x17e   : > { %v1116_v13 = vpop.f32.mrf.mxu0  ;;  %1226 = vst [vmem:[%s1678_s17] sm:$0xff] %v1218_v24  ;;  %v1051_v55 = vld [vmem:[%s1678_s17 + $0x38] sm:$0xff] }
 0x17f   : > { %1171 = vst.msk [vmem:[%s1678_s17 + $0x8] sm:$0xff] %vm283_vm8, %v1163_v30  ;;  %v1164_v33 = vadd.f32 %v1116_v13, %v1054_v28 }
 0x181   : > { %v1212_v34 = vadd.f32 %v1198_v31, %v1164_v33 }
 0x182   : > { %v1038_v36 = vpop.f32.mrf.mxu3 }
 0x183   : > { %v1057_v39 = vadd.f32 %v1049_v38, %v1038_v36  ;;  %v1009_v40 = vpop.f32.mrf.mxu2  ;;  %v1220_v41 = vmax.f32 %v1212_v34, 0.0 }
 0x184   : > { %v1056_v43 = vadd.f32 %v1009_v40, %v945_v35  ;;  %v1157_v44 = vld [vmem:[%s1678_s17 + $0x18] sm:$0xff] }
 0x185   : > { %1065 = vst.msk [vmem:[%s1678_s17 + $0x28] sm:$0xff] %vm283_vm8, %v1057_v39  ;;  %v1165_v45 = vadd.f32 %v1157_v44, %v1145_v47  ;;  %v1148_v25 = vpop.f32.mrf.mxu1 }
 0x186   : > { %v1179_v57 = vld [vmem:[%s1678_s17 + $0x8] sm:$0xff]  ;;  %v1119_v21 = vpop.f32.mrf.mxu0  ;;  %1228 = vst [vmem:[%s1678_s17 + $0x10] sm:$0xff] %v1220_v41 }
 0x187   : > { %1173 = vst.msk [vmem:[%s1678_s17 + $0x18] sm:$0xff] %vm283_vm8, %v1165_v45  ;;  %v1211_v49 = vadd.f32 %v1193_v16, %v1179_v57  ;;  %v1166_v50 = vadd.f32 %v1119_v21, %v1056_v43 }
 0x189   : > { %v1219_v51 = vmax.f32 %v1211_v49, 0.0  ;;  %v1214_v52 = vadd.f32 %v1203_v48, %v1166_v50 }
 0x18a   : > { %v1041_v54 = vpop.f32.mrf.mxu3 }
 0x18b   : > { %1227 = vst.msk [vmem:[%s1678_s17 + $0x8] sm:$0xff] %vm283_vm8, %v1219_v51  ;;  %v1059_v56 = vadd.f32 %v1051_v55, %v1041_v54  ;;  %v1012_v58 = vpop.f32.mrf.mxu2  ;;  %v1222_v59 = vmax.f32 %v1214_v52, 0.0 }
 0x18c   : > { %v1058_v60 = vadd.f32 %v1012_v58, %v947_v53  ;;  %v1159_v62 = vld [vmem:[%s1678_s17 + $0x28] sm:$0xff] }
 0x18d   : > { %1067 = vst.msk [vmem:[%s1678_s17 + $0x38] sm:$0xff] %vm283_vm8, %v1059_v56  ;;  %v1167_v63 = vadd.f32 %v1159_v62, %v1148_v25  ;;  %v1151_v6 = vpop.f32.mrf.mxu1 }
 0x18e   : > { %v1181_v0 = vld [vmem:[%s1678_s17 + $0x18] sm:$0xff]  ;;  %v1122_v27 = vpop.f32.mrf.mxu0  ;;  %1230 = vst [vmem:[%s1678_s17 + $0x20] sm:$0xff] %v1222_v59 }
 0x18f   : > { %1175 = vst.msk [vmem:[%s1678_s17 + $0x28] sm:$0xff] %vm283_vm8, %v1167_v63  ;;  %v1213_v61 = vadd.f32 %v1198_v31, %v1181_v0  ;;  %v1168_v3 = vadd.f32 %v1122_v27, %v1058_v60 }
 0x191   : > { %v1221_v4 = vmax.f32 %v1213_v61, 0.0  ;;  %v1216_v1 = vadd.f32 %v1208_v2, %v1168_v3 }
 0x193   : > { %1229 = vst.msk [vmem:[%s1678_s17 + $0x18] sm:$0xff] %vm283_vm8, %v1221_v4  ;;  %v1224_v7 = vmax.f32 %v1216_v1, 0.0 }
 0x194   : > { %v1161_v8 = vld [vmem:[%s1678_s17 + $0x38] sm:$0xff] }
 0x195   : > { %v1169_v10 = vadd.f32 %v1161_v8, %v1151_v6  ;;  %1232 = vst [vmem:[%s1678_s17 + $0x30] sm:$0xff] %v1224_v7 }
 0x196   : > { %v1183_v11 = vld [vmem:[%s1678_s17 + $0x28] sm:$0xff] }
 0x197   : > { %1177 = vst.msk [vmem:[%s1678_s17 + $0x38] sm:$0xff] %vm283_vm8, %v1169_v10  ;;  %v1215_v12 = vadd.f32 %v1203_v48, %v1183_v11 }
 0x199   : > { %v1223_v14 = vmax.f32 %v1215_v12, 0.0 }
 0x19b   : > { %1231 = vst.msk [vmem:[%s1678_s17 + $0x28] sm:$0xff] %vm283_vm8, %v1223_v14 }
 0x19e   : > { %v1185_v15 = vld [vmem:[%s1678_s17 + $0x38] sm:$0xff] }
 0x19f   : > { %v1217_v16 = vadd.f32 %v1208_v2, %v1185_v15 }
 0x1a1   : > { %v1225_v37 = vmax.f32 %v1217_v16, 0.0 }
 0x1a3   : > { %1233 = vst.msk [vmem:[%s1678_s17 + $0x38] sm:$0xff] %vm283_vm8, %v1225_v37 }
 0x1a4 PF: > { %s15_s12 = sadd.s32 1, %s1559_s12  }
 0x1a5   : > { %p12_p7 = scmp.ge.s32.totalorder %s15_s12, 4  }
 0x1a7   :  { %14 = sbr.rel (!%p12_p7) target bundleno = 2 (0x2), region = 79 }
 0x1ac   :  { %1255 = vsyncpa [#allocation3], 1 }
 0x1ad   :  { %1257 = vsyncpa [#allocation3 + $0x1], 1 }
 0x1ae   :  { %1258 = vsyncpa [#allocation5], 1 }

// kernel: _lambda_.5
= control target key start
LH: loop header
LB: loop body
LE: loop exit
PB: predicated region body
PF: predicated region fallthrough
CT: control target
= control target key end

     0   :  { %10 = vsyncpa [#allocation4], 0  ;;  %s1843_s0 = inlined_call_operand.vmem [shape: f32[2,12288], index: 0, kind: input, shape index: {}]   ;;  %s1844_s1 = inlined_call_operand.hbm [shape: f32[12288,128], index: 1, kind: input, shape index: {}]   ;;  %s1845_s2 = inlined_call_operand.hbm [shape: f32[1,128], index: 2, kind: input, shape index: {}]   ;;  %s1846_s3 = inlined_call_operand.hbm [shape: f32[128,2], index: 3, kind: input, shape index: {}]   ;;  %s1847_s4 = inlined_call_operand.hbm [shape: f32[1,2], index: 4, kind: input, shape index: {}]   ;;  %s1848_s5 = inlined_call_operand.hbm [shape: f32[2,2], index: 5, kind: output, shape index: {}]  }
   0x1   :  { %12 = vsyncpa [#allocation4 + $0x1], 0 }
   0x2   :  { %13 = vsyncpa [#allocation7], 0 }
   0x3   :  { %14 = vsyncpa [#allocation10], 0 }
   0x4   :  { %15 = vsyncpa [#allocation5], 0  ;;  %s1422_s18 = smov 0   ;;  %s1424_s19 = smov 0  }
   0x5   :  { %s1426_s20 = smov 0   ;;  %s1428_s21 = smov 0  }
   0x6 LB: > { %s1441_s22 = sadd.s32 4294967295, %s1383_s21   ;;  %p67_p0 = scmp.ne.s32.totalorder %s1375_s19, %s1371_s18  ;;  %s1383_s21 = sphi %s1428_s21, %s1857_s21   ;;  %s1379_s20 = sphi %s1426_s20, %s1856_s20   ;;  %s1375_s19 = sphi %s1424_s19, %s1855_s19   ;;  %s1371_s18 = sphi %s1422_s18, %s1854_s18  }
   0x7   : > { %p68_p1 = scmp.eq.s32.totalorder %s1441_s22, 0  ;;  %p1085_p2 = scmp.ge.s32.totalorder %s1383_s21, 1 }
   0x8   : > { %p162_p3 = scmp.lt.s32.totalorder %s1383_s21, 7  ;;  %p1086_p4 = scmp.ne.s32.totalorder %s1441_s22, 0 }
   0x9   : > { %p1450_p5 = por %p68_p1, %p67_p0  ;;  %s174_s26 = sshll.u32 %s1845_s2, 4  ;;  %s175_s26 = int_to_ptr.hbm [resolvable:$true] %s174_s26 }
   0xa   : > { %p1457_p6 = pnand %p1085_p2, %p162_p3  ;;  %s1385_s28 = smov [#allocation6]  }
   0xb   : > { %s176_s29 = sshll.u32 %s1385_s28, 4  ;;  %s185_s7 = sshll.u32 %s1846_s3, 4  ;;  %s177_s29 = int_to_ptr.vmem [resolvable:$true] %s176_s29  ;;  %s186_s7 = int_to_ptr.hbm [resolvable:$true] %s185_s7 }
   0xc   : > { %p1125_p7 = pneg %p1457_p6  ;;  %s1386_s9 = smov [#allocation8]  }
   0xd   : > { %s187_s10 = sshll.u32 %s1386_s9, 4  ;;  %s1387_s11 = smov 128   ;;  %s188_s10 = int_to_ptr.vmem [resolvable:$true] %s187_s10 }
   0xe   : > { %p1468_p8 = pnand %p1125_p7, %p68_p1  ;;  %s1388_s12 = smov 8  }
   0xf   : > { %s200_s15 = sshll.u32 %s1847_s4, 4  ;;  %s1389_s16 = smov [#allocation9]   ;;  %s201_s15 = int_to_ptr.hbm [resolvable:$true] %s200_s15 }
  0x10   : > { %1128 = dma.hbm_to_vmem [thread:$0]  (!%p1468_p8), %s175_s26, 16, %s177_s29, [#allocation7]  }
  0x11   : > { %1131 = dma.hbm_to_vmem [thread:$0]  (!%p1468_p8), %s186_s7, 2048, %s188_s10, [#allocation7], %s1387_s11, %s1387_s11, %s1388_s12  }
  0x12   : > { %s202_s17 = sshll.u32 %s1389_s16, 4  ;;  %s1485_s18 = sadd.s32 1, %s1383_s21   ;;  %s203_s17 = int_to_ptr.vmem [resolvable:$true] %s202_s17 }
  0x13   : > { %1134 = dma.hbm_to_vmem [thread:$0]  (!%p1468_p8), %s201_s15, 16, %s203_s17, [#allocation10]  }
  0x14   : > { %s51_s24 = ssub.s32 %s1383_s21, %s1485_s18  ;;  %s54_s25 = sadd.s32 1, %s1379_s20 }
  0x15   : > { %p52_p9 = scmp.eq.s32.totalorder %s51_s24, 0  ;;  %p61_p10 = scmp.ne.s32.totalorder %s1379_s20, %s1375_s19 }
  0x16   : > { %p62_p11 = scmp.eq.s32.totalorder %s1383_s21, 0  ;;  %p1142_p12 = scmp.lt.s32.totalorder %s1383_s21, 6 }
  0x17   : > { %s1495_s26 = scalar_select %p52_p9, %s1379_s20, %s54_s25  }
  0x18   : > { %p63_p13 = por %p62_p11, %p61_p10  ;;  %s222_s28 = sand.u32 1, %s1379_s20  }
  0x19   : > { %s1090_s29 = sshll.u32 %s222_s28, 11  ;;  %s1106_s30 = sshll.u32 %s1383_s21, 11 }
  0x1a   : > { %s231_s8 = scalar_lea.hbm %s1844_s1, %s1106_s30  ;;  %s226_s9 = scalar_lea.vmem [#allocation3], %s1090_s29 }
  0x1b   : > { %s234_s10 = sshll.u32 %s226_s9, 4  ;;  %s232_s13 = sshll.u32 %s231_s8, 4  ;;  %s235_s10 = int_to_ptr.vmem [resolvable:$true] %s234_s10  ;;  %s233_s13 = int_to_ptr.hbm [resolvable:$true] %s232_s13 }
  0x1c   : > { %p1502_p0 = pnand %p1142_p12, %p63_p13  ;;  %s223_s15 = scalar_lea.sflag [#allocation4], %s222_s28 }
  0x1d   : > { %s1279_s16 = sshra.s32 %s233_s13, 4  ;;  %s1286_s25 = scalar_lea.hbm %s1844_s1, 12288  ;;  %s1280_s16 = int_to_ptr.hbm [resolvable:$true] %s1279_s16 }
  0x1e   : > { %s1281_s17 = scalar_lea.hbm %s1280_s16, 2048  ;;  %p1283_p3 = pneg %p1502_p0 }
  0x1f   : > { %p1282_p2 = scmp.ne.s32.totalorder %s1280_s16, %s1281_s17  ;;  %p1287_p9 = scmp.lt.s32.totalorder %s1280_s16, %s1844_s1 }
  0x20   : > { %p1288_p10 = scmp.lt.s32.totalorder %s1286_s25, %s1281_s17 }
  0x21   : > { %p1284_p7 = pnand %p1283_p3, %p1282_p2 }
  0x22   : > { %p1289_p11 = por %p1288_p10, %p1287_p9 }
  0x23   : > { %p1285_p8 = pneg %p1284_p7 }
  0x25   : > { %p1290_p12 = pnand %p1289_p11, %p1285_p8 }
  0x27   : > { %1293 = shalt.err (!%p1290_p12)
}
  0x28   : > { %1138 = dma.hbm_to_vmem [thread:$0]  (!%p1502_p0), %s233_s13, 32768, %s235_s10, %s223_s15, %s1387_s11, %s1387_s11, %s1388_s12  }
  0x29   : > { %246 = sbr.rel (%p1457_p6) target bundleno = 499 (0x1f3), region = 40  ;;  %s248_s28 = sand.u32 (!%p1457_p6), 1, %s1375_s19  }
  0x2a   : > { %s1094_s6 = sshll.u32 (!%p1457_p6), %s248_s28, 11  ;;  %s249_s7 = scalar_lea.sflag (!%p1457_p6), [#allocation4], %s248_s28 }
  0x2b   : > { %s1522_s8 = scalar_lea.vmem (!%p1457_p6), [#allocation3], %s1094_s6 }
  0x2e   : > { %1354 = dma.done.wait (%p1450_p5), %s249_s7, 32768  }
  0x2f   : > { %1356 = vsyncadd (%p1450_p5), %s249_s7, 4294934528 }
  0x30   : > { %1358 = dma.done.wait (%p68_p1), [#allocation7], 2064  }
  0x31   : > { %1360 = vsyncadd (%p68_p1), [#allocation7], 4294965232 }
  0x32   : > { %1362 = dma.done.wait (%p68_p1), [#allocation10], 16  }
  0x33   : > { %1364 = vsyncadd (%p68_p1), [#allocation10], 4294967280  ;;  %s1098_s27 = sshll.u32 %s1441_s22, 4 }
  0x34   : > { %p296_p6 = scmp.lt.s32.totalorder %s1098_s27, 95  ;;  %305 = sbr.rel (%p1086_p4) target bundleno = 59 (0x3b), region = 60 }
  0x36   : > { %s1859_s27 = smov (!%p296_p6, %s1098_s27), 95 }
  0x37   : > { %s1099_s11 = sshll.u32 %s1859_s27, 1 }
  0x38   : > { %s1540_s9 = scalar_lea.vmem %s1843_s0, %s1099_s11 }
  0x39   : > { %v1390_v0 = vmov 0.0  }
  0x3a   : > { %306 = vst [vmem:[#allocation2] sm:$0x3] %v1390_v0 }
  0x3b PF: > { %v327_v1 = vld [vmem:[%s1522_s8 + $0x78] sm:$0xff]  ;;  %v326_v3 = vld [vmem:[%s1522_s8 + $0x70] sm:$0xff]  ;;  %v325_v7 = vld [vmem:[%s1522_s8 + $0x68] sm:$0xff]  ;;  %p1101_p1 = scmp.ne.s32.totalorder %s1441_s22, 5 }
  0x3c   : > { %v359_v2 = vld [vmem:[%s1522_s8 + $0x178] sm:$0xff]  ;;  %609 = vmatpush.msra.mxu0 %v327_v1  ;;  %v358_v5 = vld [vmem:[%s1522_s8 + $0x170] sm:$0xff]  ;;  %v357_v9 = vld [vmem:[%s1522_s8 + $0x168] sm:$0xff] }
  0x3d   : > { %649 = vmatpush.msra.mxu2 %v359_v2  ;;  %v343_v4 = vld [vmem:[%s1522_s8 + $0xf8] sm:$0xff]  ;;  %v342_v8 = vld [vmem:[%s1522_s8 + $0xf0] sm:$0xff]  ;;  %v341_v11 = vld [vmem:[%s1522_s8 + $0xe8] sm:$0xff] }
  0x3e   : > { %v375_v6 = vld [vmem:[%s1522_s8 + $0x1f8] sm:$0xff]  ;;  %629 = vmatpush.msra.mxu1 %v343_v4  ;;  %610 = vmatpush.msra.mxu0 %v326_v3  ;;  %v374_v10 = vld [vmem:[%s1522_s8 + $0x1f0] sm:$0xff]  ;;  %v324_v12 = vld [vmem:[%s1522_s8 + $0x60] sm:$0xff] }
  0x3f   : > { %669 = vmatpush.msra.mxu3 %v375_v6  ;;  %650 = vmatpush.msra.mxu2 %v358_v5  ;;  %v356_v13 = vld [vmem:[%s1522_s8 + $0x160] sm:$0xff]  ;;  %v373_v14 = vld [vmem:[%s1522_s8 + $0x1e8] sm:$0xff]  ;;  %v323_v17 = vld [vmem:[%s1522_s8 + $0x58] sm:$0xff] }
  0x40   : > { %630 = vmatpush.msra.mxu1 %v342_v8  ;;  %611 = vmatpush.msra.mxu0 %v325_v7  ;;  %v340_v15 = vld [vmem:[%s1522_s8 + $0xe0] sm:$0xff]  ;;  %v355_v18 = vld [vmem:[%s1522_s8 + $0x158] sm:$0xff]  ;;  %v322_v21 = vld [vmem:[%s1522_s8 + $0x50] sm:$0xff] }
  0x41   : > { %670 = vmatpush.msra.mxu3 %v374_v10  ;;  %651 = vmatpush.msra.mxu2 %v357_v9  ;;  %v372_v16 = vld [vmem:[%s1522_s8 + $0x1e0] sm:$0xff]  ;;  %v339_v19 = vld [vmem:[%s1522_s8 + $0xd8] sm:$0xff]  ;;  %v354_v22 = vld [vmem:[%s1522_s8 + $0x150] sm:$0xff] }
  0x42   : > { %631 = vmatpush.msra.mxu1 %v341_v11  ;;  %612 = vmatpush.msra.mxu0 %v324_v12  ;;  %v371_v20 = vld [vmem:[%s1522_s8 + $0x1d8] sm:$0xff]  ;;  %v338_v23 = vld [vmem:[%s1522_s8 + $0xd0] sm:$0xff]  ;;  %v321_v25 = vld [vmem:[%s1522_s8 + $0x48] sm:$0xff] }
  0x43   : > { %671 = vmatpush.msra.mxu3 %v373_v14  ;;  %652 = vmatpush.msra.mxu2 %v356_v13  ;;  %v370_v24 = vld [vmem:[%s1522_s8 + $0x1d0] sm:$0xff]  ;;  %v353_v26 = vld [vmem:[%s1522_s8 + $0x148] sm:$0xff]  ;;  %v320_v29 = vld [vmem:[%s1522_s8 + $0x40] sm:$0xff] }
  0x44   : > { %632 = vmatpush.msra.mxu1 %v340_v15  ;;  %613 = vmatpush.msra.mxu0 %v323_v17  ;;  %v337_v27 = vld [vmem:[%s1522_s8 + $0xc8] sm:$0xff]  ;;  %v352_v30 = vld [vmem:[%s1522_s8 + $0x140] sm:$0xff]  ;;  %v319_v33 = vld [vmem:[%s1522_s8 + $0x38] sm:$0xff] }
  0x45   : > { %672 = vmatpush.msra.mxu3 %v372_v16  ;;  %653 = vmatpush.msra.mxu2 %v355_v18  ;;  %v369_v28 = vld [vmem:[%s1522_s8 + $0x1c8] sm:$0xff]  ;;  %v336_v31 = vld [vmem:[%s1522_s8 + $0xc0] sm:$0xff]  ;;  %v351_v34 = vld [vmem:[%s1522_s8 + $0x138] sm:$0xff] }
  0x46   : > { %633 = vmatpush.msra.mxu1 %v339_v19  ;;  %614 = vmatpush.msra.mxu0 %v322_v21  ;;  %v368_v32 = vld [vmem:[%s1522_s8 + $0x1c0] sm:$0xff]  ;;  %v335_v35 = vld [vmem:[%s1522_s8 + $0xb8] sm:$0xff]  ;;  %v318_v37 = vld [vmem:[%s1522_s8 + $0x30] sm:$0xff] }
  0x47   : > { %673 = vmatpush.msra.mxu3 %v371_v20  ;;  %654 = vmatpush.msra.mxu2 %v354_v22  ;;  %v367_v36 = vld [vmem:[%s1522_s8 + $0x1b8] sm:$0xff]  ;;  %v350_v38 = vld [vmem:[%s1522_s8 + $0x130] sm:$0xff]  ;;  %v317_v41 = vld [vmem:[%s1522_s8 + $0x28] sm:$0xff] }
  0x48   : > { %634 = vmatpush.msra.mxu1 %v338_v23  ;;  %615 = vmatpush.msra.mxu0 %v321_v25  ;;  %v334_v39 = vld [vmem:[%s1522_s8 + $0xb0] sm:$0xff]  ;;  %v349_v42 = vld [vmem:[%s1522_s8 + $0x128] sm:$0xff]  ;;  %v316_v45 = vld [vmem:[%s1522_s8 + $0x20] sm:$0xff] }
  0x49   : > { %674 = vmatpush.msra.mxu3 %v370_v24  ;;  %655 = vmatpush.msra.mxu2 %v353_v26  ;;  %v366_v40 = vld [vmem:[%s1522_s8 + $0x1b0] sm:$0xff]  ;;  %v333_v43 = vld [vmem:[%s1522_s8 + $0xa8] sm:$0xff]  ;;  %v348_v46 = vld [vmem:[%s1522_s8 + $0x120] sm:$0xff] }
  0x4a   : > { %635 = vmatpush.msra.mxu1 %v337_v27  ;;  %616 = vmatpush.msra.mxu0 %v320_v29  ;;  %v365_v44 = vld [vmem:[%s1522_s8 + $0x1a8] sm:$0xff]  ;;  %v332_v47 = vld [vmem:[%s1522_s8 + $0xa0] sm:$0xff]  ;;  %v315_v49 = vld [vmem:[%s1522_s8 + $0x18] sm:$0xff] }
  0x4b   : > { %675 = vmatpush.msra.mxu3 %v369_v28  ;;  %656 = vmatpush.msra.mxu2 %v352_v30  ;;  %v364_v48 = vld [vmem:[%s1522_s8 + $0x1a0] sm:$0xff]  ;;  %v347_v50 = vld [vmem:[%s1522_s8 + $0x118] sm:$0xff]  ;;  %v314_v53 = vld [vmem:[%s1522_s8 + $0x10] sm:$0xff] }
  0x4c   : > { %636 = vmatpush.msra.mxu1 %v336_v31  ;;  %617 = vmatpush.msra.mxu0 %v319_v33  ;;  %v331_v51 = vld [vmem:[%s1522_s8 + $0x98] sm:$0xff]  ;;  %v346_v54 = vld [vmem:[%s1522_s8 + $0x110] sm:$0xff]  ;;  %v313_v57 = vld [vmem:[%s1522_s8 + $0x8] sm:$0xff] }
  0x4d   : > { %676 = vmatpush.msra.mxu3 %v368_v32  ;;  %657 = vmatpush.msra.mxu2 %v351_v34  ;;  %v363_v52 = vld [vmem:[%s1522_s8 + $0x198] sm:$0xff]  ;;  %v330_v55 = vld [vmem:[%s1522_s8 + $0x90] sm:$0xff]  ;;  %v345_v58 = vld [vmem:[%s1522_s8 + $0x108] sm:$0xff] }
  0x4e   : > { %637 = vmatpush.msra.mxu1 %v335_v35  ;;  %618 = vmatpush.msra.mxu0 %v318_v37  ;;  %v362_v56 = vld [vmem:[%s1522_s8 + $0x190] sm:$0xff]  ;;  %v329_v59 = vld [vmem:[%s1522_s8 + $0x88] sm:$0xff]  ;;  %v312_v61 = vld [vmem:[%s1522_s8] sm:$0xff] }
  0x4f   : > { %677 = vmatpush.msra.mxu3 %v367_v36  ;;  %658 = vmatpush.msra.mxu2 %v350_v38  ;;  %v361_v60 = vld [vmem:[%s1522_s8 + $0x188] sm:$0xff]  ;;  %v344_v62 = vld [vmem:[%s1522_s8 + $0x100] sm:$0xff]  ;;  %v391_v63 = vld [vmem:[%s1522_s8 + $0x278] sm:$0xff] }
  0x50   : > { %638 = vmatpush.msra.mxu1 %v334_v39  ;;  %619 = vmatpush.msra.mxu0 %v317_v41  ;;  %v423_v0 = vld [vmem:[%s1522_s8 + $0x378] sm:$0xff]  ;;  %v328_v1 = vld [vmem:[%s1522_s8 + $0x80] sm:$0xff]  ;;  %v390_v3 = vld [vmem:[%s1522_s8 + $0x270] sm:$0xff] }
  0x51   : > { %678 = vmatpush.msra.mxu3 %v366_v40  ;;  %659 = vmatpush.msra.mxu2 %v349_v42  ;;  %v360_v2 = vld [vmem:[%s1522_s8 + $0x180] sm:$0xff]  ;;  %v407_v4 = vld [vmem:[%s1522_s8 + $0x2f8] sm:$0xff]  ;;  %v422_v5 = vld [vmem:[%s1522_s8 + $0x370] sm:$0xff] }
  0x52   : > { %639 = vmatpush.msra.mxu1 %v333_v43  ;;  %620 = vmatpush.msra.mxu0 %v316_v45  ;;  %v439_v6 = vld [vmem:[%s1522_s8 + $0x3f8] sm:$0xff]  ;;  %v389_v7 = vld [vmem:[%s1522_s8 + $0x268] sm:$0xff]  ;;  %v406_v8 = vld [vmem:[%s1522_s8 + $0x2f0] sm:$0xff] }
  0x53   : > { %679 = vmatpush.msra.mxu3 %v365_v44  ;;  %660 = vmatpush.msra.mxu2 %v348_v46  ;;  %v421_v9 = vld [vmem:[%s1522_s8 + $0x368] sm:$0xff]  ;;  %v438_v10 = vld [vmem:[%s1522_s8 + $0x3f0] sm:$0xff]  ;;  %v388_v11 = vld [vmem:[%s1522_s8 + $0x260] sm:$0xff] }
  0x54   : > { %640 = vmatpush.msra.mxu1 %v332_v47  ;;  %621 = vmatpush.msra.mxu0 %v315_v49  ;;  %v405_v12 = vld [vmem:[%s1522_s8 + $0x2e8] sm:$0xff]  ;;  %v420_v13 = vld [vmem:[%s1522_s8 + $0x360] sm:$0xff]  ;;  %v387_v15 = vld [vmem:[%s1522_s8 + $0x258] sm:$0xff] }
  0x55   : > { %680 = vmatpush.msra.mxu3 %v364_v48  ;;  %661 = vmatpush.msra.mxu2 %v347_v50  ;;  %v437_v14 = vld [vmem:[%s1522_s8 + $0x3e8] sm:$0xff]  ;;  %v404_v16 = vld [vmem:[%s1522_s8 + $0x2e0] sm:$0xff]  ;;  %v419_v17 = vld [vmem:[%s1522_s8 + $0x358] sm:$0xff] }
  0x56   : > { %641 = vmatpush.msra.mxu1 %v331_v51  ;;  %622 = vmatpush.msra.mxu0 %v314_v53  ;;  %v436_v18 = vld [vmem:[%s1522_s8 + $0x3e0] sm:$0xff]  ;;  %v386_v19 = vld [vmem:[%s1522_s8 + $0x250] sm:$0xff]  ;;  %v403_v20 = vld [vmem:[%s1522_s8 + $0x2d8] sm:$0xff] }
  0x57   : > { %681 = vmatpush.msra.mxu3 %v363_v52  ;;  %662 = vmatpush.msra.mxu2 %v346_v54  ;;  %v418_v21 = vld [vmem:[%s1522_s8 + $0x350] sm:$0xff]  ;;  %v435_v22 = vld [vmem:[%s1522_s8 + $0x3d8] sm:$0xff]  ;;  %v385_v24 = vld [vmem:[%s1522_s8 + $0x248] sm:$0xff] }
  0x58   : > { %642 = vmatpush.msra.mxu1 %v330_v55  ;;  %623 = vmatpush.msra.mxu0 %v313_v57  ;;  %v308_v23 = vld [vmem:[%s1540_s9] sm:$0xff]  ;;  %v417_v26 = vld [vmem:[%s1522_s8 + $0x348] sm:$0xff]  ;;  %v384_v28 = vld [vmem:[%s1522_s8 + $0x240] sm:$0xff] }
  0x59   : > { %682 = vmatpush.msra.mxu3 %v362_v56  ;;  %663 = vmatpush.msra.mxu2 %v345_v58  ;;  %v402_v25 = vld [vmem:[%s1522_s8 + $0x2d0] sm:$0xff]  ;;  %572 = vst [vmem:[#allocation1] ss:$4 sm:$0xff] %v308_v23  ;;  %v401_v29 = vld [vmem:[%s1522_s8 + $0x2c8] sm:$0xff]  ;;  %v416_v30 = vld [vmem:[%s1522_s8 + $0x340] sm:$0xff] }
  0x5a   : > { %643 = vmatpush.msra.mxu1 %v329_v59  ;;  %624 = vmatpush.msra.mxu0 %v312_v61  ;;  %v434_v27 = vld [vmem:[%s1522_s8 + $0x3d0] sm:$0xff]  ;;  %v433_v31 = vld [vmem:[%s1522_s8 + $0x3c8] sm:$0xff]  ;;  %v383_v32 = vld [vmem:[%s1522_s8 + $0x238] sm:$0xff] }
  0x5b   : > { %683 = vmatpush.msra.mxu3 %v361_v60  ;;  %664 = vmatpush.msra.mxu2 %v344_v62  ;;  %v400_v33 = vld [vmem:[%s1522_s8 + $0x2c0] sm:$0xff]  ;;  %v415_v34 = vld [vmem:[%s1522_s8 + $0x338] sm:$0xff]  ;;  %v382_v36 = vld [vmem:[%s1522_s8 + $0x230] sm:$0xff] }
  0x5c   : > { %689 = vmatpush.msrb.mxu0 %v391_v63  ;;  %644 = vmatpush.msra.mxu1 %v328_v1  ;;  %v432_v35 = vld [vmem:[%s1522_s8 + $0x3c0] sm:$0xff]  ;;  %v399_v37 = vld [vmem:[%s1522_s8 + $0x2b8] sm:$0xff]  ;;  %v414_v38 = vld [vmem:[%s1522_s8 + $0x330] sm:$0xff] }
  0x5d   : > { %729 = vmatpush.msrb.mxu2 %v423_v0  ;;  %684 = vmatpush.msra.mxu3 %v360_v2  ;;  %v431_v39 = vld [vmem:[%s1522_s8 + $0x3b8] sm:$0xff]  ;;  %v381_v41 = vld [vmem:[%s1522_s8 + $0x228] sm:$0xff]  ;;  %v398_v42 = vld [vmem:[%s1522_s8 + $0x2b0] sm:$0xff] }
  0x5e   : > { %690 = vmatpush.msrb.mxu0 %v390_v3  ;;  %709 = vmatpush.msrb.mxu1 %v407_v4  ;;  %v309_v40 = vld [vmem:[%s1540_s9 + $0x8] sm:$0xff]  ;;  %v310_v43 = vld [vmem:[%s1540_s9 + $0x10] sm:$0xff]  ;;  %v430_v49 = vld [vmem:[%s1522_s8 + $0x3b0] sm:$0xff] }
  0x5f   : > { %730 = vmatpush.msrb.mxu2 %v422_v5  ;;  %749 = vmatpush.msrb.mxu3 %v439_v6  ;;  %574 = vst [vmem:[#allocation1 + $0x20] ss:$4 sm:$0xff] %v309_v40  ;;  %v413_v44 = vld [vmem:[%s1522_s8 + $0x328] sm:$0xff]  ;;  %v380_v50 = vld [vmem:[%s1522_s8 + $0x220] sm:$0xff]  ;;  %v379_v54 = vld [vmem:[%s1522_s8 + $0x218] sm:$0xff] }
  0x60   : > { %691 = vmatpush.msrb.mxu0 %v389_v7  ;;  %710 = vmatpush.msrb.mxu1 %v406_v8  ;;  %v577_v45 = vld.sshfl [vmem:[#allocation1 + $0x10] sm:$0xff pattern:$0x73625140]  ;;  %v1652_v46 = vld.sshfl [vmem:[#allocation1] sm:$0xff pattern:$0x73625140] }
  0x61   : > { %731 = vmatpush.msrb.mxu2 %v421_v9  ;;  %750 = vmatpush.msrb.mxu3 %v438_v10  ;;  %v1654_v47 = vld.sshfl [vmem:[#allocation1 + $0x18] sm:$0xff pattern:$0x73625140]  ;;  %v1656_v48 = vld.sshfl [vmem:[#allocation1 + $0x8] sm:$0xff pattern:$0x73625140] }
  0x62   : > { %692 = vmatpush.msrb.mxu0 %v388_v11  ;;  %711 = vmatpush.msrb.mxu1 %v405_v12  ;;  %v397_v51 = vld [vmem:[%s1522_s8 + $0x2a8] sm:$0xff]  ;;  %583 = vst [vmem:[#allocation1] ss:$4 sm:$0xff] %v310_v43  ;;  %v412_v52 = vld [vmem:[%s1522_s8 + $0x320] sm:$0xff]  ;;  %v411_v56 = vld [vmem:[%s1522_s8 + $0x318] sm:$0xff] }
  0x63   : > { %732 = vmatpush.msrb.mxu2 %v420_v13  ;;  %751 = vmatpush.msrb.mxu3 %v437_v14  ;;  %v429_v53 = vld [vmem:[%s1522_s8 + $0x3a8] sm:$0xff]  ;;  %v396_v55 = vld [vmem:[%s1522_s8 + $0x2a0] sm:$0xff]  ;;  %v378_v58 = vld [vmem:[%s1522_s8 + $0x210] sm:$0xff] }
  0x64   : > { %693 = vmatpush.msrb.mxu0 %v387_v15  ;;  %712 = vmatpush.msrb.mxu1 %v404_v16  ;;  %v428_v57 = vld [vmem:[%s1522_s8 + $0x3a0] sm:$0xff]  ;;  %v395_v59 = vld [vmem:[%s1522_s8 + $0x298] sm:$0xff]  ;;  %v311_v60 = vld [vmem:[%s1540_s9 + $0x18] sm:$0xff] }
  0x65   : > { %733 = vmatpush.msrb.mxu2 %v419_v17  ;;  %752 = vmatpush.msrb.mxu3 %v436_v18  ;;  %v410_v1 = vld [vmem:[%s1522_s8 + $0x310] sm:$0xff]  ;;  %v427_v2 = vld [vmem:[%s1522_s8 + $0x398] sm:$0xff]  ;;  %v377_v3 = vld [vmem:[%s1522_s8 + $0x208] sm:$0xff] }
  0x66   : > { %694 = vmatpush.msrb.mxu0 %v386_v19  ;;  %713 = vmatpush.msrb.mxu1 %v403_v20  ;;  %v1670_v61 = vld.sshfl [vmem:[#allocation1 + $0x30] sm:$0xff pattern:$0x73625140]  ;;  %v1672_v62 = vld.sshfl [vmem:[#allocation1 + $0x20] sm:$0xff pattern:$0x73625140] }
  0x67   : > { %734 = vmatpush.msrb.mxu2 %v418_v21  ;;  %753 = vmatpush.msrb.mxu3 %v435_v22  ;;  %v1674_v63 = vld.sshfl [vmem:[#allocation1 + $0x38] sm:$0xff pattern:$0x73625140]  ;;  %v1676_v0 = vld.sshfl [vmem:[#allocation1 + $0x28] sm:$0xff pattern:$0x73625140] }
  0x68   : > { %695 = vmatpush.msrb.mxu0 %v385_v24  ;;  %714 = vmatpush.msrb.mxu1 %v402_v25  ;;  %584 = vst [vmem:[#allocation1 + $0x20] ss:$4 sm:$0xff] %v311_v60  ;;  %v394_v4 = vld [vmem:[%s1522_s8 + $0x290] sm:$0xff]  ;;  %v409_v5 = vld [vmem:[%s1522_s8 + $0x308] sm:$0xff]  ;;  %v376_v7 = vld [vmem:[%s1522_s8 + $0x200] sm:$0xff] }
  0x69   : > { %735 = vmatpush.msrb.mxu2 %v417_v26  ;;  %754 = vmatpush.msrb.mxu3 %v434_v27  ;;  %v426_v6 = vld [vmem:[%s1522_s8 + $0x390] sm:$0xff]  ;;  %v393_v8 = vld [vmem:[%s1522_s8 + $0x288] sm:$0xff]  ;;  %v408_v9 = vld [vmem:[%s1522_s8 + $0x300] sm:$0xff] }
  0x6a   : > { %696 = vmatpush.msrb.mxu0 %v384_v28  ;;  %715 = vmatpush.msrb.mxu1 %v401_v29  ;;  %v425_v10 = vld [vmem:[%s1522_s8 + $0x388] sm:$0xff]  ;;  %v455_v11 = vld [vmem:[%s1522_s8 + $0x478] sm:$0xff]  ;;  %v392_v13 = vld [vmem:[%s1522_s8 + $0x280] sm:$0xff] }
  0x6b   : > { %736 = vmatpush.msrb.mxu2 %v416_v30  ;;  %755 = vmatpush.msrb.mxu3 %v433_v31  ;;  %v487_v12 = vld [vmem:[%s1522_s8 + $0x578] sm:$0xff]  ;;  %v424_v14 = vld [vmem:[%s1522_s8 + $0x380] sm:$0xff]  ;;  %v454_v15 = vld [vmem:[%s1522_s8 + $0x470] sm:$0xff] }
  0x6c   : > { %697 = vmatpush.msrb.mxu0 %v383_v32  ;;  %716 = vmatpush.msrb.mxu1 %v400_v33  ;;  %v471_v16 = vld [vmem:[%s1522_s8 + $0x4f8] sm:$0xff]  ;;  %v486_v17 = vld [vmem:[%s1522_s8 + $0x570] sm:$0xff]  ;;  %v453_v19 = vld [vmem:[%s1522_s8 + $0x468] sm:$0xff] }
  0x6d   : > { %737 = vmatpush.msrb.mxu2 %v415_v34  ;;  %756 = vmatpush.msrb.mxu3 %v432_v35  ;;  %v503_v18 = vld [vmem:[%s1522_s8 + $0x5f8] sm:$0xff]  ;;  %v470_v20 = vld [vmem:[%s1522_s8 + $0x4f0] sm:$0xff]  ;;  %v485_v21 = vld [vmem:[%s1522_s8 + $0x568] sm:$0xff] }
  0x6e   : > { %698 = vmatpush.msrb.mxu0 %v382_v36  ;;  %717 = vmatpush.msrb.mxu1 %v399_v37  ;;  %v502_v22 = vld [vmem:[%s1522_s8 + $0x5f0] sm:$0xff]  ;;  %v452_v23 = vld [vmem:[%s1522_s8 + $0x460] sm:$0xff]  ;;  %v469_v24 = vld [vmem:[%s1522_s8 + $0x4e8] sm:$0xff] }
  0x6f   : > { %738 = vmatpush.msrb.mxu2 %v414_v38  ;;  %757 = vmatpush.msrb.mxu3 %v431_v39  ;;  %v484_v25 = vld [vmem:[%s1522_s8 + $0x560] sm:$0xff]  ;;  %v501_v26 = vld [vmem:[%s1522_s8 + $0x5e8] sm:$0xff]  ;;  %v451_v27 = vld [vmem:[%s1522_s8 + $0x458] sm:$0xff] }
  0x70   : > { %699 = vmatpush.msrb.mxu0 %v381_v41  ;;  %718 = vmatpush.msrb.mxu1 %v398_v42  ;;  %v468_v28 = vld [vmem:[%s1522_s8 + $0x4e0] sm:$0xff]  ;;  %v483_v29 = vld [vmem:[%s1522_s8 + $0x558] sm:$0xff]  ;;  %v450_v31 = vld [vmem:[%s1522_s8 + $0x450] sm:$0xff] }
  0x71   : > { %739 = vmatpush.msrb.mxu2 %v413_v44  ;;  %758 = vmatpush.msrb.mxu3 %v430_v49  ;;  %v500_v30 = vld [vmem:[%s1522_s8 + $0x5e0] sm:$0xff]  ;;  %v467_v32 = vld [vmem:[%s1522_s8 + $0x4d8] sm:$0xff]  ;;  %v482_v33 = vld [vmem:[%s1522_s8 + $0x550] sm:$0xff] }
  0x72   : > { %700 = vmatpush.msrb.mxu0 %v380_v50  ;;  %719 = vmatpush.msrb.mxu1 %v397_v51  ;;  %v499_v34 = vld [vmem:[%s1522_s8 + $0x5d8] sm:$0xff]  ;;  %v449_v35 = vld [vmem:[%s1522_s8 + $0x448] sm:$0xff]  ;;  %v466_v36 = vld [vmem:[%s1522_s8 + $0x4d0] sm:$0xff] }
  0x73   : > { %740 = vmatpush.msrb.mxu2 %v412_v52  ;;  %759 = vmatpush.msrb.mxu3 %v429_v53  ;;  %v481_v37 = vld [vmem:[%s1522_s8 + $0x548] sm:$0xff]  ;;  %v498_v38 = vld [vmem:[%s1522_s8 + $0x5d0] sm:$0xff]  ;;  %v448_v39 = vld [vmem:[%s1522_s8 + $0x440] sm:$0xff] }
  0x74   : > { %701 = vmatpush.msrb.mxu0 %v379_v54  ;;  %720 = vmatpush.msrb.mxu1 %v396_v55  ;;  %v465_v40 = vld [vmem:[%s1522_s8 + $0x4c8] sm:$0xff]  ;;  %v480_v41 = vld [vmem:[%s1522_s8 + $0x540] sm:$0xff]  ;;  %v447_v43 = vld [vmem:[%s1522_s8 + $0x438] sm:$0xff] }
  0x75   : > { %741 = vmatpush.msrb.mxu2 %v411_v56  ;;  %760 = vmatpush.msrb.mxu3 %v428_v57  ;;  %v497_v42 = vld [vmem:[%s1522_s8 + $0x5c8] sm:$0xff]  ;;  %v464_v44 = vld [vmem:[%s1522_s8 + $0x4c0] sm:$0xff]  ;;  %v478_v49 = vld [vmem:[%s1522_s8 + $0x530] sm:$0xff] }
  0x76   : > { %702 = vmatpush.msrb.mxu0 %v378_v58  ;;  %721 = vmatpush.msrb.mxu1 %v395_v59  ;;  %v495_v50 = vld [vmem:[%s1522_s8 + $0x5b8] sm:$0xff]  ;;  %v445_v51 = vld [vmem:[%s1522_s8 + $0x428] sm:$0xff]  ;;  %v462_v52 = vld [vmem:[%s1522_s8 + $0x4b0] sm:$0xff] }
  0x77   : > { %742 = vmatpush.msrb.mxu2 %v410_v1  ;;  %761 = vmatpush.msrb.mxu3 %v427_v2  ;;  %v477_v53 = vld [vmem:[%s1522_s8 + $0x528] sm:$0xff]  ;;  %v494_v54 = vld [vmem:[%s1522_s8 + $0x5b0] sm:$0xff]  ;;  %v444_v55 = vld [vmem:[%s1522_s8 + $0x420] sm:$0xff] }
  0x78   : > { %703 = vmatpush.msrb.mxu0 %v377_v3  ;;  %722 = vmatpush.msrb.mxu1 %v394_v4  ;;  %v461_v56 = vld [vmem:[%s1522_s8 + $0x4a8] sm:$0xff]  ;;  %v476_v57 = vld [vmem:[%s1522_s8 + $0x520] sm:$0xff]  ;;  %v443_v59 = vld [vmem:[%s1522_s8 + $0x418] sm:$0xff] }
  0x79   : > { %743 = vmatpush.msrb.mxu2 %v409_v5  ;;  %762 = vmatpush.msrb.mxu3 %v426_v6  ;;  %v493_v58 = vld [vmem:[%s1522_s8 + $0x5a8] sm:$0xff]  ;;  %v460_v60 = vld [vmem:[%s1522_s8 + $0x4a0] sm:$0xff]  ;;  %v474_v1 = vld [vmem:[%s1522_s8 + $0x510] sm:$0xff] }
  0x7a   : > { %665 = vmatmul.f32.vlgmr.msra.gmra.mxu2 %v577_v45  ;;  %704 = vmatpush.msrb.mxu0 %v376_v7  ;;  %v479_v45 = vld [vmem:[%s1522_s8 + $0x538] sm:$0xff]  ;;  %v441_v3 = vld [vmem:[%s1522_s8 + $0x408] sm:$0xff]  ;;  %v458_v4 = vld [vmem:[%s1522_s8 + $0x490] sm:$0xff] }
  0x7b   : > { %723 = vmatpush.msrb.mxu1 %v393_v8  ;;  %744 = vmatpush.msrb.mxu2 %v408_v9  ;;  %v491_v2 = vld [vmem:[%s1522_s8 + $0x598] sm:$0xff]  ;;  %v473_v5 = vld [vmem:[%s1522_s8 + $0x508] sm:$0xff]  ;;  %v490_v6 = vld [vmem:[%s1522_s8 + $0x590] sm:$0xff] }
  0x7c   : > { %763 = vmatpush.msrb.mxu3 %v425_v10  ;;  %625 = vmatmul.f32.vlgmr.msra.gmra.mxu0 %v1652_v46  ;;  %v496_v46 = vld [vmem:[%s1522_s8 + $0x5c0] sm:$0xff]  ;;  %v457_v8 = vld [vmem:[%s1522_s8 + $0x488] sm:$0xff] }
  0x7d   : > { %685 = vmatmul.f32.vlgmr.msra.gmra.mxu3 %v1654_v47  ;;  %769 = vmatpush.msra.mxu0 %v455_v11  ;;  %v446_v47 = vld [vmem:[%s1522_s8 + $0x430] sm:$0xff]  ;;  %v440_v7 = vld [vmem:[%s1522_s8 + $0x400] sm:$0xff]  ;;  %v489_v10 = vld [vmem:[%s1522_s8 + $0x588] sm:$0xff] }
  0x7e   : > { %809 = vmatpush.msra.mxu2 %v487_v12  ;;  %724 = vmatpush.msrb.mxu1 %v392_v13  ;;  %v472_v9 = vld [vmem:[%s1522_s8 + $0x500] sm:$0xff]  ;;  %v585_v11 = vld.sshfl [vmem:[#allocation1] sm:$0xff pattern:$0x73625140] }
  0x7f   : > { %764 = vmatpush.msrb.mxu3 %v424_v14  ;;  %645 = vmatmul.f32.vlgmr.msra.gmra.mxu1 %v1656_v48  ;;  %v463_v48 = vld [vmem:[%s1522_s8 + $0x4b8] sm:$0xff]  ;;  %v587_v12 = vld.sshfl [vmem:[#allocation1 + $0x10] sm:$0xff pattern:$0x73625140] }
  0x80   : > { %770 = vmatpush.msra.mxu0 %v454_v15  ;;  %789 = vmatpush.msra.mxu1 %v471_v16  ;;  %v519_v13 = vld [vmem:[%s1522_s8 + $0x678] sm:$0xff]  ;;  %v456_v15 = vld [vmem:[%s1522_s8 + $0x480] sm:$0xff] }
  0x81   : > { %810 = vmatpush.msra.mxu2 %v486_v17  ;;  %829 = vmatpush.msra.mxu3 %v503_v18  ;;  %v551_v14 = vld [vmem:[%s1522_s8 + $0x778] sm:$0xff]  ;;  %v488_v16 = vld [vmem:[%s1522_s8 + $0x580] sm:$0xff]  ;;  %v588_v18 = vld.sshfl [vmem:[#allocation1 + $0x18] sm:$0xff pattern:$0x73625140] }
  0x82   : > { %771 = vmatpush.msra.mxu0 %v453_v19  ;;  %790 = vmatpush.msra.mxu1 %v470_v20  ;;  %v586_v17 = vld.sshfl [vmem:[#allocation1 + $0x8] sm:$0xff pattern:$0x73625140]  ;;  %v518_v19 = vld [vmem:[%s1522_s8 + $0x670] sm:$0xff] }
  0x83   : > { %811 = vmatpush.msra.mxu2 %v485_v21  ;;  %830 = vmatpush.msra.mxu3 %v502_v22  ;;  %v535_v20 = vld [vmem:[%s1522_s8 + $0x6f8] sm:$0xff]  ;;  %v550_v21 = vld [vmem:[%s1522_s8 + $0x770] sm:$0xff] }
  0x84   : > { %745 = vmatmul.f32.vlgmr.msrb.gmra.mxu2 %v1670_v61  ;;  %772 = vmatpush.msra.mxu0 %v452_v23  ;;  %v475_v61 = vld [vmem:[%s1522_s8 + $0x518] sm:$0xff]  ;;  %v517_v23 = vld [vmem:[%s1522_s8 + $0x668] sm:$0xff] }
  0x85   : > { %791 = vmatpush.msra.mxu1 %v469_v24  ;;  %812 = vmatpush.msra.mxu2 %v484_v25  ;;  %v567_v22 = vld [vmem:[%s1522_s8 + $0x7f8] sm:$0xff]  ;;  %v534_v24 = vld [vmem:[%s1522_s8 + $0x6f0] sm:$0xff]  ;;  %v549_v25 = vld [vmem:[%s1522_s8 + $0x768] sm:$0xff] }
  0x86   : > { %831 = vmatpush.msra.mxu3 %v501_v26  ;;  %705 = vmatmul.f32.vlgmr.msrb.gmra.mxu0 %v1672_v62  ;;  %v492_v62 = vld [vmem:[%s1522_s8 + $0x5a0] sm:$0xff]  ;;  %v566_v26 = vld [vmem:[%s1522_s8 + $0x7f0] sm:$0xff] }
  0x87   : > { %765 = vmatmul.f32.vlgmr.msrb.gmra.mxu3 %v1674_v63  ;;  %773 = vmatpush.msra.mxu0 %v451_v27  ;;  %v442_v63 = vld [vmem:[%s1522_s8 + $0x410] sm:$0xff]  ;;  %v516_v27 = vld [vmem:[%s1522_s8 + $0x660] sm:$0xff] }
  0x88   : > { %792 = vmatpush.msra.mxu1 %v468_v28  ;;  %813 = vmatpush.msra.mxu2 %v483_v29  ;;  %v533_v28 = vld [vmem:[%s1522_s8 + $0x6e8] sm:$0xff]  ;;  %v548_v29 = vld [vmem:[%s1522_s8 + $0x760] sm:$0xff] }
  0x89   : > { %832 = vmatpush.msra.mxu3 %v500_v30  ;;  %725 = vmatmul.f32.vlgmr.msrb.gmra.mxu1 %v1676_v0  ;;  %v459_v0 = vld [vmem:[%s1522_s8 + $0x498] sm:$0xff]  ;;  %v565_v30 = vld [vmem:[%s1522_s8 + $0x7e8] sm:$0xff] }
  0x8a   : > { %774 = vmatpush.msra.mxu0 %v450_v31  ;;  %793 = vmatpush.msra.mxu1 %v467_v32  ;;  %v515_v31 = vld [vmem:[%s1522_s8 + $0x658] sm:$0xff]  ;;  %v532_v32 = vld [vmem:[%s1522_s8 + $0x6e0] sm:$0xff] }
  0x8b   : > { %814 = vmatpush.msra.mxu2 %v482_v33  ;;  %833 = vmatpush.msra.mxu3 %v499_v34  ;;  %v547_v33 = vld [vmem:[%s1522_s8 + $0x758] sm:$0xff]  ;;  %v564_v34 = vld [vmem:[%s1522_s8 + $0x7e0] sm:$0xff] }
  0x8c   : > { %775 = vmatpush.msra.mxu0 %v449_v35  ;;  %794 = vmatpush.msra.mxu1 %v466_v36  ;;  %v514_v35 = vld [vmem:[%s1522_s8 + $0x650] sm:$0xff]  ;;  %v531_v36 = vld [vmem:[%s1522_s8 + $0x6d8] sm:$0xff] }
  0x8d   : > { %815 = vmatpush.msra.mxu2 %v481_v37  ;;  %834 = vmatpush.msra.mxu3 %v498_v38  ;;  %v546_v37 = vld [vmem:[%s1522_s8 + $0x750] sm:$0xff]  ;;  %v563_v38 = vld [vmem:[%s1522_s8 + $0x7d8] sm:$0xff] }
  0x8e   : > { %776 = vmatpush.msra.mxu0 %v448_v39  ;;  %795 = vmatpush.msra.mxu1 %v465_v40  ;;  %v513_v39 = vld [vmem:[%s1522_s8 + $0x648] sm:$0xff]  ;;  %v530_v40 = vld [vmem:[%s1522_s8 + $0x6d0] sm:$0xff] }
  0x8f   : > { %816 = vmatpush.msra.mxu2 %v480_v41  ;;  %835 = vmatpush.msra.mxu3 %v497_v42  ;;  %v545_v41 = vld [vmem:[%s1522_s8 + $0x748] sm:$0xff]  ;;  %v562_v42 = vld [vmem:[%s1522_s8 + $0x7d0] sm:$0xff] }
  0x90   : > { %777 = vmatpush.msra.mxu0 %v447_v43  ;;  %796 = vmatpush.msra.mxu1 %v464_v44  ;;  %v512_v43 = vld [vmem:[%s1522_s8 + $0x640] sm:$0xff]  ;;  %v529_v44 = vld [vmem:[%s1522_s8 + $0x6c8] sm:$0xff] }
  0x91   : > { %817 = vmatpush.msra.mxu2 %v479_v45  ;;  %836 = vmatpush.msra.mxu3 %v496_v46  ;;  %v544_v45 = vld [vmem:[%s1522_s8 + $0x740] sm:$0xff]  ;;  %v561_v46 = vld [vmem:[%s1522_s8 + $0x7c8] sm:$0xff] }
  0x92   : > { %778 = vmatpush.msra.mxu0 %v446_v47  ;;  %797 = vmatpush.msra.mxu1 %v463_v48  ;;  %v511_v47 = vld [vmem:[%s1522_s8 + $0x638] sm:$0xff]  ;;  %v528_v48 = vld [vmem:[%s1522_s8 + $0x6c0] sm:$0xff] }
  0x93   : > { %818 = vmatpush.msra.mxu2 %v478_v49  ;;  %837 = vmatpush.msra.mxu3 %v495_v50  ;;  %v543_v49 = vld [vmem:[%s1522_s8 + $0x738] sm:$0xff]  ;;  %v560_v50 = vld [vmem:[%s1522_s8 + $0x7c0] sm:$0xff] }
  0x94   : > { %779 = vmatpush.msra.mxu0 %v445_v51  ;;  %798 = vmatpush.msra.mxu1 %v462_v52  ;;  %v510_v51 = vld [vmem:[%s1522_s8 + $0x630] sm:$0xff]  ;;  %v527_v52 = vld [vmem:[%s1522_s8 + $0x6b8] sm:$0xff] }
  0x95   : > { %819 = vmatpush.msra.mxu2 %v477_v53  ;;  %838 = vmatpush.msra.mxu3 %v494_v54  ;;  %v542_v53 = vld [vmem:[%s1522_s8 + $0x730] sm:$0xff]  ;;  %v559_v54 = vld [vmem:[%s1522_s8 + $0x7b8] sm:$0xff] }
  0x96   : > { %780 = vmatpush.msra.mxu0 %v444_v55  ;;  %799 = vmatpush.msra.mxu1 %v461_v56  ;;  %v509_v55 = vld [vmem:[%s1522_s8 + $0x628] sm:$0xff]  ;;  %v526_v56 = vld [vmem:[%s1522_s8 + $0x6b0] sm:$0xff] }
  0x97   : > { %820 = vmatpush.msra.mxu2 %v476_v57  ;;  %839 = vmatpush.msra.mxu3 %v493_v58  ;;  %v541_v57 = vld [vmem:[%s1522_s8 + $0x728] sm:$0xff]  ;;  %v558_v58 = vld [vmem:[%s1522_s8 + $0x7b0] sm:$0xff] }
  0x98   : > { %781 = vmatpush.msra.mxu0 %v443_v59  ;;  %800 = vmatpush.msra.mxu1 %v460_v60  ;;  %v508_v59 = vld [vmem:[%s1522_s8 + $0x620] sm:$0xff]  ;;  %v525_v60 = vld [vmem:[%s1522_s8 + $0x6a8] sm:$0xff] }
  0x99   : > { %821 = vmatpush.msra.mxu2 %v475_v61  ;;  %840 = vmatpush.msra.mxu3 %v492_v62  ;;  %v540_v61 = vld [vmem:[%s1522_s8 + $0x720] sm:$0xff]  ;;  %v557_v62 = vld [vmem:[%s1522_s8 + $0x7a8] sm:$0xff] }
  0x9a   : > { %782 = vmatpush.msra.mxu0 %v442_v63  ;;  %801 = vmatpush.msra.mxu1 %v459_v0  ;;  %v507_v63 = vld [vmem:[%s1522_s8 + $0x618] sm:$0xff]  ;;  %v524_v0 = vld [vmem:[%s1522_s8 + $0x6a0] sm:$0xff] }
  0x9b   : > { %822 = vmatpush.msra.mxu2 %v474_v1  ;;  %841 = vmatpush.msra.mxu3 %v491_v2  ;;  %v539_v1 = vld [vmem:[%s1522_s8 + $0x718] sm:$0xff]  ;;  %v556_v2 = vld [vmem:[%s1522_s8 + $0x7a0] sm:$0xff] }
  0x9c   : > { %783 = vmatpush.msra.mxu0 %v441_v3  ;;  %802 = vmatpush.msra.mxu1 %v458_v4  ;;  %v506_v3 = vld [vmem:[%s1522_s8 + $0x610] sm:$0xff]  ;;  %v523_v4 = vld [vmem:[%s1522_s8 + $0x698] sm:$0xff] }
  0x9d   : > { %823 = vmatpush.msra.mxu2 %v473_v5  ;;  %842 = vmatpush.msra.mxu3 %v490_v6  ;;  %v538_v5 = vld [vmem:[%s1522_s8 + $0x710] sm:$0xff]  ;;  %v555_v6 = vld [vmem:[%s1522_s8 + $0x798] sm:$0xff] }
  0x9e   : > { %784 = vmatpush.msra.mxu0 %v440_v7  ;;  %803 = vmatpush.msra.mxu1 %v457_v8  ;;  %v505_v7 = vld [vmem:[%s1522_s8 + $0x608] sm:$0xff]  ;;  %v522_v8 = vld [vmem:[%s1522_s8 + $0x690] sm:$0xff] }
  0x9f   : > { %824 = vmatpush.msra.mxu2 %v472_v9  ;;  %843 = vmatpush.msra.mxu3 %v489_v10  ;;  %v537_v9 = vld [vmem:[%s1522_s8 + $0x708] sm:$0xff]  ;;  %v554_v10 = vld [vmem:[%s1522_s8 + $0x790] sm:$0xff] }
  0xa0   : > { %785 = vmatmul.f32.vlgmr.msra.gmra.mxu0 %v585_v11  ;;  %825 = vmatmul.f32.vlgmr.msra.gmra.mxu2 %v587_v12  ;;  %v504_v11 = vld [vmem:[%s1522_s8 + $0x600] sm:$0xff]  ;;  %v521_v12 = vld [vmem:[%s1522_s8 + $0x688] sm:$0xff] }
  0xa1   : > { %849 = vmatpush.msrb.mxu0 %v519_v13  ;;  %889 = vmatpush.msrb.mxu2 %v551_v14  ;;  %v536_v13 = vld [vmem:[%s1522_s8 + $0x700] sm:$0xff]  ;;  %v553_v14 = vld [vmem:[%s1522_s8 + $0x788] sm:$0xff] }
  0xa2   : > { %804 = vmatpush.msra.mxu1 %v456_v15  ;;  %844 = vmatpush.msra.mxu3 %v488_v16  ;;  %v589_v15 = vld.sshfl [vmem:[#allocation1 + $0x20] sm:$0xff pattern:$0x73625140]  ;;  %v591_v16 = vld.sshfl [vmem:[#allocation1 + $0x30] sm:$0xff pattern:$0x73625140] }
  0xa3   : > { %805 = vmatmul.f32.vlgmr.msra.gmra.mxu1 %v586_v17  ;;  %845 = vmatmul.f32.vlgmr.msra.gmra.mxu3 %v588_v18  ;;  %v520_v17 = vld [vmem:[%s1522_s8 + $0x680] sm:$0xff] }
  0xa4   : > { %850 = vmatpush.msrb.mxu0 %v518_v19  ;;  %869 = vmatpush.msrb.mxu1 %v535_v20  ;;  %v552_v18 = vld [vmem:[%s1522_s8 + $0x780] sm:$0xff]  ;;  %v592_v20 = vld.sshfl [vmem:[#allocation1 + $0x38] sm:$0xff pattern:$0x73625140] }
  0xa5   : > { %890 = vmatpush.msrb.mxu2 %v550_v21  ;;  %909 = vmatpush.msrb.mxu3 %v567_v22  ;;  %v590_v19 = vld.sshfl [vmem:[#allocation1 + $0x28] sm:$0xff pattern:$0x73625140] }
  0xa6   : > { %851 = vmatpush.msrb.mxu0 %v517_v23  ;;  %870 = vmatpush.msrb.mxu1 %v534_v24 }
  0xa7   : > { %891 = vmatpush.msrb.mxu2 %v549_v25  ;;  %910 = vmatpush.msrb.mxu3 %v566_v26 }
  0xa8   : > { %852 = vmatpush.msrb.mxu0 %v516_v27  ;;  %871 = vmatpush.msrb.mxu1 %v533_v28 }
  0xa9   : > { %892 = vmatpush.msrb.mxu2 %v548_v29  ;;  %911 = vmatpush.msrb.mxu3 %v565_v30 }
  0xaa   : > { %853 = vmatpush.msrb.mxu0 %v515_v31  ;;  %872 = vmatpush.msrb.mxu1 %v532_v32 }
  0xab   : > { %893 = vmatpush.msrb.mxu2 %v547_v33  ;;  %912 = vmatpush.msrb.mxu3 %v564_v34 }
  0xac   : > { %854 = vmatpush.msrb.mxu0 %v514_v35  ;;  %873 = vmatpush.msrb.mxu1 %v531_v36 }
  0xad   : > { %894 = vmatpush.msrb.mxu2 %v546_v37  ;;  %913 = vmatpush.msrb.mxu3 %v563_v38 }
  0xae   : > { %855 = vmatpush.msrb.mxu0 %v513_v39  ;;  %874 = vmatpush.msrb.mxu1 %v530_v40 }
  0xaf   : > { %895 = vmatpush.msrb.mxu2 %v545_v41  ;;  %914 = vmatpush.msrb.mxu3 %v562_v42 }
  0xb0   : > { %856 = vmatpush.msrb.mxu0 %v512_v43  ;;  %875 = vmatpush.msrb.mxu1 %v529_v44 }
  0xb1   : > { %896 = vmatpush.msrb.mxu2 %v544_v45  ;;  %915 = vmatpush.msrb.mxu3 %v561_v46 }
  0xb2   : > { %857 = vmatpush.msrb.mxu0 %v511_v47  ;;  %876 = vmatpush.msrb.mxu1 %v528_v48 }
  0xb3   : > { %897 = vmatpush.msrb.mxu2 %v543_v49  ;;  %916 = vmatpush.msrb.mxu3 %v560_v50  ;;  %v307_v50 = vld [vmem:[#allocation2] sm:$0x3] }
  0xb4   : > { %858 = vmatpush.msrb.mxu0 %v510_v51  ;;  %877 = vmatpush.msrb.mxu1 %v527_v52 }
  0xb5   : > { %898 = vmatpush.msrb.mxu2 %v542_v53  ;;  %917 = vmatpush.msrb.mxu3 %v559_v54 }
  0xb6   : > { %859 = vmatpush.msrb.mxu0 %v509_v55  ;;  %878 = vmatpush.msrb.mxu1 %v526_v56 }
  0xb7   : > { %899 = vmatpush.msrb.mxu2 %v541_v57  ;;  %918 = vmatpush.msrb.mxu3 %v558_v58 }
  0xb8   : > { %860 = vmatpush.msrb.mxu0 %v508_v59  ;;  %879 = vmatpush.msrb.mxu1 %v525_v60 }
  0xb9   : > { %900 = vmatpush.msrb.mxu2 %v540_v61  ;;  %919 = vmatpush.msrb.mxu3 %v557_v62 }
  0xba   : > { %861 = vmatpush.msrb.mxu0 %v507_v63  ;;  %880 = vmatpush.msrb.mxu1 %v524_v0 }
  0xbb   : > { %901 = vmatpush.msrb.mxu2 %v539_v1  ;;  %920 = vmatpush.msrb.mxu3 %v556_v2 }
  0xbc   : > { %862 = vmatpush.msrb.mxu0 %v506_v3  ;;  %881 = vmatpush.msrb.mxu1 %v523_v4 }
  0xbd   : > { %902 = vmatpush.msrb.mxu2 %v538_v5  ;;  %921 = vmatpush.msrb.mxu3 %v555_v6 }
  0xbe   : > { %863 = vmatpush.msrb.mxu0 %v505_v7  ;;  %882 = vmatpush.msrb.mxu1 %v522_v8 }
  0xbf   : > { %903 = vmatpush.msrb.mxu2 %v537_v9  ;;  %922 = vmatpush.msrb.mxu3 %v554_v10 }
  0xc0   : > { %864 = vmatpush.msrb.mxu0 %v504_v11  ;;  %883 = vmatpush.msrb.mxu1 %v521_v12 }
  0xc1   : > { %904 = vmatpush.msrb.mxu2 %v536_v13  ;;  %923 = vmatpush.msrb.mxu3 %v553_v14 }
  0xc2   : > { %865 = vmatmul.f32.vlgmr.msrb.gmra.mxu0 %v589_v15  ;;  %905 = vmatmul.f32.vlgmr.msrb.gmra.mxu2 %v591_v16 }
  0xc3   : > { %884 = vmatpush.msrb.mxu1 %v520_v17  ;;  %924 = vmatpush.msrb.mxu3 %v552_v18 }
  0xc4   : > { %885 = vmatmul.f32.vlgmr.msrb.gmra.mxu1 %v590_v19  ;;  %925 = vmatmul.f32.vlgmr.msrb.gmra.mxu3 %v592_v20 }
  0xf9   : > { %v626_v22 = vpop.f32.mrf.mxu0 }
  0xfc   : > { %v646_v21 = vpop.f32.mrf.mxu1 }
  0xfd   : > { %v647_v23 = vadd.f32 %v646_v21, %v626_v22  ;;  %v666_v24 = vpop.f32.mrf.mxu2 }
  0xff   : > { %v667_v25 = vadd.f32 %v666_v24, %v647_v23 }
 0x100   : > { %v686_v26 = vpop.f32.mrf.mxu3 }
 0x101   : > { %v687_v27 = vadd.f32 %v686_v26, %v667_v25 }
 0x103   : > { %v706_v28 = vpop.f32.mrf.mxu0 }
 0x104   : > { %v707_v29 = vadd.f32 %v706_v28, %v687_v27 }
 0x106   : > { %v726_v30 = vpop.f32.mrf.mxu1 }
 0x107   : > { %v727_v31 = vadd.f32 %v726_v30, %v707_v29  ;;  %v746_v32 = vpop.f32.mrf.mxu2 }
 0x109   : > { %v747_v33 = vadd.f32 %v746_v32, %v727_v31 }
 0x10a   : > { %v766_v34 = vpop.f32.mrf.mxu3 }
 0x10b   : > { %v767_v36 = vadd.f32 %v766_v34, %v747_v33 }
 0x11d   : > { %v786_v35 = vpop.f32.mrf.mxu0 }
 0x11e   : > { %v787_v37 = vadd.f32 %v786_v35, %v767_v36 }
 0x120   : > { %v806_v38 = vpop.f32.mrf.mxu1 }
 0x121   : > { %v807_v40 = vadd.f32 %v806_v38, %v787_v37 }
 0x123   : > { %v826_v39 = vpop.f32.mrf.mxu2 }
 0x124   : > { %v827_v41 = vadd.f32 %v826_v39, %v807_v40 }
 0x126   : > { %v846_v42 = vpop.f32.mrf.mxu3 }
 0x127   : > { %v847_v43 = vadd.f32 %v846_v42, %v827_v41 }
 0x13f   : > { %v866_v44 = vpop.f32.mrf.mxu0 }
 0x140   : > { %v867_v45 = vadd.f32 %v866_v44, %v847_v43 }
 0x141   : > { %v886_v46 = vpop.f32.mrf.mxu1 }
 0x142   : > { %v887_v47 = vadd.f32 %v886_v46, %v867_v45 }
 0x145   : > { %v906_v48 = vpop.f32.mrf.mxu2 }
 0x146   : > { %v907_v49 = vadd.f32 %v906_v48, %v887_v47 }
 0x147   : > { %v926_v51 = vpop.f32.mrf.mxu3 }
 0x148   : > { %v927_v52 = vadd.f32 %v926_v51, %v907_v49  ;;  %934 = sbr.rel (%p1101_p1) target bundleno = 494 (0x1ee), region = 64 }
 0x14a   : > { %v929_v53 = vadd.f32 %v927_v52, %v307_v50 }
 0x14c   : > { %930 = vst [vmem:[#allocation2] sm:$0x3] %v929_v53 }
 0x14d   : > { %v957_v54 = vld [vmem:[#allocation8 + $0x78] sm:$0xff]  ;;  %v956_v55 = vld [vmem:[#allocation8 + $0x70] sm:$0xff]  ;;  %v955_v56 = vld [vmem:[#allocation8 + $0x68] sm:$0xff]  ;;  %vm982_vm0 = vcmask 9216  }
 0x14e   : > { %962 = vmatpush.msra.mxu0 %v957_v54  ;;  %v954_v57 = vld [vmem:[#allocation8 + $0x60] sm:$0xff]  ;;  %v953_v58 = vld [vmem:[#allocation8 + $0x58] sm:$0xff]  ;;  %v952_v59 = vld [vmem:[#allocation8 + $0x50] sm:$0xff] }
 0x14f   : > { %v951_v60 = vld [vmem:[#allocation8 + $0x48] sm:$0xff]  ;;  %v950_v61 = vld [vmem:[#allocation8 + $0x40] sm:$0xff]  ;;  %v949_v62 = vld [vmem:[#allocation8 + $0x38] sm:$0xff] }
 0x150   : > { %963 = vmatpush.msra.mxu0 %v956_v55  ;;  %v948_v63 = vld [vmem:[#allocation8 + $0x30] sm:$0xff]  ;;  %v947_v0 = vld [vmem:[#allocation8 + $0x28] sm:$0xff]  ;;  %v946_v1 = vld [vmem:[#allocation8 + $0x20] sm:$0xff] }
 0x151   : > { %v1187_v2 = vld [vmem:[#allocation6] ss:$0 sm:$0xff]  ;;  %v944_v5 = vld [vmem:[#allocation8 + $0x10] sm:$0xff]  ;;  %v943_v7 = vld [vmem:[#allocation8 + $0x8] sm:$0xff] }
 0x152   : > { %964 = vmatpush.msra.mxu0 %v955_v56  ;;  %v945_v4 = vld [vmem:[#allocation8 + $0x18] sm:$0xff]  ;;  %v942_v8 = vld [vmem:[#allocation8] sm:$0xff] }
 0x153   : > { %v935_v3 = vld [vmem:[#allocation2] sm:$0x3]  ;;  %v1188_v10 = vld [vmem:[#allocation9] ss:$0 sm:$0xff] }
 0x154   : > { %965 = vmatpush.msra.mxu0 %v954_v57  ;;  %v940_v6 = vadd.f32 %v1187_v2, %v935_v3 }
 0x156   : > { %966 = vmatpush.msra.mxu0 %v953_v58  ;;  %v941_v9 = vmax.f32 %v940_v6, 0.0 }
 0x158   : > { %967 = vmatpush.msra.mxu0 %v952_v59 }
 0x15a   : > { %968 = vmatpush.msra.mxu0 %v951_v60 }
 0x15c   : > { %969 = vmatpush.msra.mxu0 %v950_v61 }
 0x15e   : > { %970 = vmatpush.msra.mxu0 %v949_v62 }
 0x160   : > { %971 = vmatpush.msra.mxu0 %v948_v63 }
 0x162   : > { %972 = vmatpush.msra.mxu0 %v947_v0 }
 0x164   : > { %973 = vmatpush.msra.mxu0 %v946_v1 }
 0x166   : > { %974 = vmatpush.msra.mxu0 %v945_v4 }
 0x168   : > { %975 = vmatpush.msra.mxu0 %v944_v5 }
 0x16a   : > { %976 = vmatpush.msra.mxu0 %v943_v7 }
 0x16c   : > { %977 = vmatpush.msra.mxu0 %v942_v8 }
 0x16d   : > { %978 = vmatmul.f32.vlgmr.msra.gmra.mxu0 %v941_v9 }
 0x1ea   : > { %v979_v11 = vpop.f32.mrf.mxu0 }
 0x1eb   : > { %v980_v12 = vadd.f32 %v1188_v10, %v979_v11 }
 0x1ed   : > { %983 = vst.msk [vmem:[#allocation11] sm:$0x3] %vm982_vm0, %v980_v12 }
 0x1ee PF: > { %p1146_p4 = scmp.eq.s32.totalorder %s1441_s22, 5  ;;  %s1391_s10 = smov [#allocation11]  }
 0x1ef   : > { %s990_s13 = sshll.u32 %s1391_s10, 4  ;;  %s992_s16 = sshll.u32 %s1848_s5, 4  ;;  %s991_s13 = int_to_ptr.vmem [resolvable:$true] %s990_s13  ;;  %s993_s16 = int_to_ptr.hbm [resolvable:$true] %s992_s16 }
 0x1f0   : > { %1122 = dma.vmem_to_hbm [thread:$0]  (%p1146_p4), %s991_s13, 32, %s993_s16, [#allocation5]  }
 0x1f1   : > { %1366 = dma.done.wait (%p1146_p4), [#allocation5], 32  }
 0x1f2   : > { %1368 = vsyncadd (%p1146_p4), [#allocation5], 4294967264 }
 0x1f3 PF: > { %s1853_s17 = smov %s1485_s18  ;;  %p18_p5 = scmp.ge.s32.totalorder %s1485_s18, 8  }
 0x1f4   : > { %s1854_s18 = smov %s1375_s19  ;;  %s1855_s19 = smov %s1379_s20 }
 0x1f5   : > { %s1856_s20 = smov %s1495_s26  ;;  %s1857_s21 = smov %s1853_s17 }
 0x1f6   :  { %20 = sbr.rel (!%p18_p5) target bundleno = 6 (0x6), region = 101 }
 0x1fb   :  { %1006 = vsyncpa [#allocation4], 1 }
 0x1fc   :  { %1008 = vsyncpa [#allocation4 + $0x1], 1 }
 0x1fd   :  { %1009 = vsyncpa [#allocation7], 1 }
 0x1fe   :  { %1010 = vsyncpa [#allocation10], 1 }
 0x1ff   :  { %1011 = vsyncpa [#allocation5], 1 }
 0x200   :  { %1013 = vsyncpa [#allocation5 + $0x1], 1 }

// kernel: _lambda_.4
= control target key start
LH: loop header
LB: loop body
LE: loop exit
PB: predicated region body
PF: predicated region fallthrough
CT: control target
= control target key end

     0   :  { %8 = vsyncpa [#allocation3], 0  ;;  %s3281_s0 = inlined_call_operand.vmem [shape: f32[2,32,222], index: 0, kind: input, shape index: {}]   ;;  %s3282_s1 = inlined_call_operand.hbm [shape: f32[9,64,32], index: 1, kind: input, shape index: {}]   ;;  %s3283_s2 = inlined_call_operand.hbm [shape: f32[64,1], index: 2, kind: input, shape index: {}]   ;;  %s3284_s3 = inlined_call_operand.vmem [shape: f32[2,64,188], index: 3, kind: output, shape index: {}]  }
   0x1   :  { %9 = vsyncpa [#allocation5], 0  ;;  %s2679_s12 = smov 0  }
   0x2 LB: > { %s125_s15 = sshll.u32 %s3282_s1, 4  ;;  %s2198_s16 = sadd.s32 4294967295, %s2644_s12   ;;  %s2644_s12 = sphi %s2679_s12, %s15_s12   ;;  %s126_s15 = int_to_ptr.hbm [resolvable:$true] %s125_s15 }
   0x3   : > { %p2200_p0 = scmp.ge.s32.totalorder %s2644_s12, 1  ;;  %p114_p1 = scmp.lt.s32.totalorder %s2644_s12, 3 }
   0x4   : > { %p2382_p2 = scmp.eq.s32.totalorder %s2198_s16, 0  ;;  %s2646_s18 = smov [#allocation2]  }
   0x5   : > { %p2690_p3 = pnand %p2200_p0, %p114_p1  ;;  %s127_s19 = sshll.u32 %s2646_s18, 4  ;;  %s128_s19 = int_to_ptr.vmem [resolvable:$true] %s127_s19 }
   0x6   : > { %s139_s22 = sshll.u32 %s3283_s2, 4  ;;  %s2647_s23 = smov [#allocation4]   ;;  %s140_s22 = int_to_ptr.hbm [resolvable:$true] %s139_s22 }
   0x7   : > { %p2375_p4 = pneg %p2690_p3  ;;  %s141_s24 = sshll.u32 %s2647_s23, 4  ;;  %s142_s24 = int_to_ptr.vmem [resolvable:$true] %s141_s24 }
   0x8   : > { %s2648_s25 = smov 128   ;;  %s2649_s26 = smov 8  }
   0x9   : > { %p2376_p5 = pnand %p2382_p2, %p2375_p4  ;;  %165 = sbr.rel (%p2690_p3) target bundleno = 560 (0x230), region = 32 }
   0xb   : > { %2378 = dma.hbm_to_vmem [thread:$0]  (!%p2376_p5), %s126_s15, 9216, %s128_s19, [#allocation3], %s2648_s25, %s2648_s25, %s2649_s26  }
   0xc   : > { %2381 = dma.hbm_to_vmem [thread:$0]  (!%p2376_p5), %s140_s22, 1024, %s142_s24, [#allocation5], %s2648_s25, %s2648_s25, %s2649_s26  }
   0xe   : > { %2635 = dma.done.wait (%p2382_p2), [#allocation3], 9216  }
   0xf   : > { %2637 = vsyncadd (%p2382_p2), [#allocation3], 4294958080 }
  0x10   : > { %2639 = dma.done.wait (%p2382_p2), [#allocation5], 1024  }
  0x11   : > { %2641 = vsyncadd (%p2382_p2), [#allocation5], 4294966272  ;;  %p195_p6 = scmp.lt.s32.totalorder %s2198_s16, 1  ;;  %s2650_s4 = smov 127   ;;  %v217_v12 = vld [vmem:[#allocation2 + $0x20] sm:$0xff]  ;;  %vm221_vm0 = vcmask 261120  }
  0x12   : > { %s2651_s5 = smov 126   ;;  %v218_v13 = vld [vmem:[#allocation2 + $0x28] sm:$0xff]  ;;  %s2652_s6 = smov 112   ;;  %v213_v14 = vld [vmem:[#allocation2] sm:$0xff]  ;;  %v219_v15 = vld [vmem:[#allocation2 + $0x30] sm:$0xff]  ;;  %vm594_vm1 = vcmask 1031168  }
  0x13   : > { %s3287_s16 = smov (!%p195_p6, %s2198_s16), 1  ;;  %s2653_s7 = smov 111   ;;  %v214_v16 = vld [vmem:[#allocation2 + $0x8] sm:$0xff]  ;;  %v220_v17 = vld [vmem:[#allocation2 + $0x38] sm:$0xff]  ;;  %v215_v19 = vld [vmem:[#allocation2 + $0x10] sm:$0xff]  ;;  %vm386_vm2 = vcmask 1039360  }
  0x14   : > { %s2357_s27 = sshll.u32 %s3287_s16, 6  ;;  %s2654_s8 = smov 110   ;;  %v216_v23 = vld [vmem:[#allocation2 + $0x18] sm:$0xff]  ;;  %vm802_vm3 = vcmask 916480   ;;  %v354_v47 = vld [vmem:[#allocation2 + $0x40] sm:$0xff]  ;;  %v355_v58 = vld [vmem:[#allocation2 + $0x48] sm:$0xff] }
  0x15   : > { %s199_s30 = scalar_lea.vmem %s3281_s0, %s2357_s27  ;;  %s2655_s9 = smov 96   ;;  %v562_v57 = vld [vmem:[#allocation2 + $0x80] sm:$0xff]  ;;  %vm1010_vm4 = vcmask 908288   ;;  %vm1218_vm5 = vcmask 900096   ;;  %vm329_vm6 = vcmask 490496   ;;  %vm1426_vm7 = vcmask 785408  }
  0x16   : > { %v351_v0 = vld [vmem:[%s199_s30 + $0x30] sm:$0xff]  ;;  %v352_v1 = vld [vmem:[%s199_s30 + $0x38] sm:$0xff]  ;;  %v350_v6 = vld [vmem:[%s199_s30 + $0x28] sm:$0xff]  ;;  %s2656_s10 = smov 95   ;;  %s2657_s11 = smov 94   ;;  %vm1634_vm8 = vcmask 777216  }
  0x17   : > { %v347_v2 = vld [vmem:[%s199_s30 + $0x10] sm:$0xff]  ;;  %v2712_v3 = vpack.i.bf16 %v352_v1, %v351_v0  ;;  %v348_v4 = vld [vmem:[%s199_s30 + $0x18] sm:$0xff]  ;;  %2363 = vmatpush.msra.mxu3 %v352_v1  ;;  %2359 = vmatpush.msra.mxu2 %v351_v0  ;;  %v349_v7 = vld [vmem:[%s199_s30 + $0x20] sm:$0xff]  ;;  %s2358_s13 = sshll.u32 %s3287_s16, 7  ;;  %vm1842_vm9 = vcmask 769024  }
  0x18   : > { %v2714_v5 = vpack.i.bf16 %v348_v4, %v347_v2  ;;  %299 = vmatpush.msra.mxu1 %v352_v1  ;;  %258 = vmatpush.msra.mxu0 %v351_v0  ;;  %v345_v8 = vld [vmem:[%s199_s30] sm:$0xff]  ;;  %v346_v9 = vld [vmem:[%s199_s30 + $0x8] sm:$0xff]  ;;  %v2412_v10 = vpack.i.bf16 %v350_v6, %v349_v7  ;;  %s2805_s17 = scalar_lea.vmem %s3284_s3, %s2358_s13 }
  0x19   : > { %2408 = vrot.lane.b32.xlu0 %v2712_v3, %s2650_s4  ;;  %2428 = vrot.lane.b32.xlu2 %v2712_v3, %s2651_s5  ;;  %v2422_v11 = vpack.i.bf16 %v346_v9, %v345_v8 }
  0x1a   : > { %2418 = vrot.lane.b32.xlu1 %v2714_v5, %s2650_s4  ;;  %2364 = vmatpush.msra.mxu3 %v350_v6 }
  0x1b   : > { %2360 = vmatpush.msra.mxu2 %v349_v7  ;;  %300 = vmatpush.msra.mxu1 %v350_v6 }
  0x1c   : > { %2365 = vmatpush.msra.mxu3 %v348_v4  ;;  %259 = vmatpush.msra.mxu0 %v349_v7 }
  0x1d   : > { %2361 = vmatpush.msra.mxu2 %v347_v2  ;;  %301 = vmatpush.msra.mxu1 %v348_v4  ;;  %v356_v4 = vld [vmem:[#allocation2 + $0x50] sm:$0xff] }
  0x1e   : > { %2366 = vmatpush.msra.mxu3 %v346_v9  ;;  %260 = vmatpush.msra.mxu0 %v347_v2  ;;  %v563_v2 = vld [vmem:[#allocation2 + $0x88] sm:$0xff] }
  0x1f   : > { %2362 = vmatpush.msra.mxu2 %v345_v8  ;;  %302 = vmatpush.msra.mxu1 %v346_v9 }
  0x20   : > { %261 = vmatpush.msra.mxu0 %v345_v8  ;;  %2223 = vmatmul.msk.f32.vlgmr.msra.gmra.mxu3 %vm221_vm0, %v217_v12 }
  0x21   : > { %2413 = vrot.lane.b32.xlu0 %v2412_v10, %s2650_s4  ;;  %2433 = vrot.lane.b32.xlu2 %v2412_v10, %s2651_s5 }
  0x22   : > { %2423 = vrot.lane.b32.xlu1 %v2422_v11, %s2650_s4  ;;  %2215 = vmatmul.msk.f32.vlgmr.msra.gmra.mxu2 %vm221_vm0, %v217_v12 }
  0x23   : > { %2219 = vmatmul.msk.f32.vlgmr.msra.gmra.mxu1 %vm221_vm0, %v213_v14  ;;  %2211 = vmatmul.msk.f32.vlgmr.msra.gmra.mxu0 %vm221_vm0, %v213_v14  ;;  %v564_v14 = vld [vmem:[#allocation2 + $0x90] sm:$0xff] }
  0x28   : > { %2224 = vmatmul.msk.f32.gmra.mxu3 %vm221_vm0, %v218_v13 }
  0x29   : > { %2438 = vrot.lane.b32.xlu0 %v2714_v5, %s2651_s5  ;;  %2448 = vrot.lane.b32.xlu2 %v2712_v3, %s2652_s6 }
  0x2a   : > { %2443 = vrot.lane.b32.xlu1 %v2422_v11, %s2651_s5  ;;  %2216 = vmatmul.msk.f32.gmra.mxu2 %vm221_vm0, %v218_v13 }
  0x2b   : > { %2220 = vmatmul.msk.f32.gmra.mxu1 %vm221_vm0, %v214_v16  ;;  %2212 = vmatmul.msk.f32.gmra.mxu0 %vm221_vm0, %v214_v16  ;;  %v357_v16 = vld [vmem:[#allocation2 + $0x58] sm:$0xff] }
  0x30   : > { %2225 = vmatmul.msk.f32.gmra.mxu3 %vm221_vm0, %v219_v15 }
  0x31   : > { %2453 = vrot.lane.b32.xlu0 %v2412_v10, %s2652_s6  ;;  %2463 = vrot.lane.b32.xlu2 %v2422_v11, %s2652_s6 }
  0x32   : > { %2458 = vrot.lane.b32.xlu1 %v2714_v5, %s2652_s6  ;;  %2217 = vmatmul.msk.f32.gmra.mxu2 %vm221_vm0, %v219_v15 }
  0x33   : > { %2221 = vmatmul.msk.f32.gmra.mxu1 %vm221_vm0, %v215_v19  ;;  %2213 = vmatmul.msk.f32.gmra.mxu0 %vm221_vm0, %v215_v19 }
  0x38   : > { %2226 = vmatmul.msk.f32.gmra.mxu3 %vm221_vm0, %v220_v17 }
  0x39   : > { %2468 = vrot.lane.b32.xlu0 %v2712_v3, %s2653_s7  ;;  %2478 = vrot.lane.b32.xlu2 %v2714_v5, %s2653_s7 }
  0x3a   : > { %2473 = vrot.lane.b32.xlu1 %v2412_v10, %s2653_s7  ;;  %2218 = vmatmul.msk.f32.gmra.mxu2 %vm221_vm0, %v220_v17 }
  0x3b   : > { %2214 = vmatmul.msk.f32.gmra.mxu0 %vm221_vm0, %v216_v23  ;;  %2222 = vmatmul.msk.f32.gmra.mxu1 %vm221_vm0, %v216_v23 }
  0x41   : > { %2483 = vrot.lane.b32.xlu0 %v2422_v11, %s2653_s7  ;;  %2493 = vrot.lane.b32.xlu2 %v2412_v10, %s2654_s8 }
  0x42   : > { %2488 = vrot.lane.b32.xlu1 %v2712_v3, %s2654_s8 }
  0x49   : > { %2498 = vrot.lane.b32.xlu0 %v2714_v5, %s2654_s8  ;;  %2508 = vrot.lane.b32.xlu2 %v2712_v3, %s2655_s9 }
  0x4a   : > { %2503 = vrot.lane.b32.xlu1 %v2422_v11, %s2654_s8 }
  0x51   : > { %2513 = vrot.lane.b32.xlu0 %v2412_v10, %s2655_s9  ;;  %2523 = vrot.lane.b32.xlu2 %v2422_v11, %s2655_s9 }
  0x52   : > { %2518 = vrot.lane.b32.xlu1 %v2714_v5, %s2655_s9 }
  0x59   : > { %2528 = vrot.lane.b32.xlu0 %v2712_v3, %s2656_s10  ;;  %2538 = vrot.lane.b32.xlu2 %v2714_v5, %s2656_s10 }
  0x5a   : > { %2533 = vrot.lane.b32.xlu1 %v2412_v10, %s2656_s10 }
  0x61   : > { %2543 = vrot.lane.b32.xlu0 %v2422_v11, %s2656_s10  ;;  %2553 = vrot.lane.b32.xlu2 %v2412_v10, %s2657_s11 }
  0x62   : > { %2548 = vrot.lane.b32.xlu1 %v2712_v3, %s2657_s11 }
  0x69   : > { %2558 = vrot.lane.b32.xlu0 %v2714_v5, %s2657_s11 }
  0x6a   : > { %2563 = vrot.lane.b32.xlu1 %v2422_v11, %s2657_s11 }
  0x73   : > { %v2429_v18 = vpop.permute.xlu2 %2428 }
  0x74   : > { %v2430_v20 = vunpack.i.l.bf16 %v2429_v18  ;;  %v2431_v21 = vunpack.i.h.bf16 %v2429_v18 }
  0x76   : > { %684 = vmatpush.msrb.mxu1 %v2431_v21  ;;  %v598_v24 = vsel %vm594_vm1, %v2430_v20, %v2431_v21  ;;  %v565_v21 = vld [vmem:[#allocation2 + $0x98] sm:$0xff] }
  0x77   : > { %643 = vmatpush.msrb.mxu0 %v598_v24 }
  0x7b   : > { %v2434_v22 = vpop.permute.xlu2 %2433 }
  0x7c   : > { %v2435_v25 = vunpack.i.l.bf16 %v2434_v22  ;;  %v2436_v26 = vunpack.i.h.bf16 %v2434_v22  ;;  %v358_v22 = vld [vmem:[#allocation2 + $0x60] sm:$0xff] }
  0x7e   : > { %685 = vmatpush.msrb.mxu1 %v2436_v26  ;;  %v597_v27 = vsel %vm594_vm1, %v2435_v25, %v2436_v26  ;;  %v566_v25 = vld [vmem:[#allocation2 + $0xa0] sm:$0xff] }
  0x7f   : > { %644 = vmatpush.msrb.mxu0 %v597_v27  ;;  %v359_v27 = vld [vmem:[#allocation2 + $0x68] sm:$0xff] }
  0x83   : > { %v2449_v41 = vpop.permute.xlu2 %2448 }
  0x84   : > { %v2451_v43 = vunpack.i.h.bf16 %v2449_v41  ;;  %v2450_v44 = vunpack.i.l.bf16 %v2449_v41 }
  0x86   : > { %v806_v48 = vsel %vm802_vm3, %v2450_v44, %v2451_v43 }
  0x8b   : > { %v2409_v28 = vpop.permute.xlu0 %2408  ;;  %v2464_v9 = vpop.permute.xlu2 %2463 }
  0x8c   : > { %v2410_v29 = vunpack.i.l.bf16 %v2409_v28  ;;  %v2411_v30 = vunpack.i.h.bf16 %v2409_v28  ;;  %v2419_v31 = vpop.permute.xlu1 %2418  ;;  %v2466_v12 = vunpack.i.h.bf16 %v2464_v9  ;;  %v2465_v17 = vunpack.i.l.bf16 %v2464_v9 }
  0x8d   : > { %v2420_v34 = vunpack.i.l.bf16 %v2419_v31  ;;  %v2421_v38 = vunpack.i.h.bf16 %v2419_v31 }
  0x8e   : > { %476 = vmatpush.msrb.mxu3 %v2411_v30  ;;  %v390_v32 = vsel %vm386_vm2, %v2410_v29, %v2411_v30  ;;  %v803_v18 = vsel %vm802_vm3, %v2465_v17, %v2466_v12  ;;  %v982_v17 = vld [vmem:[#allocation2 + $0x120] sm:$0xff] }
  0x8f   : > { %435 = vmatpush.msrb.mxu2 %v390_v32  ;;  %v388_v45 = vsel %vm386_vm2, %v2420_v34, %v2421_v38  ;;  %v360_v34 = vld [vmem:[#allocation2 + $0x70] sm:$0xff] }
  0x93   : > { %v2414_v33 = vpop.permute.xlu0 %2413  ;;  %v2479_v19 = vpop.permute.xlu2 %2478 }
  0x94   : > { %v2415_v35 = vunpack.i.l.bf16 %v2414_v33  ;;  %v2416_v36 = vunpack.i.h.bf16 %v2414_v33  ;;  %v2424_v37 = vpop.permute.xlu1 %2423  ;;  %v2481_v20 = vunpack.i.h.bf16 %v2479_v19  ;;  %v2480_v23 = vunpack.i.l.bf16 %v2479_v19  ;;  %v567_v33 = vld [vmem:[#allocation2 + $0xa8] sm:$0xff] }
  0x95   : > { %v2425_v39 = vunpack.i.l.bf16 %v2424_v37  ;;  %v2426_v40 = vunpack.i.h.bf16 %v2424_v37  ;;  %v775_v19 = vld [vmem:[#allocation2 + $0xe8] sm:$0xff] }
  0x96   : > { %477 = vmatpush.msrb.mxu3 %v2416_v36  ;;  %v389_v42 = vsel %vm386_vm2, %v2415_v35, %v2416_v36  ;;  %v1012_v24 = vsel %vm1010_vm4, %v2480_v23, %v2481_v20 }
  0x97   : > { %436 = vmatpush.msrb.mxu2 %v389_v42  ;;  %v387_v46 = vsel %vm386_vm2, %v2425_v39, %v2426_v40  ;;  %v568_v39 = vld [vmem:[#allocation2 + $0xb0] sm:$0xff] }
  0x98   : > { %478 = vmatpush.msrb.mxu3 %v2421_v38 }
  0x99   : > { %437 = vmatpush.msrb.mxu2 %v388_v45  ;;  %v569_v45 = vld [vmem:[#allocation2 + $0xb8] sm:$0xff] }
  0x9a   : > { %479 = vmatpush.msrb.mxu3 %v2426_v40  ;;  %v361_v40 = vld [vmem:[#allocation2 + $0x78] sm:$0xff] }
  0x9b   : > { %438 = vmatpush.msrb.mxu2 %v387_v46  ;;  %2235 = vmatmul.msk.f32.vlgmr.msrb.gmra.mxu3 %vm221_vm0, %v354_v47  ;;  %v2439_v49 = vpop.permute.xlu0 %2438  ;;  %v2494_v36 = vpop.permute.xlu2 %2493  ;;  %v770_v46 = vld [vmem:[#allocation2 + $0xc0] sm:$0xff] }
  0x9c   : > { %2227 = vmatmul.msk.f32.vlgmr.msrb.gmra.mxu2 %vm221_vm0, %v354_v47  ;;  %v2440_v50 = vunpack.i.l.bf16 %v2439_v49  ;;  %v2444_v51 = vpop.permute.xlu1 %2443  ;;  %v2441_v52 = vunpack.i.h.bf16 %v2439_v49  ;;  %892 = vmatpush.msra.mxu3 %v2451_v43  ;;  %v2496_v38 = vunpack.i.h.bf16 %v2494_v36  ;;  %v2495_v41 = vunpack.i.l.bf16 %v2494_v36 }
  0x9d   : > { %v2445_v53 = vunpack.i.l.bf16 %v2444_v51  ;;  %v2446_v54 = vunpack.i.h.bf16 %v2444_v51  ;;  %851 = vmatpush.msra.mxu2 %v806_v48 }
  0x9e   : > { %686 = vmatpush.msrb.mxu1 %v2441_v52  ;;  %v596_v55 = vsel %vm594_vm1, %v2440_v50, %v2441_v52  ;;  %v1221_v42 = vsel %vm1218_vm5, %v2495_v41, %v2496_v38  ;;  %v978_v52 = vld [vmem:[#allocation2 + $0x100] sm:$0xff] }
  0x9f   : > { %645 = vmatpush.msrb.mxu0 %v596_v55  ;;  %v595_v56 = vsel %vm594_vm1, %v2445_v53, %v2446_v54  ;;  %v771_v53 = vld [vmem:[#allocation2 + $0xc8] sm:$0xff] }
  0xa0   : > { %687 = vmatpush.msrb.mxu1 %v2446_v54 }
  0xa1   : > { %646 = vmatpush.msrb.mxu0 %v595_v56  ;;  %2251 = vmatmul.msk.f32.vlgmr.msrb.gmra.mxu1 %vm221_vm0, %v562_v57 }
  0xa2   : > { %2243 = vmatmul.msk.f32.vlgmr.msrb.gmra.mxu0 %vm221_vm0, %v562_v57  ;;  %v304_v57 = vpop.f32.mrf.mxu1 }
  0xa3   : > { %2236 = vmatmul.msk.f32.gmra.mxu3 %vm221_vm0, %v355_v58  ;;  %v2454_v59 = vpop.permute.xlu0 %2453  ;;  %v2509_v43 = vpop.permute.xlu2 %2508  ;;  %330 = vst.msk [vmem:[%s2805_s17 + $0x8] sm:$0xff] %vm329_vm6, %v304_v57 }
  0xa4   : > { %2228 = vmatmul.msk.f32.gmra.mxu2 %vm221_vm0, %v355_v58  ;;  %v2456_v60 = vunpack.i.h.bf16 %v2454_v59  ;;  %v2455_v61 = vunpack.i.l.bf16 %v2454_v59  ;;  %v2459_v62 = vpop.permute.xlu1 %2458  ;;  %v2511_v44 = vunpack.i.h.bf16 %v2509_v43  ;;  %v2510_v47 = vunpack.i.l.bf16 %v2509_v43  ;;  %v316_v48 = vpop.f32.mrf.mxu3  ;;  %v1186_v43 = vld [vmem:[#allocation2 + $0x140] sm:$0xff] }
  0xa5   : > { %v2461_v63 = vunpack.i.h.bf16 %v2459_v62  ;;  %v2460_v0 = vunpack.i.l.bf16 %v2459_v62  ;;  %338 = vst.msk [vmem:[%s2805_s17 + $0x48] sm:$0xff] %vm329_vm6, %v316_v48 }
  0xa6   : > { %893 = vmatpush.msra.mxu3 %v2456_v60  ;;  %v805_v1 = vsel %vm802_vm3, %v2455_v61, %v2456_v60  ;;  %v1430_v49 = vsel %vm1426_vm7, %v2510_v47, %v2511_v44  ;;  %v979_v60 = vld [vmem:[#allocation2 + $0x108] sm:$0xff]  ;;  %v772_v61 = vld [vmem:[#allocation2 + $0xd0] sm:$0xff] }
  0xa7   : > { %852 = vmatpush.msra.mxu2 %v805_v1  ;;  %v804_v3 = vsel %vm802_vm3, %v2460_v0, %v2461_v63 }
  0xa8   : > { %894 = vmatpush.msra.mxu3 %v2461_v63 }
  0xa9   : > { %2252 = vmatmul.msk.f32.gmra.mxu1 %vm221_vm0, %v563_v2  ;;  %853 = vmatpush.msra.mxu2 %v804_v3 }
  0xaa   : > { %2244 = vmatmul.msk.f32.gmra.mxu0 %vm221_vm0, %v563_v2  ;;  %895 = vmatpush.msra.mxu3 %v2466_v12  ;;  %v307_v1 = vpop.f32.mrf.mxu1  ;;  %v506_v48 = vld [vmem:[%s2805_s17 + $0x8] sm:$0xff] }
  0xab   : > { %2237 = vmatmul.msk.f32.gmra.mxu3 %vm221_vm0, %v356_v4  ;;  %v2469_v5 = vpop.permute.xlu0 %2468  ;;  %854 = vmatpush.msra.mxu2 %v803_v18  ;;  %332 = vst.msk [vmem:[%s2805_s17 + $0x18] sm:$0xff] %vm329_vm6, %v307_v1  ;;  %v2524_v18 = vpop.permute.xlu2 %2523 }
  0xac   : > { %2229 = vmatmul.msk.f32.gmra.mxu2 %vm221_vm0, %v356_v4  ;;  %v2471_v6 = vunpack.i.h.bf16 %v2469_v5  ;;  %v2470_v7 = vunpack.i.l.bf16 %v2469_v5  ;;  %v2474_v8 = vpop.permute.xlu1 %2473  ;;  %v319_v55 = vpop.f32.mrf.mxu3  ;;  %v980_v4 = vld [vmem:[#allocation2 + $0x110] sm:$0xff]  ;;  %v773_v5 = vld [vmem:[#allocation2 + $0xd8] sm:$0xff]  ;;  %v2526_v23 = vunpack.i.h.bf16 %v2524_v18 }
  0xad   : > { %v2476_v10 = vunpack.i.h.bf16 %v2474_v8  ;;  %v2475_v11 = vunpack.i.l.bf16 %v2474_v8  ;;  %340 = vst.msk [vmem:[%s2805_s17 + $0x58] sm:$0xff] %vm329_vm6, %v319_v55 }
  0xae   : > { %1100 = vmatpush.msra.mxu1 %v2471_v6  ;;  %v1014_v13 = vsel %vm1010_vm4, %v2470_v7, %v2471_v6 }
  0xaf   : > { %1059 = vmatpush.msra.mxu0 %v1014_v13  ;;  %v1013_v15 = vsel %vm1010_vm4, %v2475_v11, %v2476_v10  ;;  %v2836_v11 = vpop.f32.mrf.mxu2  ;;  %v981_v13 = vld [vmem:[#allocation2 + $0x118] sm:$0xff] }
  0xb0   : > { %1101 = vmatpush.msra.mxu1 %v2476_v10 }
  0xb1   : > { %2253 = vmatmul.msk.f32.gmra.mxu1 %vm221_vm0, %v564_v14  ;;  %1060 = vmatpush.msra.mxu0 %v1013_v15  ;;  %v774_v15 = vld [vmem:[#allocation2 + $0xe0] sm:$0xff] }
  0xb2   : > { %2245 = vmatmul.msk.f32.gmra.mxu0 %vm221_vm0, %v564_v14  ;;  %1102 = vmatpush.msra.mxu1 %v2481_v20  ;;  %v310_v9 = vpop.f32.mrf.mxu1  ;;  %v2840_v14 = vpop.f32.mrf.mxu0 }
  0xb3   : > { %2238 = vmatmul.msk.f32.gmra.mxu3 %vm221_vm0, %v357_v16  ;;  %1061 = vmatpush.msra.mxu0 %v1012_v24  ;;  %v2484_v26 = vpop.permute.xlu0 %2483  ;;  %334 = vst.msk [vmem:[%s2805_s17 + $0x28] sm:$0xff] %vm329_vm6, %v310_v9  ;;  %v2525_v24 = vunpack.i.l.bf16 %v2524_v18 }
  0xb4   : > { %2230 = vmatmul.msk.f32.gmra.mxu2 %vm221_vm0, %v357_v16  ;;  %v2486_v28 = vunpack.i.h.bf16 %v2484_v26  ;;  %v2485_v29 = vunpack.i.l.bf16 %v2484_v26  ;;  %v2489_v31 = vpop.permute.xlu1 %2488  ;;  %v322_v3 = vpop.f32.mrf.mxu3 }
  0xb5   : > { %v2491_v32 = vunpack.i.h.bf16 %v2489_v31  ;;  %v2490_v35 = vunpack.i.l.bf16 %v2489_v31  ;;  %342 = vst.msk [vmem:[%s2805_s17 + $0x68] sm:$0xff] %vm329_vm6, %v322_v3  ;;  %v1427_v26 = vsel %vm1426_vm7, %v2525_v24, %v2526_v23 }
  0xb6   : > { %1103 = vmatpush.msra.mxu1 %v2486_v28  ;;  %v1011_v30 = vsel %vm1010_vm4, %v2485_v29, %v2486_v28  ;;  %v776_v28 = vld [vmem:[#allocation2 + $0xf0] sm:$0xff] }
  0xb7   : > { %1062 = vmatpush.msra.mxu0 %v1011_v30  ;;  %1308 = vmatpush.msrb.mxu3 %v2491_v32  ;;  %v1222_v37 = vsel %vm1218_vm5, %v2490_v35, %v2491_v32  ;;  %v2848_v20 = vpop.f32.mrf.mxu2  ;;  %v777_v35 = vld [vmem:[#allocation2 + $0xf8] sm:$0xff] }
  0xb8   : > { %1267 = vmatpush.msrb.mxu2 %v1222_v37  ;;  %1516 = vmatpush.msrb.mxu1 %v2511_v44 }
  0xb9   : > { %2254 = vmatmul.msk.f32.gmra.mxu1 %vm221_vm0, %v565_v21  ;;  %1309 = vmatpush.msrb.mxu3 %v2496_v38 }
  0xba   : > { %2246 = vmatmul.msk.f32.gmra.mxu0 %vm221_vm0, %v565_v21  ;;  %1268 = vmatpush.msrb.mxu2 %v1221_v42  ;;  %v985_v42 = vld [vmem:[#allocation2 + $0x138] sm:$0xff] }
  0xbb   : > { %2239 = vmatmul.msk.f32.gmra.mxu3 %vm221_vm0, %v358_v22  ;;  %v2499_v50 = vpop.permute.xlu0 %2498  ;;  %1475 = vmatpush.msrb.mxu0 %v1430_v49 }
  0xbc   : > { %2231 = vmatmul.msk.f32.gmra.mxu2 %vm221_vm0, %v358_v22  ;;  %v2501_v51 = vunpack.i.h.bf16 %v2499_v50  ;;  %v2500_v54 = vunpack.i.l.bf16 %v2499_v50  ;;  %v2504_v0 = vpop.permute.xlu1 %2503  ;;  %v325_v12 = vpop.f32.mrf.mxu3 }
  0xbd   : > { %v2506_v2 = vunpack.i.h.bf16 %v2504_v0  ;;  %v2505_v6 = vunpack.i.l.bf16 %v2504_v0  ;;  %344 = vst.msk [vmem:[%s2805_s17 + $0x78] sm:$0xff] %vm329_vm6, %v325_v12  ;;  %v313_v22 = vpop.f32.mrf.mxu1 }
  0xbe   : > { %1310 = vmatpush.msrb.mxu3 %v2501_v51  ;;  %v1220_v56 = vsel %vm1218_vm5, %v2500_v54, %v2501_v51  ;;  %336 = vst.msk [vmem:[%s2805_s17 + $0x38] sm:$0xff] %vm329_vm6, %v313_v22  ;;  %v1394_v54 = vld [vmem:[#allocation2 + $0x180] sm:$0xff]  ;;  %v1396_v22 = vld [vmem:[#allocation2 + $0x190] sm:$0xff] }
  0xbf   : > { %1269 = vmatpush.msrb.mxu2 %v1220_v56  ;;  %v1219_v7 = vsel %vm1218_vm5, %v2505_v6, %v2506_v2  ;;  %v2861_v29 = vpop.f32.mrf.mxu2  ;;  %v1187_v56 = vld [vmem:[#allocation2 + $0x148] sm:$0xff] }
  0xc0   : > { %1311 = vmatpush.msrb.mxu3 %v2506_v2 }
  0xc1   : > { %2255 = vmatmul.msk.f32.gmra.mxu1 %vm221_vm0, %v566_v25  ;;  %1270 = vmatpush.msrb.mxu2 %v1219_v7  ;;  %v1188_v7 = vld [vmem:[#allocation2 + $0x150] sm:$0xff] }
  0xc2   : > { %2247 = vmatmul.msk.f32.gmra.mxu0 %vm221_vm0, %v566_v25  ;;  %v2852_v25 = vpop.f32.mrf.mxu0 }
  0xc3   : > { %2240 = vmatmul.msk.f32.gmra.mxu3 %vm221_vm0, %v359_v27  ;;  %v2514_v58 = vpop.permute.xlu0 %2513 }
  0xc4   : > { %2232 = vmatmul.msk.f32.gmra.mxu2 %vm221_vm0, %v359_v27  ;;  %v2516_v59 = vunpack.i.h.bf16 %v2514_v58  ;;  %v2515_v62 = vunpack.i.l.bf16 %v2514_v58  ;;  %v2519_v8 = vpop.permute.xlu1 %2518  ;;  %v983_v27 = vld [vmem:[#allocation2 + $0x128] sm:$0xff] }
  0xc5   : > { %v2521_v10 = vunpack.i.h.bf16 %v2519_v8  ;;  %v2520_v16 = vunpack.i.l.bf16 %v2519_v8 }
  0xc6   : > { %1517 = vmatpush.msrb.mxu1 %v2516_v59  ;;  %v1429_v63 = vsel %vm1426_vm7, %v2515_v62, %v2516_v59  ;;  %v2539_v59 = vpop.permute.xlu2 %2538 }
  0xc7   : > { %1476 = vmatpush.msrb.mxu0 %v1429_v63  ;;  %v1428_v21 = vsel %vm1426_vm7, %v2520_v16, %v2521_v10  ;;  %v508_v63 = vld [vmem:[%s2805_s17 + $0x18] sm:$0xff]  ;;  %v510_v16 = vld [vmem:[%s2805_s17 + $0x28] sm:$0xff] }
  0xc8   : > { %1518 = vmatpush.msrb.mxu1 %v2521_v10 }
  0xc9   : > { %2256 = vmatmul.msk.f32.gmra.mxu1 %vm221_vm0, %v567_v33  ;;  %1477 = vmatpush.msrb.mxu0 %v1428_v21 }
  0xca   : > { %2248 = vmatmul.msk.f32.gmra.mxu0 %vm221_vm0, %v567_v33  ;;  %1519 = vmatpush.msrb.mxu1 %v2526_v23  ;;  %v2865_v30 = vpop.f32.mrf.mxu0 }
  0xcb   : > { %2241 = vmatmul.msk.f32.gmra.mxu3 %vm221_vm0, %v360_v34  ;;  %1478 = vmatpush.msrb.mxu0 %v1427_v26  ;;  %v2529_v31 = vpop.permute.xlu0 %2528 }
  0xcc   : > { %2233 = vmatmul.msk.f32.gmra.mxu2 %vm221_vm0, %v360_v34  ;;  %v2531_v32 = vunpack.i.h.bf16 %v2529_v31  ;;  %v2530_v33 = vunpack.i.l.bf16 %v2529_v31  ;;  %v984_v34 = vld [vmem:[#allocation2 + $0x130] sm:$0xff]  ;;  %v2534_v37 = vpop.permute.xlu1 %2533 }
  0xcd   : > { %v2536_v38 = vunpack.i.h.bf16 %v2534_v37  ;;  %v2535_v41 = vunpack.i.l.bf16 %v2534_v37 }
  0xce   : > { %v1638_v36 = vsel %vm1634_vm8, %v2530_v33, %v2531_v32  ;;  %v2554_v12 = vpop.permute.xlu2 %2553 }
  0xcf   : > { %v1637_v44 = vsel %vm1634_vm8, %v2535_v41, %v2536_v38  ;;  %v1397_v41 = vld [vmem:[#allocation2 + $0x198] sm:$0xff] }
  0xd1   : > { %2257 = vmatmul.msk.f32.gmra.mxu1 %vm221_vm0, %v568_v39 }
  0xd2   : > { %2249 = vmatmul.msk.f32.gmra.mxu0 %vm221_vm0, %v568_v39  ;;  %v2873_v39 = vpop.f32.mrf.mxu2 }
  0xd3   : > { %2242 = vmatmul.msk.f32.gmra.mxu3 %vm221_vm0, %v361_v40 }
  0xd4   : > { %2234 = vmatmul.msk.f32.gmra.mxu2 %vm221_vm0, %v361_v40  ;;  %v2875_v40 = vpop.f32.mrf.mxu0 }
  0xd9   : > { %2258 = vmatmul.msk.f32.gmra.mxu1 %vm221_vm0, %v569_v45 }
  0xda   : > { %2250 = vmatmul.msk.f32.gmra.mxu0 %vm221_vm0, %v569_v45  ;;  %v2549_v45 = vpop.permute.xlu1 %2548 }
  0xdb   : > { %2267 = vmatmul.msk.f32.vlgmr.msra.gmra.mxu3 %vm221_vm0, %v770_v46  ;;  %v2550_v50 = vunpack.i.l.bf16 %v2549_v45 }
  0xdc   : > { %2259 = vmatmul.msk.f32.vlgmr.msra.gmra.mxu2 %vm221_vm0, %v770_v46  ;;  %1724 = vmatpush.msra.mxu3 %v2531_v32  ;;  %v2551_v46 = vunpack.i.h.bf16 %v2549_v45 }
  0xdd   : > { %1683 = vmatpush.msra.mxu2 %v1638_v36 }
  0xde   : > { %1725 = vmatpush.msra.mxu3 %v2536_v38  ;;  %v1846_v58 = vsel %vm1842_vm9, %v2550_v50, %v2551_v46 }
  0xdf   : > { %1684 = vmatpush.msra.mxu2 %v1637_v44  ;;  %v1190_v44 = vld [vmem:[#allocation2 + $0x160] sm:$0xff] }
  0xe1   : > { %2283 = vmatmul.msk.f32.vlgmr.msra.gmra.mxu1 %vm221_vm0, %v978_v52 }
  0xe2   : > { %2275 = vmatmul.msk.f32.vlgmr.msra.gmra.mxu0 %vm221_vm0, %v978_v52  ;;  %1932 = vmatpush.msra.mxu1 %v2551_v46 }
  0xe3   : > { %2268 = vmatmul.msk.f32.gmra.mxu3 %vm221_vm0, %v771_v53  ;;  %1891 = vmatpush.msra.mxu0 %v1846_v58 }
  0xe4   : > { %2260 = vmatmul.msk.f32.gmra.mxu2 %vm221_vm0, %v771_v53 }
  0xe9   : > { %2284 = vmatmul.msk.f32.gmra.mxu1 %vm221_vm0, %v979_v60 }
  0xea   : > { %2276 = vmatmul.msk.f32.gmra.mxu0 %vm221_vm0, %v979_v60  ;;  %v2541_v60 = vunpack.i.h.bf16 %v2539_v59 }
  0xeb   : > { %2269 = vmatmul.msk.f32.gmra.mxu3 %vm221_vm0, %v772_v61 }
  0xec   : > { %2261 = vmatmul.msk.f32.gmra.mxu2 %vm221_vm0, %v772_v61  ;;  %v2540_v61 = vunpack.i.l.bf16 %v2539_v59  ;;  %1726 = vmatpush.msra.mxu3 %v2541_v60 }
  0xee   : > { %v1636_v9 = vsel %vm1634_vm8, %v2540_v61, %v2541_v60  ;;  %v1191_v60 = vld [vmem:[#allocation2 + $0x168] sm:$0xff] }
  0xef   : > { %1685 = vmatpush.msra.mxu2 %v1636_v9  ;;  %v1399_v9 = vld [vmem:[#allocation2 + $0x1a8] sm:$0xff] }
  0xf1   : > { %2285 = vmatmul.msk.f32.gmra.mxu1 %vm221_vm0, %v980_v4 }
  0xf2   : > { %2277 = vmatmul.msk.f32.gmra.mxu0 %vm221_vm0, %v980_v4  ;;  %v1395_v4 = vld [vmem:[#allocation2 + $0x188] sm:$0xff] }
  0xf3   : > { %2270 = vmatmul.msk.f32.gmra.mxu3 %vm221_vm0, %v773_v5 }
  0xf4   : > { %2262 = vmatmul.msk.f32.gmra.mxu2 %vm221_vm0, %v773_v5 }
  0xf9   : > { %2286 = vmatmul.msk.f32.gmra.mxu1 %vm221_vm0, %v981_v13 }
  0xfa   : > { %2278 = vmatmul.msk.f32.gmra.mxu0 %vm221_vm0, %v981_v13  ;;  %v2556_v13 = vunpack.i.h.bf16 %v2554_v12 }
  0xfb   : > { %2271 = vmatmul.msk.f32.gmra.mxu3 %vm221_vm0, %v774_v15 }
  0xfc   : > { %2263 = vmatmul.msk.f32.gmra.mxu2 %vm221_vm0, %v774_v15  ;;  %1933 = vmatpush.msra.mxu1 %v2556_v13 }
 0x101   : > { %2287 = vmatmul.msk.f32.gmra.mxu1 %vm221_vm0, %v982_v17 }
 0x102   : > { %2279 = vmatmul.msk.f32.gmra.mxu0 %vm221_vm0, %v982_v17 }
 0x103   : > { %2272 = vmatmul.msk.f32.gmra.mxu3 %vm221_vm0, %v775_v19 }
 0x104   : > { %2264 = vmatmul.msk.f32.gmra.mxu2 %vm221_vm0, %v775_v19 }
 0x109   : > { %2288 = vmatmul.msk.f32.gmra.mxu1 %vm221_vm0, %v983_v27 }
 0x10a   : > { %2280 = vmatmul.msk.f32.gmra.mxu0 %vm221_vm0, %v983_v27 }
 0x10b   : > { %2273 = vmatmul.msk.f32.gmra.mxu3 %vm221_vm0, %v776_v28 }
 0x10c   : > { %2265 = vmatmul.msk.f32.gmra.mxu2 %vm221_vm0, %v776_v28 }
 0x111   : > { %2289 = vmatmul.msk.f32.gmra.mxu1 %vm221_vm0, %v984_v34 }
 0x112   : > { %2281 = vmatmul.msk.f32.gmra.mxu0 %vm221_vm0, %v984_v34  ;;  %v512_v34 = vld [vmem:[%s2805_s17 + $0x38] sm:$0xff] }
 0x113   : > { %2274 = vmatmul.msk.f32.gmra.mxu3 %vm221_vm0, %v777_v35 }
 0x114   : > { %2266 = vmatmul.msk.f32.gmra.mxu2 %vm221_vm0, %v777_v35 }
 0x119   : > { %2290 = vmatmul.msk.f32.gmra.mxu1 %vm221_vm0, %v985_v42 }
 0x11a   : > { %2282 = vmatmul.msk.f32.gmra.mxu0 %vm221_vm0, %v985_v42 }
 0x11b   : > { %2299 = vmatmul.msk.f32.vlgmr.msrb.gmra.mxu3 %vm221_vm0, %v1186_v43 }
 0x11c   : > { %2291 = vmatmul.msk.f32.vlgmr.msrb.gmra.mxu2 %vm221_vm0, %v1186_v43 }
 0x11e   : > { %v481_v47 = vpop.f32.mrf.mxu3  ;;  %v689_v49 = vpop.f32.mrf.mxu1 }
 0x11f   : > { %v522_v51 = vadd.f32 %v506_v48, %v481_v47  ;;  %v440_v52 = vpop.f32.mrf.mxu2  ;;  %v648_v53 = vpop.f32.mrf.mxu0 }
 0x120   : > { %v521_v55 = vadd.f32 %v440_v52, %v2840_v14  ;;  %v2555_v14 = vunpack.i.l.bf16 %v2554_v12 }
 0x121   : > { %538 = vst.msk [vmem:[%s2805_s17 + $0x8] sm:$0xff] %vm329_vm6, %v522_v51  ;;  %2315 = vmatmul.msk.f32.vlgmr.msrb.gmra.mxu1 %vm221_vm0, %v1394_v54  ;;  %v514_v51 = vld [vmem:[%s2805_s17 + $0x48] sm:$0xff] }
 0x122   : > { %v2887_v57 = vadd.f32 %v648_v53, %v521_v55  ;;  %2307 = vmatmul.msk.f32.vlgmr.msrb.gmra.mxu0 %vm221_vm0, %v1394_v54  ;;  %v1845_v27 = vsel %vm1842_vm9, %v2555_v14, %v2556_v13  ;;  %v1192_v14 = vld [vmem:[#allocation2 + $0x170] sm:$0xff] }
 0x123   : > { %2300 = vmatmul.msk.f32.gmra.mxu3 %vm221_vm0, %v1187_v56  ;;  %1892 = vmatpush.msra.mxu0 %v1845_v27 }
 0x124   : > { %2292 = vmatmul.msk.f32.gmra.mxu2 %vm221_vm0, %v1187_v56  ;;  %v1398_v56 = vld [vmem:[#allocation2 + $0x1a0] sm:$0xff] }
 0x126   : > { %v484_v62 = vpop.f32.mrf.mxu3  ;;  %v692_v0 = vpop.f32.mrf.mxu1 }
 0x127   : > { %v524_v1 = vadd.f32 %v508_v63, %v484_v62  ;;  %v443_v2 = vpop.f32.mrf.mxu2  ;;  %v651_v3 = vpop.f32.mrf.mxu0 }
 0x128   : > { %v523_v5 = vadd.f32 %v443_v2, %v2852_v25  ;;  %v714_v6 = vld [vmem:[%s2805_s17 + $0x8] sm:$0xff]  ;;  %v1189_v25 = vld [vmem:[#allocation2 + $0x158] sm:$0xff]  ;;  %v2564_v62 = vpop.permute.xlu1 %2563 }
 0x129   : > { %540 = vst.msk [vmem:[%s2805_s17 + $0x18] sm:$0xff] %vm329_vm6, %v524_v1  ;;  %v730_v8 = vadd.f32 %v714_v6, %v689_v49  ;;  %2316 = vmatmul.msk.f32.gmra.mxu1 %vm221_vm0, %v1395_v4  ;;  %v2565_v1 = vunpack.i.l.bf16 %v2564_v62 }
 0x12a   : > { %v2900_v10 = vadd.f32 %v651_v3, %v523_v5  ;;  %2308 = vmatmul.msk.f32.gmra.mxu0 %vm221_vm0, %v1395_v4  ;;  %v516_v4 = vld [vmem:[%s2805_s17 + $0x58] sm:$0xff] }
 0x12b   : > { %746 = vst.msk [vmem:[%s2805_s17 + $0x8] sm:$0xff] %vm329_vm6, %v730_v8  ;;  %2301 = vmatmul.msk.f32.gmra.mxu3 %vm221_vm0, %v1188_v7 }
 0x12c   : > { %2293 = vmatmul.msk.f32.gmra.mxu2 %vm221_vm0, %v1188_v7 }
 0x12e   : > { %v487_v15 = vpop.f32.mrf.mxu3  ;;  %v695_v17 = vpop.f32.mrf.mxu1 }
 0x12f   : > { %v526_v18 = vadd.f32 %v510_v16, %v487_v15  ;;  %v446_v19 = vpop.f32.mrf.mxu2  ;;  %v654_v21 = vpop.f32.mrf.mxu0 }
 0x130   : > { %v525_v23 = vadd.f32 %v446_v19, %v2865_v30  ;;  %v716_v24 = vld [vmem:[%s2805_s17 + $0x18] sm:$0xff]  ;;  %v2544_v30 = vpop.permute.xlu0 %2543 }
 0x131   : > { %542 = vst.msk [vmem:[%s2805_s17 + $0x28] sm:$0xff] %vm329_vm6, %v526_v18  ;;  %v732_v26 = vadd.f32 %v716_v24, %v692_v0  ;;  %2317 = vmatmul.msk.f32.gmra.mxu1 %vm221_vm0, %v1396_v22  ;;  %v2546_v31 = vunpack.i.h.bf16 %v2544_v30  ;;  %v2545_v32 = vunpack.i.l.bf16 %v2544_v30  ;;  %v2566_v0 = vunpack.i.h.bf16 %v2564_v62 }
 0x132   : > { %v2914_v28 = vadd.f32 %v654_v21, %v525_v23  ;;  %2309 = vmatmul.msk.f32.gmra.mxu0 %vm221_vm0, %v1396_v22  ;;  %v1400_v23 = vld [vmem:[#allocation2 + $0x1b0] sm:$0xff] }
 0x133   : > { %748 = vst.msk [vmem:[%s2805_s17 + $0x18] sm:$0xff] %vm329_vm6, %v732_v26  ;;  %2302 = vmatmul.msk.f32.gmra.mxu3 %vm221_vm0, %v1189_v25  ;;  %v1635_v46 = vsel %vm1634_vm8, %v2545_v32, %v2546_v31  ;;  %v1193_v26 = vld [vmem:[#allocation2 + $0x178] sm:$0xff] }
 0x134   : > { %2294 = vmatmul.msk.f32.gmra.mxu2 %vm221_vm0, %v1189_v25  ;;  %1727 = vmatpush.msra.mxu3 %v2546_v31  ;;  %v520_v31 = vld [vmem:[%s2805_s17 + $0x78] sm:$0xff] }
 0x135   : > { %1686 = vmatpush.msra.mxu2 %v1635_v46  ;;  %v922_v46 = vld [vmem:[%s2805_s17 + $0x8] sm:$0xff] }
 0x136   : > { %v490_v33 = vpop.f32.mrf.mxu3  ;;  %v698_v35 = vpop.f32.mrf.mxu1 }
 0x137   : > { %v528_v36 = vadd.f32 %v512_v34, %v490_v33  ;;  %v449_v37 = vpop.f32.mrf.mxu2  ;;  %v657_v38 = vpop.f32.mrf.mxu0 }
 0x138   : > { %v527_v42 = vadd.f32 %v449_v37, %v2875_v40  ;;  %v718_v43 = vld [vmem:[%s2805_s17 + $0x28] sm:$0xff]  ;;  %v2559_v40 = vpop.permute.xlu0 %2558 }
 0x139   : > { %544 = vst.msk [vmem:[%s2805_s17 + $0x38] sm:$0xff] %vm329_vm6, %v528_v36  ;;  %v734_v45 = vadd.f32 %v718_v43, %v695_v17  ;;  %2318 = vmatmul.msk.f32.gmra.mxu1 %vm221_vm0, %v1397_v41  ;;  %v2561_v48 = vunpack.i.h.bf16 %v2559_v40  ;;  %v2560_v49 = vunpack.i.l.bf16 %v2559_v40  ;;  %v518_v17 = vld [vmem:[%s2805_s17 + $0x68] sm:$0xff]  ;;  %v1401_v36 = vld [vmem:[#allocation2 + $0x1b8] sm:$0xff] }
 0x13a   : > { %v2928_v47 = vadd.f32 %v657_v38, %v527_v42  ;;  %2310 = vmatmul.msk.f32.gmra.mxu0 %vm221_vm0, %v1397_v41  ;;  %v1602_v41 = vld [vmem:[#allocation2 + $0x1c0] sm:$0xff]  ;;  %v2658_v42 = vmov 0   ;;  %v2026_v43 = vld [vmem:[#allocation4 + $0x8] sm:$0xff] }
 0x13b   : > { %750 = vst.msk [vmem:[%s2805_s17 + $0x28] sm:$0xff] %vm329_vm6, %v734_v45  ;;  %2303 = vmatmul.msk.f32.gmra.mxu3 %vm221_vm0, %v1190_v44  ;;  %1934 = vmatpush.msra.mxu1 %v2561_v48  ;;  %v1844_v61 = vsel %vm1842_vm9, %v2560_v49, %v2561_v48 }
 0x13c   : > { %2295 = vmatmul.msk.f32.gmra.mxu2 %vm221_vm0, %v1190_v44  ;;  %1893 = vmatpush.msra.mxu0 %v1844_v61 }
 0x13d   : > { %1935 = vmatpush.msra.mxu1 %v2566_v0  ;;  %2568 = vset.pattern.permute.xlu0 %v2658_v42 }
 0x13e   : > { %v493_v50 = vpop.f32.mrf.mxu3  ;;  %v701_v52 = vpop.f32.mrf.mxu1  ;;  %2569 = vset.pattern.permute.xlu1 %v2658_v42  ;;  %2040 = vperm.xlu0 %2568, %v2026_v43   ;;  %v1814_v43 = vld [vmem:[#allocation2 + $0x220] sm:$0xff] }
 0x13f   : > { %v530_v53 = vadd.f32 %v514_v51, %v493_v50  ;;  %v452_v54 = vpop.f32.mrf.mxu2  ;;  %v660_v55 = vpop.f32.mrf.mxu0  ;;  %2567 = vset.pattern.permute.xlu2 %v2658_v42  ;;  %v1810_v51 = vld [vmem:[#allocation2 + $0x200] sm:$0xff] }
 0x140   : > { %v529_v58 = vadd.f32 %v452_v54, %v2836_v11  ;;  %v720_v59 = vld [vmem:[%s2805_s17 + $0x38] sm:$0xff]  ;;  %v1843_v11 = vsel %vm1842_vm9, %v2565_v1, %v2566_v0  ;;  %v1603_v54 = vld [vmem:[#allocation2 + $0x1c8] sm:$0xff] }
 0x141   : > { %546 = vst.msk [vmem:[%s2805_s17 + $0x48] sm:$0xff] %vm329_vm6, %v530_v53  ;;  %v736_v63 = vadd.f32 %v720_v59, %v698_v35  ;;  %2319 = vmatmul.msk.f32.gmra.mxu1 %vm221_vm0, %v1398_v56  ;;  %1894 = vmatpush.msra.mxu0 %v1843_v11  ;;  %v924_v59 = vld [vmem:[%s2805_s17 + $0x18] sm:$0xff]  ;;  %v1811_v0 = vld [vmem:[#allocation2 + $0x208] sm:$0xff] }
 0x142   : > { %v2942_v2 = vadd.f32 %v660_v55, %v529_v58  ;;  %2311 = vmatmul.msk.f32.gmra.mxu0 %vm221_vm0, %v1398_v56  ;;  %v2027_v55 = vld [vmem:[#allocation4 + $0x10] sm:$0xff] }
 0x143   : > { %752 = vst.msk [vmem:[%s2805_s17 + $0x38] sm:$0xff] %vm329_vm6, %v736_v63  ;;  %2304 = vmatmul.msk.f32.gmra.mxu3 %vm221_vm0, %v1191_v60  ;;  %2045 = vperm.xlu1 %2569, %v2027_v55   ;;  %v1815_v55 = vld [vmem:[#allocation2 + $0x228] sm:$0xff] }
 0x144   : > { %2296 = vmatmul.msk.f32.gmra.mxu2 %vm221_vm0, %v1191_v60 }
 0x146   : > { %v496_v3 = vpop.f32.mrf.mxu3  ;;  %v704_v5 = vpop.f32.mrf.mxu1 }
 0x147   : > { %v532_v6 = vadd.f32 %v516_v4, %v496_v3  ;;  %v455_v7 = vpop.f32.mrf.mxu2  ;;  %v663_v8 = vpop.f32.mrf.mxu0  ;;  %v1604_v3 = vld [vmem:[#allocation2 + $0x1d0] sm:$0xff]  ;;  %v2025_v4 = vld [vmem:[#allocation4] sm:$0xff] }
 0x148   : > { %v531_v12 = vadd.f32 %v455_v7, %v2848_v20  ;;  %v722_v13 = vld [vmem:[%s2805_s17 + $0x48] sm:$0xff]  ;;  %2035 = vperm.xlu2 %2567, %v2025_v4   ;;  %v1816_v4 = vld [vmem:[#allocation2 + $0x230] sm:$0xff] }
 0x149   : > { %548 = vst.msk [vmem:[%s2805_s17 + $0x58] sm:$0xff] %vm329_vm6, %v532_v6  ;;  %v738_v15 = vadd.f32 %v722_v13, %v701_v52  ;;  %2320 = vmatmul.msk.f32.gmra.mxu1 %vm221_vm0, %v1399_v9  ;;  %v926_v7 = vld [vmem:[%s2805_s17 + $0x28] sm:$0xff] }
 0x14a   : > { %v2956_v16 = vadd.f32 %v663_v8, %v531_v12  ;;  %2312 = vmatmul.msk.f32.gmra.mxu0 %vm221_vm0, %v1399_v9 }
 0x14b   : > { %754 = vst.msk [vmem:[%s2805_s17 + $0x48] sm:$0xff] %vm329_vm6, %v738_v15  ;;  %2305 = vmatmul.msk.f32.gmra.mxu3 %vm221_vm0, %v1192_v14 }
 0x14c   : > { %2297 = vmatmul.msk.f32.gmra.mxu2 %vm221_vm0, %v1192_v14  ;;  %v1812_v14 = vld [vmem:[#allocation2 + $0x210] sm:$0xff] }
 0x14e   : > { %v499_v20 = vpop.f32.mrf.mxu3  ;;  %v707_v18 = vpop.f32.mrf.mxu1 }
 0x14f   : > { %v534_v19 = vadd.f32 %v518_v17, %v499_v20  ;;  %v458_v21 = vpop.f32.mrf.mxu2  ;;  %v666_v22 = vpop.f32.mrf.mxu0  ;;  %v1605_v17 = vld [vmem:[#allocation2 + $0x1d8] sm:$0xff] }
 0x150   : > { %v533_v24 = vadd.f32 %v458_v21, %v2861_v29  ;;  %v724_v25 = vld [vmem:[%s2805_s17 + $0x58] sm:$0xff] }
 0x151   : > { %550 = vst.msk [vmem:[%s2805_s17 + $0x68] sm:$0xff] %vm329_vm6, %v534_v19  ;;  %v740_v27 = vadd.f32 %v724_v25, %v704_v5  ;;  %2321 = vmatmul.msk.f32.gmra.mxu1 %vm221_vm0, %v1400_v23 }
 0x152   : > { %v2969_v30 = vadd.f32 %v666_v22, %v533_v24  ;;  %2313 = vmatmul.msk.f32.gmra.mxu0 %vm221_vm0, %v1400_v23  ;;  %v928_v22 = vld [vmem:[%s2805_s17 + $0x38] sm:$0xff] }
 0x153   : > { %756 = vst.msk [vmem:[%s2805_s17 + $0x58] sm:$0xff] %vm329_vm6, %v740_v27  ;;  %2306 = vmatmul.msk.f32.gmra.mxu3 %vm221_vm0, %v1193_v26  ;;  %v1813_v27 = vld [vmem:[#allocation2 + $0x218] sm:$0xff] }
 0x154   : > { %2298 = vmatmul.msk.f32.gmra.mxu2 %vm221_vm0, %v1193_v26 }
 0x156   : > { %v502_v29 = vpop.f32.mrf.mxu3  ;;  %v710_v32 = vpop.f32.mrf.mxu1 }
 0x157   : > { %v536_v33 = vadd.f32 %v520_v31, %v502_v29  ;;  %v461_v34 = vpop.f32.mrf.mxu2  ;;  %v669_v35 = vpop.f32.mrf.mxu0 }
 0x158   : > { %v535_v37 = vadd.f32 %v461_v34, %v2873_v39  ;;  %v726_v38 = vld [vmem:[%s2805_s17 + $0x68] sm:$0xff] }
 0x159   : > { %552 = vst.msk [vmem:[%s2805_s17 + $0x78] sm:$0xff] %vm329_vm6, %v536_v33  ;;  %v742_v44 = vadd.f32 %v726_v38, %v707_v18  ;;  %2322 = vmatmul.msk.f32.gmra.mxu1 %vm221_vm0, %v1401_v36  ;;  %v2029_v18 = vld [vmem:[#allocation4 + $0x20] sm:$0xff] }
 0x15a   : > { %v2982_v45 = vadd.f32 %v669_v35, %v535_v37  ;;  %2314 = vmatmul.msk.f32.gmra.mxu0 %vm221_vm0, %v1401_v36  ;;  %2055 = vperm.xlu1 %2569, %v2029_v18   ;;  %v930_v35 = vld [vmem:[%s2805_s17 + $0x48] sm:$0xff]  ;;  %v1817_v18 = vld [vmem:[#allocation2 + $0x238] sm:$0xff] }
 0x15b   : > { %758 = vst.msk [vmem:[%s2805_s17 + $0x68] sm:$0xff] %vm329_vm6, %v742_v44  ;;  %2331 = vmatmul.msk.f32.vlgmr.msra.gmra.mxu3 %vm221_vm0, %v1602_v41 }
 0x15c   : > { %2323 = vmatmul.msk.f32.vlgmr.msra.gmra.mxu2 %vm221_vm0, %v1602_v41  ;;  %v1607_v41 = vld [vmem:[#allocation2 + $0x1e8] sm:$0xff] }
 0x15e   : > { %v897_v39 = vpop.f32.mrf.mxu3  ;;  %v1105_v40 = vpop.f32.mrf.mxu1 }
 0x15f   : > { %v938_v48 = vadd.f32 %v922_v46, %v897_v39  ;;  %v856_v49 = vpop.f32.mrf.mxu2  ;;  %v1064_v50 = vpop.f32.mrf.mxu0  ;;  %v2028_v46 = vld [vmem:[#allocation4 + $0x18] sm:$0xff] }
 0x160   : > { %v937_v52 = vadd.f32 %v856_v49, %v2887_v57  ;;  %v728_v53 = vld [vmem:[%s2805_s17 + $0x78] sm:$0xff]  ;;  %2050 = vperm.xlu2 %2567, %v2028_v46  }
 0x161   : > { %954 = vst.msk [vmem:[%s2805_s17 + $0x8] sm:$0xff] %vm329_vm6, %v938_v48  ;;  %v744_v56 = vadd.f32 %v728_v53, %v710_v32  ;;  %2347 = vmatmul.msk.f32.vlgmr.msra.gmra.mxu1 %vm221_vm0, %v1810_v51  ;;  %v1606_v32 = vld [vmem:[#allocation2 + $0x1e0] sm:$0xff] }
 0x162   : > { %v2995_v58 = vadd.f32 %v1064_v50, %v937_v52  ;;  %2339 = vmatmul.msk.f32.vlgmr.msra.gmra.mxu0 %vm221_vm0, %v1810_v51  ;;  %v932_v50 = vld [vmem:[%s2805_s17 + $0x58] sm:$0xff] }
 0x163   : > { %760 = vst.msk [vmem:[%s2805_s17 + $0x78] sm:$0xff] %vm329_vm6, %v744_v56  ;;  %2332 = vmatmul.msk.f32.gmra.mxu3 %vm221_vm0, %v1603_v54  ;;  %v2032_v56 = vld [vmem:[#allocation4 + $0x38] sm:$0xff] }
 0x164   : > { %2324 = vmatmul.msk.f32.gmra.mxu2 %vm221_vm0, %v1603_v54  ;;  %2070 = vperm.xlu1 %2569, %v2032_v56  }
 0x166   : > { %v900_v57 = vpop.f32.mrf.mxu3  ;;  %v1108_v60 = vpop.f32.mrf.mxu1 }
 0x167   : > { %v940_v61 = vadd.f32 %v924_v59, %v900_v57  ;;  %v859_v62 = vpop.f32.mrf.mxu2  ;;  %v1067_v63 = vpop.f32.mrf.mxu0 }
 0x168   : > { %v939_v1 = vadd.f32 %v859_v62, %v2900_v10  ;;  %v1130_v11 = vld [vmem:[%s2805_s17 + $0x8] sm:$0xff] }
 0x169   : > { %956 = vst.msk [vmem:[%s2805_s17 + $0x18] sm:$0xff] %vm329_vm6, %v940_v61  ;;  %v1146_v5 = vadd.f32 %v1130_v11, %v1105_v40  ;;  %2348 = vmatmul.msk.f32.gmra.mxu1 %vm221_vm0, %v1811_v0  ;;  %v2031_v40 = vld [vmem:[#allocation4 + $0x30] sm:$0xff] }
 0x16a   : > { %v3008_v6 = vadd.f32 %v1067_v63, %v939_v1  ;;  %2340 = vmatmul.msk.f32.gmra.mxu0 %vm221_vm0, %v1811_v0  ;;  %2065 = vperm.xlu0 %2568, %v2031_v40   ;;  %v934_v63 = vld [vmem:[%s2805_s17 + $0x68] sm:$0xff] }
 0x16b   : > { %1162 = vst.msk [vmem:[%s2805_s17 + $0x8] sm:$0xff] %vm329_vm6, %v1146_v5  ;;  %2333 = vmatmul.msk.f32.gmra.mxu3 %vm221_vm0, %v1604_v3 }
 0x16c   : > { %2325 = vmatmul.msk.f32.gmra.mxu2 %vm221_vm0, %v1604_v3 }
 0x16e   : > { %v903_v10 = vpop.f32.mrf.mxu3  ;;  %v1111_v8 = vpop.f32.mrf.mxu1 }
 0x16f   : > { %v942_v9 = vadd.f32 %v926_v7, %v903_v10  ;;  %v862_v12 = vpop.f32.mrf.mxu2  ;;  %v1070_v13 = vpop.f32.mrf.mxu0  ;;  %v1609_v7 = vld [vmem:[#allocation2 + $0x1f8] sm:$0xff] }
 0x170   : > { %v941_v15 = vadd.f32 %v862_v12, %v2914_v28  ;;  %v1132_v20 = vld [vmem:[%s2805_s17 + $0x18] sm:$0xff] }
 0x171   : > { %958 = vst.msk [vmem:[%s2805_s17 + $0x28] sm:$0xff] %vm329_vm6, %v942_v9  ;;  %v1148_v19 = vadd.f32 %v1132_v20, %v1108_v60  ;;  %2349 = vmatmul.msk.f32.gmra.mxu1 %vm221_vm0, %v1812_v14  ;;  %v1608_v60 = vld [vmem:[#allocation2 + $0x1f0] sm:$0xff] }
 0x172   : > { %v3021_v21 = vadd.f32 %v1070_v13, %v941_v15  ;;  %2341 = vmatmul.msk.f32.gmra.mxu0 %vm221_vm0, %v1812_v14  ;;  %v936_v13 = vld [vmem:[%s2805_s17 + $0x78] sm:$0xff] }
 0x173   : > { %1164 = vst.msk [vmem:[%s2805_s17 + $0x18] sm:$0xff] %vm329_vm6, %v1148_v19  ;;  %2334 = vmatmul.msk.f32.gmra.mxu3 %vm221_vm0, %v1605_v17 }
 0x174   : > { %2326 = vmatmul.msk.f32.gmra.mxu2 %vm221_vm0, %v1605_v17 }
 0x176   : > { %v906_v28 = vpop.f32.mrf.mxu3  ;;  %v1114_v23 = vpop.f32.mrf.mxu1 }
 0x177   : > { %v944_v24 = vadd.f32 %v928_v22, %v906_v28  ;;  %v865_v25 = vpop.f32.mrf.mxu2  ;;  %v1073_v26 = vpop.f32.mrf.mxu0 }
 0x178   : > { %v943_v29 = vadd.f32 %v865_v25, %v2928_v47  ;;  %v1134_v31 = vld [vmem:[%s2805_s17 + $0x28] sm:$0xff] }
 0x179   : > { %960 = vst.msk [vmem:[%s2805_s17 + $0x38] sm:$0xff] %vm329_vm6, %v944_v24  ;;  %v1150_v33 = vadd.f32 %v1134_v31, %v1111_v8  ;;  %2350 = vmatmul.msk.f32.gmra.mxu1 %vm221_vm0, %v1813_v27  ;;  %v2030_v8 = vld [vmem:[#allocation4 + $0x28] sm:$0xff] }
 0x17a   : > { %v3034_v34 = vadd.f32 %v1073_v26, %v943_v29  ;;  %2342 = vmatmul.msk.f32.gmra.mxu0 %vm221_vm0, %v1813_v27  ;;  %2060 = vperm.xlu2 %2567, %v2030_v8   ;;  %v1338_v25 = vld [vmem:[%s2805_s17 + $0x8] sm:$0xff] }
 0x17b   : > { %1166 = vst.msk [vmem:[%s2805_s17 + $0x28] sm:$0xff] %vm329_vm6, %v1150_v33  ;;  %2335 = vmatmul.msk.f32.gmra.mxu3 %vm221_vm0, %v1606_v32 }
 0x17c   : > { %2327 = vmatmul.msk.f32.gmra.mxu2 %vm221_vm0, %v1606_v32 }
 0x17e   : > { %v909_v47 = vpop.f32.mrf.mxu3  ;;  %v1117_v36 = vpop.f32.mrf.mxu1 }
 0x17f   : > { %v946_v37 = vadd.f32 %v930_v35, %v909_v47  ;;  %v868_v38 = vpop.f32.mrf.mxu2  ;;  %v1076_v42 = vpop.f32.mrf.mxu0  ;;  %v1340_v47 = vld [vmem:[%s2805_s17 + $0x18] sm:$0xff] }
 0x180   : > { %v945_v44 = vadd.f32 %v868_v38, %v2942_v2  ;;  %v1136_v39 = vld [vmem:[%s2805_s17 + $0x38] sm:$0xff] }
 0x181   : > { %962 = vst.msk [vmem:[%s2805_s17 + $0x48] sm:$0xff] %vm329_vm6, %v946_v37  ;;  %v1152_v48 = vadd.f32 %v1136_v39, %v1114_v23  ;;  %2351 = vmatmul.msk.f32.gmra.mxu1 %vm221_vm0, %v1814_v43 }
 0x182   : > { %v3047_v49 = vadd.f32 %v1076_v42, %v945_v44  ;;  %2343 = vmatmul.msk.f32.gmra.mxu0 %vm221_vm0, %v1814_v43  ;;  %v1342_v44 = vld [vmem:[%s2805_s17 + $0x28] sm:$0xff] }
 0x183   : > { %1168 = vst.msk [vmem:[%s2805_s17 + $0x38] sm:$0xff] %vm329_vm6, %v1152_v48  ;;  %2336 = vmatmul.msk.f32.gmra.mxu3 %vm221_vm0, %v1607_v41 }
 0x184   : > { %2328 = vmatmul.msk.f32.gmra.mxu2 %vm221_vm0, %v1607_v41 }
 0x186   : > { %v912_v2 = vpop.f32.mrf.mxu3  ;;  %v1120_v51 = vpop.f32.mrf.mxu1 }
 0x187   : > { %v948_v52 = vadd.f32 %v932_v50, %v912_v2  ;;  %v871_v53 = vpop.f32.mrf.mxu2  ;;  %v1079_v54 = vpop.f32.mrf.mxu0 }
 0x188   : > { %v947_v57 = vadd.f32 %v871_v53, %v2956_v16  ;;  %v1138_v59 = vld [vmem:[%s2805_s17 + $0x48] sm:$0xff] }
 0x189   : > { %964 = vst.msk [vmem:[%s2805_s17 + $0x58] sm:$0xff] %vm329_vm6, %v948_v52  ;;  %v1154_v61 = vadd.f32 %v1138_v59, %v1117_v36  ;;  %2352 = vmatmul.msk.f32.gmra.mxu1 %vm221_vm0, %v1815_v55 }
 0x18a   : > { %v3060_v62 = vadd.f32 %v1079_v54, %v947_v57  ;;  %2344 = vmatmul.msk.f32.gmra.mxu0 %vm221_vm0, %v1815_v55  ;;  %v1344_v52 = vld [vmem:[%s2805_s17 + $0x38] sm:$0xff] }
 0x18b   : > { %1170 = vst.msk [vmem:[%s2805_s17 + $0x48] sm:$0xff] %vm329_vm6, %v1154_v61  ;;  %2337 = vmatmul.msk.f32.gmra.mxu3 %vm221_vm0, %v1608_v60 }
 0x18c   : > { %2329 = vmatmul.msk.f32.gmra.mxu2 %vm221_vm0, %v1608_v60 }
 0x18e   : > { %v915_v16 = vpop.f32.mrf.mxu3  ;;  %v1123_v0 = vpop.f32.mrf.mxu1 }
 0x18f   : > { %v950_v1 = vadd.f32 %v934_v63, %v915_v16  ;;  %v874_v11 = vpop.f32.mrf.mxu2  ;;  %v1082_v3 = vpop.f32.mrf.mxu0 }
 0x190   : > { %v949_v5 = vadd.f32 %v874_v11, %v2969_v30  ;;  %v1140_v10 = vld [vmem:[%s2805_s17 + $0x58] sm:$0xff] }
 0x191   : > { %966 = vst.msk [vmem:[%s2805_s17 + $0x68] sm:$0xff] %vm329_vm6, %v950_v1  ;;  %v1156_v9 = vadd.f32 %v1140_v10, %v1120_v51  ;;  %2353 = vmatmul.msk.f32.gmra.mxu1 %vm221_vm0, %v1816_v4 }
 0x192   : > { %v3073_v12 = vadd.f32 %v1082_v3, %v949_v5  ;;  %2345 = vmatmul.msk.f32.gmra.mxu0 %vm221_vm0, %v1816_v4  ;;  %v1346_v61 = vld [vmem:[%s2805_s17 + $0x48] sm:$0xff] }
 0x193   : > { %1172 = vst.msk [vmem:[%s2805_s17 + $0x58] sm:$0xff] %vm329_vm6, %v1156_v9  ;;  %2338 = vmatmul.msk.f32.gmra.mxu3 %vm221_vm0, %v1609_v7 }
 0x194   : > { %2330 = vmatmul.msk.f32.gmra.mxu2 %vm221_vm0, %v1609_v7 }
 0x196   : > { %v918_v30 = vpop.f32.mrf.mxu3  ;;  %v1126_v14 = vpop.f32.mrf.mxu1 }
 0x197   : > { %v952_v15 = vadd.f32 %v936_v13, %v918_v30  ;;  %v877_v20 = vpop.f32.mrf.mxu2  ;;  %v1085_v17 = vpop.f32.mrf.mxu0 }
 0x198   : > { %v951_v19 = vadd.f32 %v877_v20, %v2982_v45  ;;  %v1142_v28 = vld [vmem:[%s2805_s17 + $0x68] sm:$0xff] }
 0x199   : > { %968 = vst.msk [vmem:[%s2805_s17 + $0x78] sm:$0xff] %vm329_vm6, %v952_v15  ;;  %v1158_v22 = vadd.f32 %v1142_v28, %v1123_v0  ;;  %2354 = vmatmul.msk.f32.gmra.mxu1 %vm221_vm0, %v1817_v18 }
 0x19a   : > { %v3086_v23 = vadd.f32 %v1085_v17, %v951_v19  ;;  %2346 = vmatmul.msk.f32.gmra.mxu0 %vm221_vm0, %v1817_v18  ;;  %v1348_v5 = vld [vmem:[%s2805_s17 + $0x58] sm:$0xff] }
 0x19b   : > { %1174 = vst.msk [vmem:[%s2805_s17 + $0x68] sm:$0xff] %vm329_vm6, %v1158_v22 }
 0x19e   : > { %v1313_v24 = vpop.f32.mrf.mxu3  ;;  %v1521_v26 = vpop.f32.mrf.mxu1 }
 0x19f   : > { %v1354_v45 = vadd.f32 %v1338_v25, %v1313_v24  ;;  %v3092_v27 = vpop.f32.mrf.mxu2  ;;  %v3094_v29 = vpop.f32.mrf.mxu0 }
 0x1a0   : > { %v1144_v31 = vld [vmem:[%s2805_s17 + $0x78] sm:$0xff] }
 0x1a1   : > { %1370 = vst.msk [vmem:[%s2805_s17 + $0x8] sm:$0xff] %vm329_vm6, %v1354_v45  ;;  %v1160_v32 = vadd.f32 %v1144_v31, %v1126_v14 }
 0x1a2   : > { %v1350_v15 = vld [vmem:[%s2805_s17 + $0x68] sm:$0xff] }
 0x1a3   : > { %1176 = vst.msk [vmem:[%s2805_s17 + $0x78] sm:$0xff] %vm329_vm6, %v1160_v32 }
 0x1a6   : > { %v1316_v33 = vpop.f32.mrf.mxu3  ;;  %v1524_v35 = vpop.f32.mrf.mxu1 }
 0x1a7   : > { %v1356_v36 = vadd.f32 %v1340_v47, %v1316_v33  ;;  %v3102_v37 = vpop.f32.mrf.mxu2  ;;  %v3104_v38 = vpop.f32.mrf.mxu0 }
 0x1a8   : > { %v1546_v41 = vld [vmem:[%s2805_s17 + $0x8] sm:$0xff] }
 0x1a9   : > { %1372 = vst.msk [vmem:[%s2805_s17 + $0x18] sm:$0xff] %vm329_vm6, %v1356_v36  ;;  %v1562_v42 = vadd.f32 %v1546_v41, %v1521_v26 }
 0x1aa   : > { %v1352_v25 = vld [vmem:[%s2805_s17 + $0x78] sm:$0xff] }
 0x1ab   : > { %1578 = vst.msk [vmem:[%s2805_s17 + $0x8] sm:$0xff] %vm329_vm6, %v1562_v42 }
 0x1ae   : > { %v1319_v43 = vpop.f32.mrf.mxu3  ;;  %v1527_v39 = vpop.f32.mrf.mxu1 }
 0x1af   : > { %v1358_v46 = vadd.f32 %v1342_v44, %v1319_v43  ;;  %v3112_v40 = vpop.f32.mrf.mxu2  ;;  %v3114_v48 = vpop.f32.mrf.mxu0 }
 0x1b0   : > { %v1548_v2 = vld [vmem:[%s2805_s17 + $0x18] sm:$0xff] }
 0x1b1   : > { %1374 = vst.msk [vmem:[%s2805_s17 + $0x28] sm:$0xff] %vm329_vm6, %v1358_v46  ;;  %v1564_v50 = vadd.f32 %v1548_v2, %v1524_v35  ;;  %v1353_v35 = vadd.f32 %v3092_v27, %v2995_v58  ;;  %v2036_v58 = vpop.permute.xlu2 %2035  ;;  %v1355_v27 = vadd.f32 %v3102_v37, %v3008_v6  ;;  %v2041_v37 = vpop.permute.xlu0 %2040 }
 0x1b2   : > { %v1754_v42 = vld [vmem:[%s2805_s17 + $0x8] sm:$0xff] }
 0x1b3   : > { %1580 = vst.msk [vmem:[%s2805_s17 + $0x18] sm:$0xff] %vm329_vm6, %v1564_v50  ;;  %v1561_v36 = vadd.f32 %v3094_v29, %v1353_v35 }
 0x1b6   : > { %v1322_v51 = vpop.f32.mrf.mxu3  ;;  %v1530_v53 = vpop.f32.mrf.mxu1 }
 0x1b7   : > { %v1360_v54 = vadd.f32 %v1344_v52, %v1322_v51  ;;  %v3122_v55 = vpop.f32.mrf.mxu2  ;;  %v3124_v56 = vpop.f32.mrf.mxu0 }
 0x1b8   : > { %v1550_v57 = vld [vmem:[%s2805_s17 + $0x28] sm:$0xff] }
 0x1b9   : > { %1376 = vst.msk [vmem:[%s2805_s17 + $0x38] sm:$0xff] %vm329_vm6, %v1360_v54  ;;  %v1566_v59 = vadd.f32 %v1550_v57, %v1527_v39 }
 0x1ba   : > { %v1756_v57 = vld [vmem:[%s2805_s17 + $0x18] sm:$0xff] }
 0x1bb   : > { %1582 = vst.msk [vmem:[%s2805_s17 + $0x28] sm:$0xff] %vm329_vm6, %v1566_v59 }
 0x1be   : > { %v1325_v60 = vpop.f32.mrf.mxu3  ;;  %v1533_v16 = vpop.f32.mrf.mxu1 }
 0x1bf   : > { %v1362_v63 = vadd.f32 %v1346_v61, %v1325_v60  ;;  %v3132_v0 = vpop.f32.mrf.mxu2  ;;  %v3134_v1 = vpop.f32.mrf.mxu0 }
 0x1c0   : > { %v1552_v11 = vld [vmem:[%s2805_s17 + $0x38] sm:$0xff] }
 0x1c1   : > { %1378 = vst.msk [vmem:[%s2805_s17 + $0x48] sm:$0xff] %vm329_vm6, %v1362_v63  ;;  %v1568_v3 = vadd.f32 %v1552_v11, %v1530_v53  ;;  %v1563_v53 = vadd.f32 %v3104_v38, %v1355_v27  ;;  %v1357_v38 = vadd.f32 %v3112_v40, %v3021_v21  ;;  %v2046_v40 = vpop.permute.xlu1 %2045 }
 0x1c3   : > { %1584 = vst.msk [vmem:[%s2805_s17 + $0x38] sm:$0xff] %vm329_vm6, %v1568_v3 }
 0x1c6   : > { %v1328_v4 = vpop.f32.mrf.mxu3  ;;  %v1536_v10 = vpop.f32.mrf.mxu1 }
 0x1c7   : > { %v1364_v7 = vadd.f32 %v1348_v5, %v1328_v4  ;;  %v3142_v8 = vpop.f32.mrf.mxu2  ;;  %v3144_v9 = vpop.f32.mrf.mxu0 }
 0x1c8   : > { %v1554_v30 = vld [vmem:[%s2805_s17 + $0x48] sm:$0xff] }
 0x1c9   : > { %1380 = vst.msk [vmem:[%s2805_s17 + $0x58] sm:$0xff] %vm329_vm6, %v1364_v7  ;;  %v1570_v13 = vadd.f32 %v1554_v30, %v1533_v16  ;;  %v1758_v30 = vld [vmem:[%s2805_s17 + $0x28] sm:$0xff] }
 0x1cb   : > { %1586 = vst.msk [vmem:[%s2805_s17 + $0x48] sm:$0xff] %vm329_vm6, %v1570_v13 }
 0x1ce   : > { %v1331_v14 = vpop.f32.mrf.mxu3  ;;  %v1539_v20 = vpop.f32.mrf.mxu1 }
 0x1cf   : > { %v1366_v17 = vadd.f32 %v1350_v15, %v1331_v14  ;;  %v3152_v18 = vpop.f32.mrf.mxu2  ;;  %v3154_v19 = vpop.f32.mrf.mxu0 }
 0x1d0   : > { %v1556_v28 = vld [vmem:[%s2805_s17 + $0x58] sm:$0xff] }
 0x1d1   : > { %1382 = vst.msk [vmem:[%s2805_s17 + $0x68] sm:$0xff] %vm329_vm6, %v1366_v17  ;;  %v1572_v22 = vadd.f32 %v1556_v28, %v1536_v10  ;;  %v1565_v10 = vadd.f32 %v3114_v48, %v1357_v38  ;;  %v1359_v48 = vadd.f32 %v3122_v55, %v3034_v34 }
 0x1d3   : > { %1588 = vst.msk [vmem:[%s2805_s17 + $0x58] sm:$0xff] %vm329_vm6, %v1572_v22 }
 0x1d6   : > { %v1334_v24 = vpop.f32.mrf.mxu3  ;;  %v1542_v26 = vpop.f32.mrf.mxu1 }
 0x1d7   : > { %v1368_v45 = vadd.f32 %v1352_v25, %v1334_v24  ;;  %v3162_v31 = vpop.f32.mrf.mxu2  ;;  %v3164_v32 = vpop.f32.mrf.mxu0 }
 0x1d8   : > { %v1558_v33 = vld [vmem:[%s2805_s17 + $0x68] sm:$0xff] }
 0x1d9   : > { %1384 = vst.msk [vmem:[%s2805_s17 + $0x78] sm:$0xff] %vm329_vm6, %v1368_v45  ;;  %v1574_v47 = vadd.f32 %v1558_v33, %v1539_v20 }
 0x1db   : > { %1590 = vst.msk [vmem:[%s2805_s17 + $0x68] sm:$0xff] %vm329_vm6, %v1574_v47  ;;  %v1567_v47 = vadd.f32 %v3124_v56, %v1359_v48  ;;  %v2051_v56 = vpop.permute.xlu2 %2050 }
 0x1de   : > { %v1729_v41 = vpop.f32.mrf.mxu3  ;;  %v1937_v43 = vpop.f32.mrf.mxu1 }
 0x1df   : > { %v1770_v44 = vadd.f32 %v1754_v42, %v1729_v41  ;;  %v1688_v39 = vpop.f32.mrf.mxu2  ;;  %v1896_v46 = vpop.f32.mrf.mxu0 }
 0x1e0   : > { %v1769_v2 = vadd.f32 %v1688_v39, %v1561_v36  ;;  %v1560_v50 = vld [vmem:[%s2805_s17 + $0x78] sm:$0xff] }
 0x1e1   : > { %1786 = vst.msk [vmem:[%s2805_s17 + $0x8] sm:$0xff] %vm329_vm6, %v1770_v44  ;;  %v1576_v51 = vadd.f32 %v1560_v50, %v1542_v26  ;;  %v1760_v36 = vld [vmem:[%s2805_s17 + $0x38] sm:$0xff] }
 0x1e2   : > { %v1977_v29 = vadd.f32 %v1896_v46, %v1769_v2  ;;  %v1361_v2 = vadd.f32 %v3132_v0, %v3047_v49 }
 0x1e3   : > { %1592 = vst.msk [vmem:[%s2805_s17 + $0x78] sm:$0xff] %vm329_vm6, %v1576_v51 }
 0x1e4   : > { %v2073_v52 = vadd.f32 %v2036_v58, %v1977_v29 }
 0x1e6   : > { %v1732_v54 = vpop.f32.mrf.mxu3  ;;  %v1940_v59 = vpop.f32.mrf.mxu1  ;;  %v2089_v60 = vmax.f32 %v2073_v52, 0.0  ;;  %v1569_v52 = vadd.f32 %v3134_v1, %v1361_v2 }
 0x1e7   : > { %v1772_v61 = vadd.f32 %v1756_v57, %v1732_v54  ;;  %v1691_v16 = vpop.f32.mrf.mxu2  ;;  %v1899_v63 = vpop.f32.mrf.mxu0  ;;  %v1762_v54 = vld [vmem:[%s2805_s17 + $0x48] sm:$0xff] }
 0x1e8   : > { %v1771_v11 = vadd.f32 %v1691_v16, %v1563_v53  ;;  %v1962_v3 = vld [vmem:[%s2805_s17 + $0x8] sm:$0xff]  ;;  %2105 = vst [vmem:[%s2805_s17] sm:$0xff] %v2089_v60  ;;  %v2056_v1 = vpop.permute.xlu1 %2055 }
 0x1e9   : > { %1788 = vst.msk [vmem:[%s2805_s17 + $0x18] sm:$0xff] %vm329_vm6, %v1772_v61  ;;  %v1978_v6 = vadd.f32 %v1962_v3, %v1937_v43 }
 0x1ea   : > { %v1979_v4 = vadd.f32 %v1899_v63, %v1771_v11  ;;  %v1363_v11 = vadd.f32 %v3142_v8, %v3060_v62 }
 0x1eb   : > { %1994 = vst.msk [vmem:[%s2805_s17 + $0x8] sm:$0xff] %vm329_vm6, %v1978_v6 }
 0x1ec   : > { %v2075_v5 = vadd.f32 %v2041_v37, %v1979_v4 }
 0x1ee   : > { %v1735_v7 = vpop.f32.mrf.mxu3  ;;  %v1943_v13 = vpop.f32.mrf.mxu1  ;;  %v2091_v14 = vmax.f32 %v2075_v5, 0.0  ;;  %v1571_v5 = vadd.f32 %v3144_v9, %v1363_v11  ;;  %v1365_v9 = vadd.f32 %v3152_v18, %v3073_v12 }
 0x1ef   : > { %v1774_v15 = vadd.f32 %v1758_v30, %v1735_v7  ;;  %v1694_v20 = vpop.f32.mrf.mxu2  ;;  %v1902_v17 = vpop.f32.mrf.mxu0  ;;  %v1764_v7 = vld [vmem:[%s2805_s17 + $0x58] sm:$0xff] }
 0x1f0   : > { %v1773_v28 = vadd.f32 %v1694_v20, %v1565_v10  ;;  %v1964_v22 = vld [vmem:[%s2805_s17 + $0x18] sm:$0xff]  ;;  %2107 = vst [vmem:[%s2805_s17 + $0x10] sm:$0xff] %v2091_v14 }
 0x1f1   : > { %1790 = vst.msk [vmem:[%s2805_s17 + $0x28] sm:$0xff] %vm329_vm6, %v1774_v15  ;;  %v1980_v21 = vadd.f32 %v1964_v22, %v1940_v59 }
 0x1f2   : > { %v2010_v24 = vld [vmem:[%s2805_s17 + $0x8] sm:$0xff]  ;;  %v1981_v25 = vadd.f32 %v1902_v17, %v1773_v28  ;;  %v2061_v17 = vpop.permute.xlu2 %2060 }
 0x1f3   : > { %1996 = vst.msk [vmem:[%s2805_s17 + $0x18] sm:$0xff] %vm329_vm6, %v1980_v21  ;;  %v2074_v26 = vadd.f32 %v2036_v58, %v2010_v24 }
 0x1f4   : > { %v2077_v45 = vadd.f32 %v2046_v40, %v1981_v25  ;;  %v1573_v25 = vadd.f32 %v3154_v19, %v1365_v9  ;;  %v1367_v19 = vadd.f32 %v3162_v31, %v3086_v23 }
 0x1f5   : > { %v2090_v33 = vmax.f32 %v2074_v26, 0.0 }
 0x1f6   : > { %v1738_v35 = vpop.f32.mrf.mxu3  ;;  %v1946_v41 = vpop.f32.mrf.mxu1  ;;  %v2093_v42 = vmax.f32 %v2077_v45, 0.0  ;;  %v1766_v45 = vld [vmem:[%s2805_s17 + $0x68] sm:$0xff] }
 0x1f7   : > { %2106 = vst.msk [vmem:[%s2805_s17 + $0x8] sm:$0xff] %vm329_vm6, %v2090_v33  ;;  %v1776_v34 = vadd.f32 %v1760_v36, %v1738_v35  ;;  %v1697_v55 = vpop.f32.mrf.mxu2  ;;  %v1905_v43 = vpop.f32.mrf.mxu0 }
 0x1f8   : > { %v1775_v44 = vadd.f32 %v1697_v55, %v1567_v47  ;;  %v1966_v39 = vld [vmem:[%s2805_s17 + $0x28] sm:$0xff]  ;;  %2109 = vst [vmem:[%s2805_s17 + $0x20] sm:$0xff] %v2093_v42  ;;  %v2066_v42 = vpop.permute.xlu0 %2065 }
 0x1f9   : > { %1792 = vst.msk [vmem:[%s2805_s17 + $0x38] sm:$0xff] %vm329_vm6, %v1776_v34  ;;  %v1982_v46 = vadd.f32 %v1966_v39, %v1943_v13 }
 0x1fa   : > { %v2012_v50 = vld [vmem:[%s2805_s17 + $0x18] sm:$0xff]  ;;  %v1983_v51 = vadd.f32 %v1905_v43, %v1775_v44 }
 0x1fb   : > { %1998 = vst.msk [vmem:[%s2805_s17 + $0x28] sm:$0xff] %vm329_vm6, %v1982_v46  ;;  %v2076_v58 = vadd.f32 %v2041_v37, %v2012_v50  ;;  %v1768_v50 = vld [vmem:[%s2805_s17 + $0x78] sm:$0xff] }
 0x1fc   : > { %v2079_v27 = vadd.f32 %v2051_v56, %v1983_v51 }
 0x1fd   : > { %v2092_v29 = vmax.f32 %v2076_v58, 0.0 }
 0x1fe   : > { %v1741_v53 = vpop.f32.mrf.mxu3  ;;  %v2095_v57 = vmax.f32 %v2079_v27, 0.0  ;;  %v1949_v16 = vpop.f32.mrf.mxu1 }
 0x1ff   : > { %2108 = vst.msk [vmem:[%s2805_s17 + $0x18] sm:$0xff] %vm329_vm6, %v2092_v29  ;;  %v1778_v49 = vadd.f32 %v1762_v54, %v1741_v53  ;;  %v1700_v0 = vpop.f32.mrf.mxu2  ;;  %v1908_v59 = vpop.f32.mrf.mxu0 }
 0x200   : > { %v1777_v60 = vadd.f32 %v1700_v0, %v1569_v52  ;;  %v1968_v61 = vld [vmem:[%s2805_s17 + $0x38] sm:$0xff]  ;;  %2111 = vst [vmem:[%s2805_s17 + $0x30] sm:$0xff] %v2095_v57  ;;  %v2071_v52 = vpop.permute.xlu1 %2070 }
 0x201   : > { %1794 = vst.msk [vmem:[%s2805_s17 + $0x48] sm:$0xff] %vm329_vm6, %v1778_v49  ;;  %v1984_v63 = vadd.f32 %v1968_v61, %v1946_v41 }
 0x202   : > { %v2014_v3 = vld [vmem:[%s2805_s17 + $0x28] sm:$0xff]  ;;  %v1985_v6 = vadd.f32 %v1908_v59, %v1777_v60 }
 0x203   : > { %2000 = vst.msk [vmem:[%s2805_s17 + $0x38] sm:$0xff] %vm329_vm6, %v1984_v63  ;;  %v2078_v37 = vadd.f32 %v2046_v40, %v2014_v3 }
 0x204   : > { %v2081_v38 = vadd.f32 %v2056_v1, %v1985_v6 }
 0x205   : > { %v2094_v4 = vmax.f32 %v2078_v37, 0.0 }
 0x206   : > { %v1744_v10 = vpop.f32.mrf.mxu3  ;;  %v2097_v30 = vmax.f32 %v2081_v38, 0.0  ;;  %v1952_v22 = vpop.f32.mrf.mxu1 }
 0x207   : > { %2110 = vst.msk [vmem:[%s2805_s17 + $0x28] sm:$0xff] %vm329_vm6, %v2094_v4  ;;  %v1780_v62 = vadd.f32 %v1764_v7, %v1744_v10  ;;  %v1703_v8 = vpop.f32.mrf.mxu2  ;;  %v1911_v13 = vpop.f32.mrf.mxu0 }
 0x208   : > { %v1779_v14 = vadd.f32 %v1703_v8, %v1571_v5  ;;  %v1970_v15 = vld [vmem:[%s2805_s17 + $0x48] sm:$0xff]  ;;  %2113 = vst [vmem:[%s2805_s17 + $0x40] sm:$0xff] %v2097_v30 }
 0x209   : > { %1796 = vst.msk [vmem:[%s2805_s17 + $0x58] sm:$0xff] %vm329_vm6, %v1780_v62  ;;  %v1986_v20 = vadd.f32 %v1970_v15, %v1949_v16 }
 0x20a   : > { %v2016_v28 = vld [vmem:[%s2805_s17 + $0x38] sm:$0xff]  ;;  %v1987_v21 = vadd.f32 %v1911_v13, %v1779_v14 }
 0x20b   : > { %2002 = vst.msk [vmem:[%s2805_s17 + $0x48] sm:$0xff] %vm329_vm6, %v1986_v20  ;;  %v2080_v40 = vadd.f32 %v2051_v56, %v2016_v28  ;;  %v1575_v56 = vadd.f32 %v3164_v32, %v1367_v19 }
 0x20c   : > { %v2083_v48 = vadd.f32 %v2061_v17, %v1987_v21 }
 0x20d   : > { %v2096_v24 = vmax.f32 %v2080_v40, 0.0 }
 0x20e   : > { %v1747_v26 = vpop.f32.mrf.mxu3  ;;  %v2099_v33 = vmax.f32 %v2083_v48, 0.0  ;;  %v1955_v44 = vpop.f32.mrf.mxu1 }
 0x20f   : > { %2112 = vst.msk [vmem:[%s2805_s17 + $0x38] sm:$0xff] %vm329_vm6, %v2096_v24  ;;  %v1782_v12 = vadd.f32 %v1766_v45, %v1747_v26  ;;  %v1706_v18 = vpop.f32.mrf.mxu2  ;;  %v1914_v47 = vpop.f32.mrf.mxu0 }
 0x210   : > { %v1781_v35 = vadd.f32 %v1706_v18, %v1573_v25  ;;  %v1972_v36 = vld [vmem:[%s2805_s17 + $0x58] sm:$0xff]  ;;  %2115 = vst [vmem:[%s2805_s17 + $0x50] sm:$0xff] %v2099_v33 }
 0x211   : > { %1798 = vst.msk [vmem:[%s2805_s17 + $0x68] sm:$0xff] %vm329_vm6, %v1782_v12  ;;  %v1988_v41 = vadd.f32 %v1972_v36, %v1952_v22 }
 0x212   : > { %v2018_v34 = vld [vmem:[%s2805_s17 + $0x48] sm:$0xff]  ;;  %v1989_v55 = vadd.f32 %v1914_v47, %v1781_v35 }
 0x213   : > { %2004 = vst.msk [vmem:[%s2805_s17 + $0x58] sm:$0xff] %vm329_vm6, %v1988_v41  ;;  %v2082_v43 = vadd.f32 %v2056_v1, %v2018_v34 }
 0x214   : > { %v2085_v39 = vadd.f32 %v2066_v42, %v1989_v55 }
 0x215   : > { %v2098_v46 = vmax.f32 %v2082_v43, 0.0 }
 0x216   : > { %v1750_v2 = vpop.f32.mrf.mxu3  ;;  %v2101_v51 = vmax.f32 %v2085_v39, 0.0  ;;  %v1958_v59 = vpop.f32.mrf.mxu1 }
 0x217   : > { %2114 = vst.msk [vmem:[%s2805_s17 + $0x48] sm:$0xff] %vm329_vm6, %v2098_v46  ;;  %v1784_v23 = vadd.f32 %v1768_v50, %v1750_v2  ;;  %v1709_v31 = vpop.f32.mrf.mxu2  ;;  %v1917_v58 = vpop.f32.mrf.mxu0 }
 0x218   : > { %v1783_v27 = vadd.f32 %v1709_v31, %v1575_v56  ;;  %v1974_v29 = vld [vmem:[%s2805_s17 + $0x68] sm:$0xff]  ;;  %2117 = vst [vmem:[%s2805_s17 + $0x60] sm:$0xff] %v2101_v51 }
 0x219   : > { %1800 = vst.msk [vmem:[%s2805_s17 + $0x78] sm:$0xff] %vm329_vm6, %v1784_v23  ;;  %v1990_v32 = vadd.f32 %v1974_v29, %v1955_v44 }
 0x21a   : > { %v2020_v53 = vld [vmem:[%s2805_s17 + $0x58] sm:$0xff]  ;;  %v1991_v54 = vadd.f32 %v1917_v58, %v1783_v27 }
 0x21b   : > { %2006 = vst.msk [vmem:[%s2805_s17 + $0x68] sm:$0xff] %vm329_vm6, %v1990_v32  ;;  %v2084_v57 = vadd.f32 %v2061_v17, %v2020_v53 }
 0x21c   : > { %v2087_v49 = vadd.f32 %v2071_v52, %v1991_v54 }
 0x21d   : > { %v2100_v0 = vmax.f32 %v2084_v57, 0.0 }
 0x21e   : > { %v2103_v60 = vmax.f32 %v2087_v49, 0.0 }
 0x21f   : > { %2116 = vst.msk [vmem:[%s2805_s17 + $0x58] sm:$0xff] %vm329_vm6, %v2100_v0 }
 0x220   : > { %v1976_v61 = vld [vmem:[%s2805_s17 + $0x78] sm:$0xff]  ;;  %2119 = vst [vmem:[%s2805_s17 + $0x70] sm:$0xff] %v2103_v60 }
 0x221   : > { %v1992_v16 = vadd.f32 %v1976_v61, %v1958_v59 }
 0x222   : > { %v2022_v63 = vld [vmem:[%s2805_s17 + $0x68] sm:$0xff] }
 0x223   : > { %2008 = vst.msk [vmem:[%s2805_s17 + $0x78] sm:$0xff] %vm329_vm6, %v1992_v16  ;;  %v2086_v1 = vadd.f32 %v2066_v42, %v2022_v63 }
 0x225   : > { %v2102_v11 = vmax.f32 %v2086_v1, 0.0 }
 0x227   : > { %2118 = vst.msk [vmem:[%s2805_s17 + $0x68] sm:$0xff] %vm329_vm6, %v2102_v11 }
 0x22a   : > { %v2024_v3 = vld [vmem:[%s2805_s17 + $0x78] sm:$0xff] }
 0x22b   : > { %v2088_v6 = vadd.f32 %v2071_v52, %v2024_v3 }
 0x22d   : > { %v2104_v37 = vmax.f32 %v2088_v6, 0.0 }
 0x22f   : > { %2120 = vst.msk [vmem:[%s2805_s17 + $0x78] sm:$0xff] %vm329_vm6, %v2104_v37 }
 0x230 PF: > { %s15_s12 = sadd.s32 1, %s2644_s12  }
 0x231   : > { %p12_p7 = scmp.ge.s32.totalorder %s15_s12, 4  }
 0x233   :  { %14 = sbr.rel (!%p12_p7) target bundleno = 2 (0x2), region = 79 }
 0x238   :  { %2142 = vsyncpa [#allocation3], 1 }
 0x239   :  { %2144 = vsyncpa [#allocation3 + $0x1], 1 }
 0x23a   :  { %2145 = vsyncpa [#allocation5], 1 }

</bundles_post_ra>
